<compile_context>
chip_gen: v7x
topology: tpu7x:2x2x1
jax: 0.10.0
libtpu: 0.0.40
codegen_flags: <defaults>
</compile_context>

<pallas_src>
import jax
import jax.numpy as jnp
from jax.experimental import pallas as pl
from jax.experimental.pallas import tpu as pltpu


def _stack_kernel(x_ref, w1_ref, w2_ref, o_ref, cur_ref, pad_ref):
    # x_ref  : (1, H, W, C)       input image (f32)
    # w1_ref : (nb, 9*C, C_res)   3x3 conv weights per block, HWIO-flattened, bf16
    # w2_ref : (nb, C_res, C)     1x1 conv weights per block, bf16
    # o_ref  : (1, H, W, C)       output image
    # cur_ref: (H, W, C)          resident activation         (f32 VMEM scratch)
    # pad_ref: (H+2, W+2, C)      zero-padded ReLU(activation) (f32 VMEM scratch)
    _, H, W, C = x_ref.shape
    n_blocks = w1_ref.shape[0]

    # Load the image into the resident VMEM activation once per grid step.
    cur_ref[...] = x_ref[0]

    # Zero only the 1-element border of pad_ref; the interior is fully
    # overwritten by every block.  Re-done each grid step because scratch
    # persists across iterations (and per-core under megacore sharding).
    pad_ref[0:1, :, :] = jnp.zeros((1, W + 2, C), pad_ref.dtype)
    pad_ref[H + 1:H + 2, :, :] = jnp.zeros((1, W + 2, C), pad_ref.dtype)
    pad_ref[:, 0:1, :] = jnp.zeros((H + 2, 1, C), pad_ref.dtype)
    pad_ref[:, W + 1:W + 2, :] = jnp.zeros((H + 2, 1, C), pad_ref.dtype)

    for blk in range(n_blocks):
        # First ReLU into the padded interior (relu(0) == 0, so ReLU and
        # zero-padding commute; no wrapper-side pad).
        pad_ref[1:H + 1, 1:W + 1, :] = jnp.maximum(cur_ref[...], 0.0)

        # 3x3 conv = 9 accumulating MXU matmuls fed from ref views of pad_ref
        # (no im2col slab, per-tap live ranges only).
        acc = None
        for k in range(9):
            dh, dw = k // 3, k % 3
            tap = pad_ref[dh:dh + H, dw:dw + W, :]            # (H, W, C) view load
            tap = tap.reshape(H * W, C).astype(jnp.bfloat16)
            wk = w1_ref[blk, k * C:(k + 1) * C, :]            # (C, C_res) bf16
            part = jnp.dot(tap, wk, preferred_element_type=jnp.float32)
            acc = part if acc is None else acc + part         # (H*W, C_res) f32

        # Second ReLU (f32, v5e-safe) + 1x1 conv.
        h = jnp.maximum(acc, 0.0).astype(jnp.bfloat16)
        y = jnp.dot(h, w2_ref[blk], preferred_element_type=jnp.float32)  # (H*W, C)

        # Residual add uses the pre-ReLU activation (re-read to bound live range).
        new_x = cur_ref[...] + y.reshape(H, W, C)

        if blk == n_blocks - 1:
            # Fused stack-final ReLU + single HBM store per batch element.
            o_ref[0] = jnp.maximum(new_x, 0.0).astype(o_ref.dtype)
        else:
            cur_ref[...] = new_x


def _vmem_padded_bytes(shape, dtype):
    """Rough Mosaic VMEM footprint: minor dim padded to 128, 2nd-minor to the
    dtype's sublane packing (8 for f32, 16 for bf16)."""
    itemsize = jnp.dtype(dtype).itemsize
    sub = {4: 8, 2: 16, 1: 32}.get(itemsize, 8)
    dims = list(shape)
    dims[-1] = -(-dims[-1] // 128) * 128
    if len(dims) >= 2:
        dims[-2] = -(-dims[-2] // sub) * sub
    n = 1
    for d in dims:
        n *= int(d)
    return n * itemsize


def residual_stack_pallas(x_nchw, block_weights):
    """ResidualStack forward.

    x_nchw       : (B, C, H, W) f32
    block_weights: list of (w1 (C_res, C, 3, 3), w2 (C, C_res, 1, 1)), OIHW.
    Returns (B, C, H, W).
    """
    assert len(block_weights) >= 1
    x = jnp.transpose(x_nchw, (0, 2, 3, 1))             # NCHW -> NHWC, once
    B, H, W, C = x.shape
    n_blocks = len(block_weights)

    w1_list, w2_list = [], []
    for w1, w2 in block_weights:
        C_res, C_in = w1.shape[0], w1.shape[1]
        assert C_in == C and w2.shape[0] == C and w2.shape[1] == C_res, (
            "residual add requires in_channels == num_hiddens for every block")
        # OIHW -> HWIO -> (9*C, C_res); row index = (dh*3 + dw)*C + c.
        w1_list.append(jnp.transpose(w1, (2, 3, 1, 0)).reshape(9 * C, C_res))
        w2_list.append(jnp.transpose(w2[:, :, 0, 0], (1, 0)))
    w1_all = jnp.stack(w1_list).astype(jnp.bfloat16)     # (nb, 9*C, C_res)
    w2_all = jnp.stack(w2_list).astype(jnp.bfloat16)     # (nb, C_res, C)
    C_res = w1_all.shape[-1]

    # VMEM budget from actual padded buffer sizes (x/out/weights double-buffered).
    est = (2 * 2 * _vmem_padded_bytes((1, H, W, C), jnp.float32)
           + 2 * _vmem_padded_bytes(w1_all.shape, jnp.bfloat16)
           + 2 * _vmem_padded_bytes(w2_all.shape, jnp.bfloat16)
           + _vmem_padded_bytes((H, W, C), jnp.float32)
           + _vmem_padded_bytes((H + 2, W + 2, C), jnp.float32))
    # Whole-image-resident fused path (fits easily through ~64x64x128 f32 on
    # v5e/v6e/v7x); larger images would need a row-tiled per-block variant.
    assert est <= 40 * 1024 * 1024, "image too large for fused whole-image path"
    vmem_limit = int(min(max(2 * est, 4 * 1024 * 1024), 64 * 1024 * 1024))

    out = pl.pallas_call(
        _stack_kernel,
        out_shape=jax.ShapeDtypeStruct((B, H, W, C), x.dtype),
        grid_spec=pltpu.PrefetchScalarGridSpec(
            num_scalar_prefetch=0,
            grid=(B,),
            in_specs=[
                pl.BlockSpec((1, H, W, C), lambda b: (b, 0, 0, 0)),
                pl.BlockSpec((n_blocks, 9 * C, C_res), lambda b: (0, 0, 0)),
                pl.BlockSpec((n_blocks, C_res, C), lambda b: (0, 0, 0)),
            ],
            out_specs=pl.BlockSpec((1, H, W, C), lambda b: (b, 0, 0, 0)),
            scratch_shapes=[
                pltpu.VMEM((H, W, C), jnp.float32),          # resident activation
                pltpu.VMEM((H + 2, W + 2, C), jnp.float32),  # padded ReLU tile
            ],
        ),
        compiler_params=pltpu.CompilerParams(
            dimension_semantics=("parallel",),   # megacore splits batches
            vmem_limit_bytes=vmem_limit,
        ),
    )(x, w1_all, w2_all)
    return jnp.transpose(out, (0, 3, 1, 2))              # NHWC -> NCHW


def _reference_stack(x, block_weights, *, matmul_dtype=jnp.bfloat16):
    """Pure-JAX NCHW reference matching the PyTorch ResidualStack.

    Conv inputs are cast to `matmul_dtype` with f32 accumulation to mirror the
    kernel's mixed precision; pass jnp.float32 for the exact f32 module.
    """
    def conv(h, w, padding):
        return jax.lax.conv_general_dilated(
            h.astype(matmul_dtype), w.astype(matmul_dtype),
            window_strides=(1, 1), padding=padding,
            dimension_numbers=("NCHW", "OIHW", "NCHW"),
            preferred_element_type=jnp.float32)

    for w1, w2 in block_weights:
        h = jax.nn.relu(x)
        h = conv(h, w1, ((1, 1), (1, 1)))
        h = jax.nn.relu(h)
        h = conv(h, w2, ((0, 0), (0, 0)))
        x = x + h
    return jax.nn.relu(x)


if __name__ == "__main__":
    # ResidualStack(in_channels=4, num_hiddens=4, num_residual_hiddens=8,
    #               num_residual_blocks=2)  (residual add needs in == hiddens)
    B, C, H, W = 2, 4, 16, 16
    C_res, n_blocks = 8, 2

    key = jax.random.PRNGKey(0)
    kx, *wkeys = jax.random.split(key, 1 + 2 * n_blocks)
    x = jax.random.normal(kx, (B, C, H, W), dtype=jnp.float32)
    block_weights = []
    for i in range(n_blocks):
        w1 = 0.1 * jax.random.normal(wkeys[2 * i], (C_res, C, 3, 3), jnp.float32)
        w2 = 0.1 * jax.random.normal(wkeys[2 * i + 1], (C, C_res, 1, 1), jnp.float32)
        block_weights.append((w1, w2))

    out = jax.block_until_ready(residual_stack_pallas(x, block_weights))
    assert out.shape == (B, C, H, W)

    # Precision-matched reference (bf16 matmul inputs, f32 accumulation).
    ref = jax.block_until_ready(_reference_stack(x, block_weights))
    err = jnp.max(jnp.abs(out - ref))
    assert err < 2e-3, f"mismatch vs bf16-matched reference: {err}"

    # Loose sanity check vs the exact f32 module (difference is only bf16
    # rounding of the matmul inputs).
    ref32 = jax.block_until_ready(
        _reference_stack(x, block_weights, matmul_dtype=jnp.float32))
    err32 = jnp.max(jnp.abs(out - ref32))
    assert err32 < 5e-2, f"mismatch vs f32 reference: {err32}"

    print("KERNEL_OK")
</pallas_src>

<mosaic_0001>
module attributes {stable_mosaic.version = 11 : i64} {
  func.func @_stack_kernel(%arg0: i32, %arg1: memref<1x16x16x4xf32, #tpu.memory_space<vmem>>, %arg2: memref<2x36x8xbf16, #tpu.memory_space<vmem>>, %arg3: memref<2x8x4xbf16, #tpu.memory_space<vmem>>, %arg4: memref<1x16x16x4xf32, #tpu.memory_space<vmem>>, %arg5: memref<16x16x4xf32, #tpu.memory_space<vmem>>, %arg6: memref<18x18x4xf32, #tpu.memory_space<vmem>>) attributes {dimension_semantics = [#tpu.dimension_semantics<parallel>], iteration_bounds = array<i64: 2>, scalar_prefetch = 0 : i64, scratch_operands = 2 : i64, tpu.core_type = #tpu.core_type<tc>, window_params = [{transform_indices = @transform_0, window_bounds = array<i64: 1, 16, 16, 4>}, {pipeline_mode = #tpu.pipeline_mode<synchronous>, transform_indices = @transform_1, window_bounds = array<i64: 2, 36, 8>}, {pipeline_mode = #tpu.pipeline_mode<synchronous>, transform_indices = @transform_2, window_bounds = array<i64: 2, 8, 4>}, {transform_indices = @transform_3, window_bounds = array<i64: 1, 16, 16, 4>}]} {
    %c0 = arith.constant 0 : index
    %c0_0 = arith.constant 0 : index
    %c0_1 = arith.constant 0 : index
    %c0_2 = arith.constant 0 : index
    %0 = vector.load %arg1[%c0, %c0_0, %c0_1, %c0_2] : memref<1x16x16x4xf32, #tpu.memory_space<vmem>>, vector<1x16x16x4xf32>
    %1 = vector.shape_cast %0 : vector<1x16x16x4xf32> to vector<16x16x4xf32>
    %c0_3 = arith.constant 0 : index
    %c0_4 = arith.constant 0 : index
    %c0_5 = arith.constant 0 : index
    %2 = vector.load %arg5[%c0_3, %c0_4, %c0_5] : memref<16x16x4xf32, #tpu.memory_space<vmem>>, vector<16x16x4xf32>
    tpu.vector_store %arg5[%c0_3, %c0_4, %c0_5], %1 {strides = array<i32>} : memref<16x16x4xf32, #tpu.memory_space<vmem>>, vector<16x16x4xf32>,
    %cst = arith.constant 0.000000e+00 : f32
    %3 = vector.broadcast %cst : f32 to vector<1x18x4xf32>
    %c0_6 = arith.constant 0 : index
    %c0_7 = arith.constant 0 : index
    %c0_8 = arith.constant 0 : index
    %4 = vector.load %arg6[%c0_6, %c0_7, %c0_8] : memref<18x18x4xf32, #tpu.memory_space<vmem>>, vector<1x18x4xf32>
    tpu.vector_store %arg6[%c0_6, %c0_7, %c0_8], %3 {strides = array<i32>} : memref<18x18x4xf32, #tpu.memory_space<vmem>>, vector<1x18x4xf32>,
    %cst_9 = arith.constant 0.000000e+00 : f32
    %5 = vector.broadcast %cst_9 : f32 to vector<1x18x4xf32>
    %c17 = arith.constant 17 : index
    %c0_10 = arith.constant 0 : index
    %c0_11 = arith.constant 0 : index
    %6 = vector.load %arg6[%c17, %c0_10, %c0_11] : memref<18x18x4xf32, #tpu.memory_space<vmem>>, vector<1x18x4xf32>
    tpu.vector_store %arg6[%c17, %c0_10, %c0_11], %5 {strides = array<i32>} : memref<18x18x4xf32, #tpu.memory_space<vmem>>, vector<1x18x4xf32>,
    %cst_12 = arith.constant 0.000000e+00 : f32
    %7 = vector.broadcast %cst_12 : f32 to vector<18x1x4xf32>
    %c0_13 = arith.constant 0 : index
    %c0_14 = arith.constant 0 : index
    %c0_15 = arith.constant 0 : index
    %8 = vector.load %arg6[%c0_13, %c0_14, %c0_15] : memref<18x18x4xf32, #tpu.memory_space<vmem>>, vector<18x1x4xf32>
    tpu.vector_store %arg6[%c0_13, %c0_14, %c0_15], %7 {strides = array<i32>} : memref<18x18x4xf32, #tpu.memory_space<vmem>>, vector<18x1x4xf32>,
    %cst_16 = arith.constant 0.000000e+00 : f32
    %9 = vector.broadcast %cst_16 : f32 to vector<18x1x4xf32>
    %c0_17 = arith.constant 0 : index
    %c17_18 = arith.constant 17 : index
    %c0_19 = arith.constant 0 : index
    %10 = vector.load %arg6[%c0_17, %c17_18, %c0_19] : memref<18x18x4xf32, #tpu.memory_space<vmem>>, vector<18x1x4xf32>
    tpu.vector_store %arg6[%c0_17, %c17_18, %c0_19], %9 {strides = array<i32>} : memref<18x18x4xf32, #tpu.memory_space<vmem>>, vector<18x1x4xf32>,
    %c0_20 = arith.constant 0 : index
    %c0_21 = arith.constant 0 : index
    %c0_22 = arith.constant 0 : index
    %11 = vector.load %arg5[%c0_20, %c0_21, %c0_22] : memref<16x16x4xf32, #tpu.memory_space<vmem>>, vector<16x16x4xf32>
    %cst_23 = arith.constant 0.000000e+00 : f32
    %12 = vector.broadcast %cst_23 : f32 to vector<16x16x4xf32>
    %13 = arith.maximumf %11, %12 : vector<16x16x4xf32>
    %c1 = arith.constant 1 : index
    %c1_24 = arith.constant 1 : index
    %c0_25 = arith.constant 0 : index
    %14 = vector.load %arg6[%c1, %c1_24, %c0_25] : memref<18x18x4xf32, #tpu.memory_space<vmem>>, vector<16x16x4xf32>
    tpu.vector_store %arg6[%c1, %c1_24, %c0_25], %13 {strides = array<i32>} : memref<18x18x4xf32, #tpu.memory_space<vmem>>, vector<16x16x4xf32>,
    %c0_26 = arith.constant 0 : index
    %c0_27 = arith.constant 0 : index
    %c0_28 = arith.constant 0 : index
    %15 = vector.load %arg6[%c0_26, %c0_27, %c0_28] : memref<18x18x4xf32, #tpu.memory_space<vmem>>, vector<16x16x4xf32>
    %16 = vector.shape_cast %15 : vector<16x16x4xf32> to vector<256x4xf32>
    %17 = arith.truncf %16 : vector<256x4xf32> to vector<256x4xbf16>
    %c0_29 = arith.constant 0 : index
    %c0_30 = arith.constant 0 : index
    %c0_31 = arith.constant 0 : index
    %18 = vector.load %arg2[%c0_29, %c0_30, %c0_31] : memref<2x36x8xbf16, #tpu.memory_space<vmem>>, vector<1x4x8xbf16>
    %19 = vector.shape_cast %18 : vector<1x4x8xbf16> to vector<4x8xbf16>
    %cst_32 = arith.constant dense<0.000000e+00> : vector<256x8xf32>
    %20 = tpu.matmul %17, %19, %cst_32 {dimension_numbers = #tpu.dot_dimension_numbers<[1], [0], [0], [1], [0, 0, 1, 1], [], []>} : vector<256x4xbf16>, vector<4x8xbf16>, vector<256x8xf32> -> vector<256x8xf32>
    %c0_33 = arith.constant 0 : index
    %c1_34 = arith.constant 1 : index
    %c0_35 = arith.constant 0 : index
    %21 = vector.load %arg6[%c0_33, %c1_34, %c0_35] : memref<18x18x4xf32, #tpu.memory_space<vmem>>, vector<16x16x4xf32>
    %22 = vector.shape_cast %21 : vector<16x16x4xf32> to vector<256x4xf32>
    %23 = arith.truncf %22 : vector<256x4xf32> to vector<256x4xbf16>
    %c0_36 = arith.constant 0 : index
    %c4 = arith.constant 4 : index
    %c0_37 = arith.constant 0 : index
    %24 = vector.load %arg2[%c0_36, %c4, %c0_37] : memref<2x36x8xbf16, #tpu.memory_space<vmem>>, vector<1x4x8xbf16>
    %25 = vector.shape_cast %24 : vector<1x4x8xbf16> to vector<4x8xbf16>
    %cst_38 = arith.constant dense<0.000000e+00> : vector<256x8xf32>
    %26 = tpu.matmul %23, %25, %cst_38 {dimension_numbers = #tpu.dot_dimension_numbers<[1], [0], [0], [1], [0, 0, 1, 1], [], []>} : vector<256x4xbf16>, vector<4x8xbf16>, vector<256x8xf32> -> vector<256x8xf32>
    %27 = arith.addf %20, %26 : vector<256x8xf32>
    %c0_39 = arith.constant 0 : index
    %c2 = arith.constant 2 : index
    %c0_40 = arith.constant 0 : index
    %28 = vector.load %arg6[%c0_39, %c2, %c0_40] : memref<18x18x4xf32, #tpu.memory_space<vmem>>, vector<16x16x4xf32>
    %29 = vector.shape_cast %28 : vector<16x16x4xf32> to vector<256x4xf32>
    %30 = arith.truncf %29 : vector<256x4xf32> to vector<256x4xbf16>
    %c0_41 = arith.constant 0 : index
    %c8 = arith.constant 8 : index
    %c0_42 = arith.constant 0 : index
    %31 = vector.load %arg2[%c0_41, %c8, %c0_42] : memref<2x36x8xbf16, #tpu.memory_space<vmem>>, vector<1x4x8xbf16>
    %32 = vector.shape_cast %31 : vector<1x4x8xbf16> to vector<4x8xbf16>
    %cst_43 = arith.constant dense<0.000000e+00> : vector<256x8xf32>
    %33 = tpu.matmul %30, %32, %cst_43 {dimension_numbers = #tpu.dot_dimension_numbers<[1], [0], [0], [1], [0, 0, 1, 1], [], []>} : vector<256x4xbf16>, vector<4x8xbf16>, vector<256x8xf32> -> vector<256x8xf32>
    %34 = arith.addf %27, %33 : vector<256x8xf32>
    %c1_44 = arith.constant 1 : index
    %c0_45 = arith.constant 0 : index
    %c0_46 = arith.constant 0 : index
    %35 = vector.load %arg6[%c1_44, %c0_45, %c0_46] : memref<18x18x4xf32, #tpu.memory_space<vmem>>, vector<16x16x4xf32>
    %36 = vector.shape_cast %35 : vector<16x16x4xf32> to vector<256x4xf32>
    %37 = arith.truncf %36 : vector<256x4xf32> to vector<256x4xbf16>
    %c0_47 = arith.constant 0 : index
    %c12 = arith.constant 12 : index
    %c0_48 = arith.constant 0 : index
    %38 = vector.load %arg2[%c0_47, %c12, %c0_48] : memref<2x36x8xbf16, #tpu.memory_space<vmem>>, vector<1x4x8xbf16>
    %39 = vector.shape_cast %38 : vector<1x4x8xbf16> to vector<4x8xbf16>
    %cst_49 = arith.constant dense<0.000000e+00> : vector<256x8xf32>
    %40 = tpu.matmul %37, %39, %cst_49 {dimension_numbers = #tpu.dot_dimension_numbers<[1], [0], [0], [1], [0, 0, 1, 1], [], []>} : vector<256x4xbf16>, vector<4x8xbf16>, vector<256x8xf32> -> vector<256x8xf32>
    %41 = arith.addf %34, %40 : vector<256x8xf32>
    %c1_50 = arith.constant 1 : index
    %c1_51 = arith.constant 1 : index
    %c0_52 = arith.constant 0 : index
    %42 = vector.load %arg6[%c1_50, %c1_51, %c0_52] : memref<18x18x4xf32, #tpu.memory_space<vmem>>, vector<16x16x4xf32>
    %43 = vector.shape_cast %42 : vector<16x16x4xf32> to vector<256x4xf32>
    %44 = arith.truncf %43 : vector<256x4xf32> to vector<256x4xbf16>
    %c0_53 = arith.constant 0 : index
    %c16 = arith.constant 16 : index
    %c0_54 = arith.constant 0 : index
    %45 = vector.load %arg2[%c0_53, %c16, %c0_54] : memref<2x36x8xbf16, #tpu.memory_space<vmem>>, vector<1x4x8xbf16>
    %46 = vector.shape_cast %45 : vector<1x4x8xbf16> to vector<4x8xbf16>
    %cst_55 = arith.constant dense<0.000000e+00> : vector<256x8xf32>
    %47 = tpu.matmul %44, %46, %cst_55 {dimension_numbers = #tpu.dot_dimension_numbers<[1], [0], [0], [1], [0, 0, 1, 1], [], []>} : vector<256x4xbf16>, vector<4x8xbf16>, vector<256x8xf32> -> vector<256x8xf32>
    %48 = arith.addf %41, %47 : vector<256x8xf32>
    %c1_56 = arith.constant 1 : index
    %c2_57 = arith.constant 2 : index
    %c0_58 = arith.constant 0 : index
    %49 = vector.load %arg6[%c1_56, %c2_57, %c0_58] : memref<18x18x4xf32, #tpu.memory_space<vmem>>, vector<16x16x4xf32>
    %50 = vector.shape_cast %49 : vector<16x16x4xf32> to vector<256x4xf32>
    %51 = arith.truncf %50 : vector<256x4xf32> to vector<256x4xbf16>
    %c0_59 = arith.constant 0 : index
    %c20 = arith.constant 20 : index
    %c0_60 = arith.constant 0 : index
    %52 = vector.load %arg2[%c0_59, %c20, %c0_60] : memref<2x36x8xbf16, #tpu.memory_space<vmem>>, vector<1x4x8xbf16>
    %53 = vector.shape_cast %52 : vector<1x4x8xbf16> to vector<4x8xbf16>
    %cst_61 = arith.constant dense<0.000000e+00> : vector<256x8xf32>
    %54 = tpu.matmul %51, %53, %cst_61 {dimension_numbers = #tpu.dot_dimension_numbers<[1], [0], [0], [1], [0, 0, 1, 1], [], []>} : vector<256x4xbf16>, vector<4x8xbf16>, vector<256x8xf32> -> vector<256x8xf32>
    %55 = arith.addf %48, %54 : vector<256x8xf32>
    %c2_62 = arith.constant 2 : index
    %c0_63 = arith.constant 0 : index
    %c0_64 = arith.constant 0 : index
    %56 = vector.load %arg6[%c2_62, %c0_63, %c0_64] : memref<18x18x4xf32, #tpu.memory_space<vmem>>, vector<16x16x4xf32>
    %57 = vector.shape_cast %56 : vector<16x16x4xf32> to vector<256x4xf32>
    %58 = arith.truncf %57 : vector<256x4xf32> to vector<256x4xbf16>
    %c0_65 = arith.constant 0 : index
    %c24 = arith.constant 24 : index
    %c0_66 = arith.constant 0 : index
    %59 = vector.load %arg2[%c0_65, %c24, %c0_66] : memref<2x36x8xbf16, #tpu.memory_space<vmem>>, vector<1x4x8xbf16>
    %60 = vector.shape_cast %59 : vector<1x4x8xbf16> to vector<4x8xbf16>
    %cst_67 = arith.constant dense<0.000000e+00> : vector<256x8xf32>
    %61 = tpu.matmul %58, %60, %cst_67 {dimension_numbers = #tpu.dot_dimension_numbers<[1], [0], [0], [1], [0, 0, 1, 1], [], []>} : vector<256x4xbf16>, vector<4x8xbf16>, vector<256x8xf32> -> vector<256x8xf32>
    %62 = arith.addf %55, %61 : vector<256x8xf32>
    %c2_68 = arith.constant 2 : index
    %c1_69 = arith.constant 1 : index
    %c0_70 = arith.constant 0 : index
    %63 = vector.load %arg6[%c2_68, %c1_69, %c0_70] : memref<18x18x4xf32, #tpu.memory_space<vmem>>, vector<16x16x4xf32>
    %64 = vector.shape_cast %63 : vector<16x16x4xf32> to vector<256x4xf32>
    %65 = arith.truncf %64 : vector<256x4xf32> to vector<256x4xbf16>
    %c0_71 = arith.constant 0 : index
    %c28 = arith.constant 28 : index
    %c0_72 = arith.constant 0 : index
    %66 = vector.load %arg2[%c0_71, %c28, %c0_72] : memref<2x36x8xbf16, #tpu.memory_space<vmem>>, vector<1x4x8xbf16>
    %67 = vector.shape_cast %66 : vector<1x4x8xbf16> to vector<4x8xbf16>
    %cst_73 = arith.constant dense<0.000000e+00> : vector<256x8xf32>
    %68 = tpu.matmul %65, %67, %cst_73 {dimension_numbers = #tpu.dot_dimension_numbers<[1], [0], [0], [1], [0, 0, 1, 1], [], []>} : vector<256x4xbf16>, vector<4x8xbf16>, vector<256x8xf32> -> vector<256x8xf32>
    %69 = arith.addf %62, %68 : vector<256x8xf32>
    %c2_74 = arith.constant 2 : index
    %c2_75 = arith.constant 2 : index
    %c0_76 = arith.constant 0 : index
    %70 = vector.load %arg6[%c2_74, %c2_75, %c0_76] : memref<18x18x4xf32, #tpu.memory_space<vmem>>, vector<16x16x4xf32>
    %71 = vector.shape_cast %70 : vector<16x16x4xf32> to vector<256x4xf32>
    %72 = arith.truncf %71 : vector<256x4xf32> to vector<256x4xbf16>
    %c0_77 = arith.constant 0 : index
    %c32 = arith.constant 32 : index
    %c0_78 = arith.constant 0 : index
    %73 = vector.load %arg2[%c0_77, %c32, %c0_78] : memref<2x36x8xbf16, #tpu.memory_space<vmem>>, vector<1x4x8xbf16>
    %74 = vector.shape_cast %73 : vector<1x4x8xbf16> to vector<4x8xbf16>
    %cst_79 = arith.constant dense<0.000000e+00> : vector<256x8xf32>
    %75 = tpu.matmul %72, %74, %cst_79 {dimension_numbers = #tpu.dot_dimension_numbers<[1], [0], [0], [1], [0, 0, 1, 1], [], []>} : vector<256x4xbf16>, vector<4x8xbf16>, vector<256x8xf32> -> vector<256x8xf32>
    %76 = arith.addf %69, %75 : vector<256x8xf32>
    %cst_80 = arith.constant 0.000000e+00 : f32
    %77 = vector.broadcast %cst_80 : f32 to vector<256x8xf32>
    %78 = arith.maximumf %76, %77 : vector<256x8xf32>
    %79 = arith.truncf %78 : vector<256x8xf32> to vector<256x8xbf16>
    %c0_81 = arith.constant 0 : index
    %c0_82 = arith.constant 0 : index
    %c0_83 = arith.constant 0 : index
    %80 = vector.load %arg3[%c0_81, %c0_82, %c0_83] : memref<2x8x4xbf16, #tpu.memory_space<vmem>>, vector<1x8x4xbf16>
    %81 = vector.shape_cast %80 : vector<1x8x4xbf16> to vector<8x4xbf16>
    %cst_84 = arith.constant dense<0.000000e+00> : vector<256x4xf32>
    %82 = tpu.matmul %79, %81, %cst_84 {dimension_numbers = #tpu.dot_dimension_numbers<[1], [0], [0], [1], [0, 0, 1, 1], [], []>} : vector<256x8xbf16>, vector<8x4xbf16>, vector<256x4xf32> -> vector<256x4xf32>
    %c0_85 = arith.constant 0 : index
    %c0_86 = arith.constant 0 : index
    %c0_87 = arith.constant 0 : index
    %83 = vector.load %arg5[%c0_85, %c0_86, %c0_87] : memref<16x16x4xf32, #tpu.memory_space<vmem>>, vector<16x16x4xf32>
    %84 = vector.shape_cast %82 : vector<256x4xf32> to vector<16x16x4xf32>
    %85 = arith.addf %83, %84 : vector<16x16x4xf32>
    %c0_88 = arith.constant 0 : index
    %c0_89 = arith.constant 0 : index
    %c0_90 = arith.constant 0 : index
    %86 = vector.load %arg5[%c0_88, %c0_89, %c0_90] : memref<16x16x4xf32, #tpu.memory_space<vmem>>, vector<16x16x4xf32>
    tpu.vector_store %arg5[%c0_88, %c0_89, %c0_90], %85 {strides = array<i32>} : memref<16x16x4xf32, #tpu.memory_space<vmem>>, vector<16x16x4xf32>,
    %c0_91 = arith.constant 0 : index
    %c0_92 = arith.constant 0 : index
    %c0_93 = arith.constant 0 : index
    %87 = vector.load %arg5[%c0_91, %c0_92, %c0_93] : memref<16x16x4xf32, #tpu.memory_space<vmem>>, vector<16x16x4xf32>
    %cst_94 = arith.constant 0.000000e+00 : f32
    %88 = vector.broadcast %cst_94 : f32 to vector<16x16x4xf32>
    %89 = arith.maximumf %87, %88 : vector<16x16x4xf32>
    %c1_95 = arith.constant 1 : index
    %c1_96 = arith.constant 1 : index
    %c0_97 = arith.constant 0 : index
    %90 = vector.load %arg6[%c1_95, %c1_96, %c0_97] : memref<18x18x4xf32, #tpu.memory_space<vmem>>, vector<16x16x4xf32>
    tpu.vector_store %arg6[%c1_95, %c1_96, %c0_97], %89 {strides = array<i32>} : memref<18x18x4xf32, #tpu.memory_space<vmem>>, vector<16x16x4xf32>,
    %c0_98 = arith.constant 0 : index
    %c0_99 = arith.constant 0 : index
    %c0_100 = arith.constant 0 : index
    %91 = vector.load %arg6[%c0_98, %c0_99, %c0_100] : memref<18x18x4xf32, #tpu.memory_space<vmem>>, vector<16x16x4xf32>
    %92 = vector.shape_cast %91 : vector<16x16x4xf32> to vector<256x4xf32>
    %93 = arith.truncf %92 : vector<256x4xf32> to vector<256x4xbf16>
    %c1_101 = arith.constant 1 : index
    %c0_102 = arith.constant 0 : index
    %c0_103 = arith.constant 0 : index
    %94 = vector.load %arg2[%c1_101, %c0_102, %c0_103] : memref<2x36x8xbf16, #tpu.memory_space<vmem>>, vector<1x4x8xbf16>
    %95 = vector.shape_cast %94 : vector<1x4x8xbf16> to vector<4x8xbf16>
    %cst_104 = arith.constant dense<0.000000e+00> : vector<256x8xf32>
    %96 = tpu.matmul %93, %95, %cst_104 {dimension_numbers = #tpu.dot_dimension_numbers<[1], [0], [0], [1], [0, 0, 1, 1], [], []>} : vector<256x4xbf16>, vector<4x8xbf16>, vector<256x8xf32> -> vector<256x8xf32>
    %c0_105 = arith.constant 0 : index
    %c1_106 = arith.constant 1 : index
    %c0_107 = arith.constant 0 : index
    %97 = vector.load %arg6[%c0_105, %c1_106, %c0_107] : memref<18x18x4xf32, #tpu.memory_space<vmem>>, vector<16x16x4xf32>
    %98 = vector.shape_cast %97 : vector<16x16x4xf32> to vector<256x4xf32>
    %99 = arith.truncf %98 : vector<256x4xf32> to vector<256x4xbf16>
    %c1_108 = arith.constant 1 : index
    %c4_109 = arith.constant 4 : index
    %c0_110 = arith.constant 0 : index
    %100 = vector.load %arg2[%c1_108, %c4_109, %c0_110] : memref<2x36x8xbf16, #tpu.memory_space<vmem>>, vector<1x4x8xbf16>
    %101 = vector.shape_cast %100 : vector<1x4x8xbf16> to vector<4x8xbf16>
    %cst_111 = arith.constant dense<0.000000e+00> : vector<256x8xf32>
    %102 = tpu.matmul %99, %101, %cst_111 {dimension_numbers = #tpu.dot_dimension_numbers<[1], [0], [0], [1], [0, 0, 1, 1], [], []>} : vector<256x4xbf16>, vector<4x8xbf16>, vector<256x8xf32> -> vector<256x8xf32>
    %103 = arith.addf %96, %102 : vector<256x8xf32>
    %c0_112 = arith.constant 0 : index
    %c2_113 = arith.constant 2 : index
    %c0_114 = arith.constant 0 : index
    %104 = vector.load %arg6[%c0_112, %c2_113, %c0_114] : memref<18x18x4xf32, #tpu.memory_space<vmem>>, vector<16x16x4xf32>
    %105 = vector.shape_cast %104 : vector<16x16x4xf32> to vector<256x4xf32>
    %106 = arith.truncf %105 : vector<256x4xf32> to vector<256x4xbf16>
    %c1_115 = arith.constant 1 : index
    %c8_116 = arith.constant 8 : index
    %c0_117 = arith.constant 0 : index
    %107 = vector.load %arg2[%c1_115, %c8_116, %c0_117] : memref<2x36x8xbf16, #tpu.memory_space<vmem>>, vector<1x4x8xbf16>
    %108 = vector.shape_cast %107 : vector<1x4x8xbf16> to vector<4x8xbf16>
    %cst_118 = arith.constant dense<0.000000e+00> : vector<256x8xf32>
    %109 = tpu.matmul %106, %108, %cst_118 {dimension_numbers = #tpu.dot_dimension_numbers<[1], [0], [0], [1], [0, 0, 1, 1], [], []>} : vector<256x4xbf16>, vector<4x8xbf16>, vector<256x8xf32> -> vector<256x8xf32>
    %110 = arith.addf %103, %109 : vector<256x8xf32>
    %c1_119 = arith.constant 1 : index
    %c0_120 = arith.constant 0 : index
    %c0_121 = arith.constant 0 : index
    %111 = vector.load %arg6[%c1_119, %c0_120, %c0_121] : memref<18x18x4xf32, #tpu.memory_space<vmem>>, vector<16x16x4xf32>
    %112 = vector.shape_cast %111 : vector<16x16x4xf32> to vector<256x4xf32>
    %113 = arith.truncf %112 : vector<256x4xf32> to vector<256x4xbf16>
    %c1_122 = arith.constant 1 : index
    %c12_123 = arith.constant 12 : index
    %c0_124 = arith.constant 0 : index
    %114 = vector.load %arg2[%c1_122, %c12_123, %c0_124] : memref<2x36x8xbf16, #tpu.memory_space<vmem>>, vector<1x4x8xbf16>
    %115 = vector.shape_cast %114 : vector<1x4x8xbf16> to vector<4x8xbf16>
    %cst_125 = arith.constant dense<0.000000e+00> : vector<256x8xf32>
    %116 = tpu.matmul %113, %115, %cst_125 {dimension_numbers = #tpu.dot_dimension_numbers<[1], [0], [0], [1], [0, 0, 1, 1], [], []>} : vector<256x4xbf16>, vector<4x8xbf16>, vector<256x8xf32> -> vector<256x8xf32>
    %117 = arith.addf %110, %116 : vector<256x8xf32>
    %c1_126 = arith.constant 1 : index
    %c1_127 = arith.constant 1 : index
    %c0_128 = arith.constant 0 : index
    %118 = vector.load %arg6[%c1_126, %c1_127, %c0_128] : memref<18x18x4xf32, #tpu.memory_space<vmem>>, vector<16x16x4xf32>
    %119 = vector.shape_cast %118 : vector<16x16x4xf32> to vector<256x4xf32>
    %120 = arith.truncf %119 : vector<256x4xf32> to vector<256x4xbf16>
    %c1_129 = arith.constant 1 : index
    %c16_130 = arith.constant 16 : index
    %c0_131 = arith.constant 0 : index
    %121 = vector.load %arg2[%c1_129, %c16_130, %c0_131] : memref<2x36x8xbf16, #tpu.memory_space<vmem>>, vector<1x4x8xbf16>
    %122 = vector.shape_cast %121 : vector<1x4x8xbf16> to vector<4x8xbf16>
    %cst_132 = arith.constant dense<0.000000e+00> : vector<256x8xf32>
    %123 = tpu.matmul %120, %122, %cst_132 {dimension_numbers = #tpu.dot_dimension_numbers<[1], [0], [0], [1], [0, 0, 1, 1], [], []>} : vector<256x4xbf16>, vector<4x8xbf16>, vector<256x8xf32> -> vector<256x8xf32>
    %124 = arith.addf %117, %123 : vector<256x8xf32>
    %c1_133 = arith.constant 1 : index
    %c2_134 = arith.constant 2 : index
    %c0_135 = arith.constant 0 : index
    %125 = vector.load %arg6[%c1_133, %c2_134, %c0_135] : memref<18x18x4xf32, #tpu.memory_space<vmem>>, vector<16x16x4xf32>
    %126 = vector.shape_cast %125 : vector<16x16x4xf32> to vector<256x4xf32>
    %127 = arith.truncf %126 : vector<256x4xf32> to vector<256x4xbf16>
    %c1_136 = arith.constant 1 : index
    %c20_137 = arith.constant 20 : index
    %c0_138 = arith.constant 0 : index
    %128 = vector.load %arg2[%c1_136, %c20_137, %c0_138] : memref<2x36x8xbf16, #tpu.memory_space<vmem>>, vector<1x4x8xbf16>
    %129 = vector.shape_cast %128 : vector<1x4x8xbf16> to vector<4x8xbf16>
    %cst_139 = arith.constant dense<0.000000e+00> : vector<256x8xf32>
    %130 = tpu.matmul %127, %129, %cst_139 {dimension_numbers = #tpu.dot_dimension_numbers<[1], [0], [0], [1], [0, 0, 1, 1], [], []>} : vector<256x4xbf16>, vector<4x8xbf16>, vector<256x8xf32> -> vector<256x8xf32>
    %131 = arith.addf %124, %130 : vector<256x8xf32>
    %c2_140 = arith.constant 2 : index
    %c0_141 = arith.constant 0 : index
    %c0_142 = arith.constant 0 : index
    %132 = vector.load %arg6[%c2_140, %c0_141, %c0_142] : memref<18x18x4xf32, #tpu.memory_space<vmem>>, vector<16x16x4xf32>
    %133 = vector.shape_cast %132 : vector<16x16x4xf32> to vector<256x4xf32>
    %134 = arith.truncf %133 : vector<256x4xf32> to vector<256x4xbf16>
    %c1_143 = arith.constant 1 : index
    %c24_144 = arith.constant 24 : index
    %c0_145 = arith.constant 0 : index
    %135 = vector.load %arg2[%c1_143, %c24_144, %c0_145] : memref<2x36x8xbf16, #tpu.memory_space<vmem>>, vector<1x4x8xbf16>
    %136 = vector.shape_cast %135 : vector<1x4x8xbf16> to vector<4x8xbf16>
    %cst_146 = arith.constant dense<0.000000e+00> : vector<256x8xf32>
    %137 = tpu.matmul %134, %136, %cst_146 {dimension_numbers = #tpu.dot_dimension_numbers<[1], [0], [0], [1], [0, 0, 1, 1], [], []>} : vector<256x4xbf16>, vector<4x8xbf16>, vector<256x8xf32> -> vector<256x8xf32>
    %138 = arith.addf %131, %137 : vector<256x8xf32>
    %c2_147 = arith.constant 2 : index
    %c1_148 = arith.constant 1 : index
    %c0_149 = arith.constant 0 : index
    %139 = vector.load %arg6[%c2_147, %c1_148, %c0_149] : memref<18x18x4xf32, #tpu.memory_space<vmem>>, vector<16x16x4xf32>
    %140 = vector.shape_cast %139 : vector<16x16x4xf32> to vector<256x4xf32>
    %141 = arith.truncf %140 : vector<256x4xf32> to vector<256x4xbf16>
    %c1_150 = arith.constant 1 : index
    %c28_151 = arith.constant 28 : index
    %c0_152 = arith.constant 0 : index
    %142 = vector.load %arg2[%c1_150, %c28_151, %c0_152] : memref<2x36x8xbf16, #tpu.memory_space<vmem>>, vector<1x4x8xbf16>
    %143 = vector.shape_cast %142 : vector<1x4x8xbf16> to vector<4x8xbf16>
    %cst_153 = arith.constant dense<0.000000e+00> : vector<256x8xf32>
    %144 = tpu.matmul %141, %143, %cst_153 {dimension_numbers = #tpu.dot_dimension_numbers<[1], [0], [0], [1], [0, 0, 1, 1], [], []>} : vector<256x4xbf16>, vector<4x8xbf16>, vector<256x8xf32> -> vector<256x8xf32>
    %145 = arith.addf %138, %144 : vector<256x8xf32>
    %c2_154 = arith.constant 2 : index
    %c2_155 = arith.constant 2 : index
    %c0_156 = arith.constant 0 : index
    %146 = vector.load %arg6[%c2_154, %c2_155, %c0_156] : memref<18x18x4xf32, #tpu.memory_space<vmem>>, vector<16x16x4xf32>
    %147 = vector.shape_cast %146 : vector<16x16x4xf32> to vector<256x4xf32>
    %148 = arith.truncf %147 : vector<256x4xf32> to vector<256x4xbf16>
    %c1_157 = arith.constant 1 : index
    %c32_158 = arith.constant 32 : index
    %c0_159 = arith.constant 0 : index
    %149 = vector.load %arg2[%c1_157, %c32_158, %c0_159] : memref<2x36x8xbf16, #tpu.memory_space<vmem>>, vector<1x4x8xbf16>
    %150 = vector.shape_cast %149 : vector<1x4x8xbf16> to vector<4x8xbf16>
    %cst_160 = arith.constant dense<0.000000e+00> : vector<256x8xf32>
    %151 = tpu.matmul %148, %150, %cst_160 {dimension_numbers = #tpu.dot_dimension_numbers<[1], [0], [0], [1], [0, 0, 1, 1], [], []>} : vector<256x4xbf16>, vector<4x8xbf16>, vector<256x8xf32> -> vector<256x8xf32>
    %152 = arith.addf %145, %151 : vector<256x8xf32>
    %cst_161 = arith.constant 0.000000e+00 : f32
    %153 = vector.broadcast %cst_161 : f32 to vector<256x8xf32>
    %154 = arith.maximumf %152, %153 : vector<256x8xf32>
    %155 = arith.truncf %154 : vector<256x8xf32> to vector<256x8xbf16>
    %c1_162 = arith.constant 1 : index
    %c0_163 = arith.constant 0 : index
    %c0_164 = arith.constant 0 : index
    %156 = vector.load %arg3[%c1_162, %c0_163, %c0_164] : memref<2x8x4xbf16, #tpu.memory_space<vmem>>, vector<1x8x4xbf16>
    %157 = vector.shape_cast %156 : vector<1x8x4xbf16> to vector<8x4xbf16>
    %cst_165 = arith.constant dense<0.000000e+00> : vector<256x4xf32>
    %158 = tpu.matmul %155, %157, %cst_165 {dimension_numbers = #tpu.dot_dimension_numbers<[1], [0], [0], [1], [0, 0, 1, 1], [], []>} : vector<256x8xbf16>, vector<8x4xbf16>, vector<256x4xf32> -> vector<256x4xf32>
    %c0_166 = arith.constant 0 : index
    %c0_167 = arith.constant 0 : index
    %c0_168 = arith.constant 0 : index
    %159 = vector.load %arg5[%c0_166, %c0_167, %c0_168] : memref<16x16x4xf32, #tpu.memory_space<vmem>>, vector<16x16x4xf32>
    %160 = vector.shape_cast %158 : vector<256x4xf32> to vector<16x16x4xf32>
    %161 = arith.addf %159, %160 : vector<16x16x4xf32>
    %cst_169 = arith.constant 0.000000e+00 : f32
    %162 = vector.broadcast %cst_169 : f32 to vector<16x16x4xf32>
    %163 = arith.maximumf %161, %162 : vector<16x16x4xf32>
    %c0_170 = arith.constant 0 : index
    %c0_171 = arith.constant 0 : index
    %c0_172 = arith.constant 0 : index
    %c0_173 = arith.constant 0 : index
    %164 = vector.load %arg4[%c0_170, %c0_171, %c0_172, %c0_173] : memref<1x16x16x4xf32, #tpu.memory_space<vmem>>, vector<1x16x16x4xf32>
    %165 = vector.shape_cast %164 : vector<1x16x16x4xf32> to vector<16x16x4xf32>
    %166 = vector.shape_cast %163 : vector<16x16x4xf32> to vector<1x16x16x4xf32>
    tpu.vector_store %arg4[%c0_170, %c0_171, %c0_172, %c0_173], %166 {strides = array<i32>} : memref<1x16x16x4xf32, #tpu.memory_space<vmem>>, vector<1x16x16x4xf32>,
    return
  }
  func.func @transform_0(%arg0: i32) -> (i32, i32, i32, i32) {
    %c0_i32 = arith.constant 0 : i32
    %c0_i32_0 = arith.constant 0 : i32
    %c0_i32_1 = arith.constant 0 : i32
    %c0_i32_2 = arith.constant 0 : i32
    return %arg0, %c0_i32, %c0_i32_0, %c0_i32_1 : i32, i32, i32, i32
  }
  func.func @transform_1(%arg0: i32) -> (i32, i32, i32) {
    %c0_i32 = arith.constant 0 : i32
    %c0_i32_0 = arith.constant 0 : i32
    %c0_i32_1 = arith.constant 0 : i32
    %c0_i32_2 = arith.constant 0 : i32
    return %c0_i32, %c0_i32_0, %c0_i32_1 : i32, i32, i32
  }
  func.func @transform_2(%arg0: i32) -> (i32, i32, i32) {
    %c0_i32 = arith.constant 0 : i32
    %c0_i32_0 = arith.constant 0 : i32
    %c0_i32_1 = arith.constant 0 : i32
    %c0_i32_2 = arith.constant 0 : i32
    return %c0_i32, %c0_i32_0, %c0_i32_1 : i32, i32, i32
  }
  func.func @transform_3(%arg0: i32) -> (i32, i32, i32, i32) {
    %c0_i32 = arith.constant 0 : i32
    %c0_i32_0 = arith.constant 0 : i32
    %c0_i32_1 = arith.constant 0 : i32
    %c0_i32_2 = arith.constant 0 : i32
    return %arg0, %c0_i32, %c0_i32_0, %c0_i32_1 : i32, i32, i32, i32
  }
}

</mosaic_0001>

<bundles_post_ra>
// kernel: tpu_custom_call.1
= control target key start
LH: loop header
LB: loop body
LE: loop exit
PB: predicated region body
PF: predicated region fallthrough
CT: control target
= control target key end

     0   :  { %s8409_s12 = smov 0   ;;  %s9600_s0 = inlined_call_operand.vmem [shape: f32[2,16,16,4], index: 0, kind: input, shape index: {}]   ;;  %s9601_s1 = inlined_call_operand.vmem [shape: bf16[2,36,8], index: 1, kind: input, shape index: {}]   ;;  %s9602_s2 = inlined_call_operand.vmem [shape: bf16[2,8,4], index: 2, kind: input, shape index: {}]   ;;  %s9603_s3 = inlined_call_operand.vmem [shape: f32[2,16,16,4], index: 3, kind: output, shape index: {}]  }
   0x1 LB: > { %s6460_s13 = sadd.s32 4294967295, %s8386_s12   ;;  %p6464_p0 = scmp.ge.s32.totalorder %s8386_s12, 1  ;;  %s8386_s12 = sphi %s8409_s12, %s13_s12  }
   0x2   : > { %p137_p1 = scmp.lt.s32.totalorder %s8386_s12, 3 }
   0x4   : > { %p138_p2 = pnand %p6464_p0, %p137_p1 }
   0x5   : > { %v8372_v0 = vld [vmem:[%s9601_s1] ss:$0 sps:$4 sm:$0xcc] (!%p138_p2)   ;;  %vm529_vm0 = vcmask (!%p138_p2), 1041408   ;;  %vm204_vm1 = vcmask (!%p138_p2), 31744   ;;  %vm239_vm2 = vcmask (!%p138_p2), 25600  }
   0x6   : > { %141 = sbr.rel (%p138_p2) target bundleno = 2026 (0x7ea), region = 32  ;;  %p161_p3 = scmp.lt.s32.totalorder (!%p138_p2), %s6460_s13, 1  ;;  %v480_v1 = vrot.slane (!%p138_p2), %v8372_v0, 2  ;;  %v8388_v2 = vmov (!%p138_p2), 0.0   ;;  %v8427_v3 = vld [vmem:[%s9601_s1] sm:$0x3] (!%p138_p2) }
   0x7   : > { %237 = vst.msk [vmem:[#allocation3] sm:$0xff] (!%p138_p2), %vm204_vm1, %v8388_v2  ;;  %238 = vst.msk [vmem:[#allocation3 + $0x8] sm:$0xff] (!%p138_p2), %vm204_vm1, %v8388_v2  ;;  %vm245_vm3 = vcmask (!%p138_p2), 24576   ;;  %vm3068_vm4 = vcmask (!%p138_p2), 1043456   ;;  %vm3019_vm5 = vcmask (!%p138_p2), 64512  }
   0x8   : > { %240 = vst.msk [vmem:[#allocation3 + $0x10] sm:$0x3] (!%p138_p2), %vm239_vm2, %v8388_v2  ;;  %244 = vst.msk [vmem:[#allocation3 + $0x1a8] sm:$0x3] (!%p138_p2), %vm239_vm2, %v8388_v2  ;;  %8343 = vmatprep.subr.msk.bf16.mxu0 (!%p138_p2), %vm529_vm0, %v480_v1  ;;  %v531_v4 = vsel (!%p138_p2), %vm529_vm0, %v480_v1, 0 }
   0x9   : > { %242 = vst.msk [vmem:[#allocation3 + $0x198] sm:$0xff] (!%p138_p2), %vm204_vm1, %v8388_v2  ;;  %243 = vst.msk [vmem:[#allocation3 + $0x1a0] sm:$0xff] (!%p138_p2), %vm204_vm1, %v8388_v2  ;;  %7152 = vmatpush3.bf16.msra.mxu0 (!%p138_p2), %v531_v4 }
   0xa   : > { %246 = vst.msk [vmem:[#allocation3] sm:$0x1] (!%p138_p2), %vm245_vm3, %v8388_v2  ;;  %247 = vst.msk [vmem:[#allocation3 + $0x18] sm:$0x1] (!%p138_p2), %vm245_vm3, %v8388_v2  ;;  %8344 = vmatprep.subr.msk.bf16.mxu0 (!%p138_p2), %vm529_vm0, %v8427_v3 }
   0xb   : > { %248 = vst.msk [vmem:[#allocation3 + $0x30] sm:$0x1] (!%p138_p2), %vm245_vm3, %v8388_v2  ;;  %249 = vst.msk [vmem:[#allocation3 + $0x48] sm:$0x1] (!%p138_p2), %vm245_vm3, %v8388_v2 }
   0xc   : > { %250 = vst.msk [vmem:[#allocation3 + $0x60] sm:$0x1] (!%p138_p2), %vm245_vm3, %v8388_v2  ;;  %251 = vst.msk [vmem:[#allocation3 + $0x78] sm:$0x1] (!%p138_p2), %vm245_vm3, %v8388_v2 }
   0xd   : > { %s9605_s13 = smov (!%p161_p3, %s6460_s13), 1  ;;  %252 = vst.msk [vmem:[#allocation3 + $0x90] sm:$0x1] %vm245_vm3, %v8388_v2  ;;  %253 = vst.msk [vmem:[#allocation3 + $0xa8] sm:$0x1] %vm245_vm3, %v8388_v2 }
   0xe   : > { %254 = vst.msk [vmem:[#allocation3 + $0xc0] sm:$0x1] %vm245_vm3, %v8388_v2  ;;  %255 = vst.msk [vmem:[#allocation3 + $0xd8] sm:$0x1] %vm245_vm3, %v8388_v2  ;;  %s6809_s18 = sshll.u32 %s9605_s13, 8  ;;  %v428_v11 = vld [vmem:[#allocation3 + $0x1] sm:$0xff] }
   0xf   : > { %256 = vst.msk [vmem:[#allocation3 + $0xf0] sm:$0x1] %vm245_vm3, %v8388_v2  ;;  %257 = vst.msk [vmem:[#allocation3 + $0x108] sm:$0x1] %vm245_vm3, %v8388_v2  ;;  %s8477_s21 = scalar_lea.vmem %s9600_s0, %s6809_s18  ;;  %v429_v12 = vld [vmem:[#allocation3 + $0x9] sm:$0xff]  ;;  %s9531_s9 = scalar_lea.vmem %s9603_s3, %s6809_s18 }
  0x10   : > { %258 = vst.msk [vmem:[#allocation3 + $0x120] sm:$0x1] %vm245_vm3, %v8388_v2  ;;  %259 = vst.msk [vmem:[#allocation3 + $0x138] sm:$0x1] %vm245_vm3, %v8388_v2  ;;  %v172_v5 = vld [vmem:[%s8477_s21] sm:$0xff]  ;;  %v173_v6 = vld [vmem:[%s8477_s21 + $0x8] sm:$0xff]  ;;  %v460_v14 = vpack.c.bf16 %v429_v12, %v428_v11 }
  0x11   : > { %260 = vst.msk [vmem:[#allocation3 + $0x150] sm:$0x1] %vm245_vm3, %v8388_v2  ;;  %261 = vst.msk [vmem:[#allocation3 + $0x168] sm:$0x1] %vm245_vm3, %v8388_v2  ;;  %v174_v7 = vld [vmem:[%s8477_s21 + $0x10] sm:$0xff]  ;;  %v175_v8 = vld [vmem:[%s8477_s21 + $0x18] sm:$0xff] }
  0x12   : > { %262 = vst.msk [vmem:[#allocation3 + $0x180] sm:$0x1] %vm245_vm3, %v8388_v2  ;;  %263 = vst.msk [vmem:[#allocation3 + $0x198] sm:$0x1] %vm245_vm3, %v8388_v2  ;;  %v176_v9 = vld [vmem:[%s8477_s21 + $0x20] sm:$0xff]  ;;  %v177_v10 = vld [vmem:[%s8477_s21 + $0x28] sm:$0xff]  ;;  %7153 = vmatprep.mubr.msk.bf16.mxu0 %vm204_vm1, %v460_v14 }
  0x13   : > { %264 = vst.msk [vmem:[#allocation3 + $0x11] sm:$0x1] %vm245_vm3, %v8388_v2  ;;  %265 = vst.msk [vmem:[#allocation3 + $0x29] sm:$0x1] %vm245_vm3, %v8388_v2  ;;  %v178_v13 = vld [vmem:[%s8477_s21 + $0x30] sm:$0xff]  ;;  %v179_v15 = vld [vmem:[%s8477_s21 + $0x38] sm:$0xff] }
  0x14   : > { %266 = vst.msk [vmem:[#allocation3 + $0x41] sm:$0x1] %vm245_vm3, %v8388_v2  ;;  %267 = vst.msk [vmem:[#allocation3 + $0x59] sm:$0x1] %vm245_vm3, %v8388_v2  ;;  %v180_v16 = vld [vmem:[%s8477_s21 + $0x40] sm:$0xff]  ;;  %v181_v17 = vld [vmem:[%s8477_s21 + $0x48] sm:$0xff] }
  0x15   : > { %268 = vst.msk [vmem:[#allocation3 + $0x71] sm:$0x1] %vm245_vm3, %v8388_v2  ;;  %269 = vst.msk [vmem:[#allocation3 + $0x89] sm:$0x1] %vm245_vm3, %v8388_v2  ;;  %v182_v18 = vld [vmem:[%s8477_s21 + $0x50] sm:$0xff]  ;;  %v183_v19 = vld [vmem:[%s8477_s21 + $0x58] sm:$0xff] }
  0x16   : > { %270 = vst.msk [vmem:[#allocation3 + $0xa1] sm:$0x1] %vm245_vm3, %v8388_v2  ;;  %271 = vst.msk [vmem:[#allocation3 + $0xb9] sm:$0x1] %vm245_vm3, %v8388_v2  ;;  %v184_v20 = vld [vmem:[%s8477_s21 + $0x60] sm:$0xff]  ;;  %v185_v21 = vld [vmem:[%s8477_s21 + $0x68] sm:$0xff] }
  0x17   : > { %272 = vst.msk [vmem:[#allocation3 + $0xd1] sm:$0x1] %vm245_vm3, %v8388_v2  ;;  %273 = vst.msk [vmem:[#allocation3 + $0xe9] sm:$0x1] %vm245_vm3, %v8388_v2  ;;  %v186_v22 = vld [vmem:[%s8477_s21 + $0x70] sm:$0xff]  ;;  %v187_v23 = vld [vmem:[%s8477_s21 + $0x78] sm:$0xff] }
  0x18   : > { %274 = vst.msk [vmem:[#allocation3 + $0x101] sm:$0x1] %vm245_vm3, %v8388_v2  ;;  %275 = vst.msk [vmem:[#allocation3 + $0x119] sm:$0x1] %vm245_vm3, %v8388_v2  ;;  %v188_v24 = vld [vmem:[%s8477_s21 + $0x80] sm:$0xff]  ;;  %v189_v25 = vld [vmem:[%s8477_s21 + $0x88] sm:$0xff] }
  0x19   : > { %276 = vst.msk [vmem:[#allocation3 + $0x131] sm:$0x1] %vm245_vm3, %v8388_v2  ;;  %277 = vst.msk [vmem:[#allocation3 + $0x149] sm:$0x1] %vm245_vm3, %v8388_v2  ;;  %v190_v26 = vld [vmem:[%s8477_s21 + $0x90] sm:$0xff]  ;;  %v191_v27 = vld [vmem:[%s8477_s21 + $0x98] sm:$0xff] }
  0x1a   : > { %278 = vst.msk [vmem:[#allocation3 + $0x161] sm:$0x1] %vm245_vm3, %v8388_v2  ;;  %279 = vst.msk [vmem:[#allocation3 + $0x179] sm:$0x1] %vm245_vm3, %v8388_v2  ;;  %v192_v28 = vld [vmem:[%s8477_s21 + $0xa0] sm:$0xff]  ;;  %v193_v29 = vld [vmem:[%s8477_s21 + $0xa8] sm:$0xff] }
  0x1b   : > { %280 = vst.msk [vmem:[#allocation3 + $0x191] sm:$0x1] %vm245_vm3, %v8388_v2  ;;  %281 = vst.msk [vmem:[#allocation3 + $0x1a9] sm:$0x1] %vm245_vm3, %v8388_v2  ;;  %v194_v43 = vld [vmem:[%s8477_s21 + $0xb0] sm:$0xff]  ;;  %v195_v44 = vld [vmem:[%s8477_s21 + $0xb8] sm:$0xff] }
  0x1c   : > { %205 = vst.msk [vmem:[#allocation2] sm:$0xff] %vm204_vm1, %v172_v5  ;;  %206 = vst.msk [vmem:[#allocation2 + $0x8] sm:$0xff] %vm204_vm1, %v173_v6  ;;  %v197_v14 = vld [vmem:[%s8477_s21 + $0xc8] sm:$0xff] }
  0x1d   : > { %207 = vst.msk [vmem:[#allocation2 + $0x10] sm:$0xff] %vm204_vm1, %v174_v7  ;;  %208 = vst.msk [vmem:[#allocation2 + $0x18] sm:$0xff] %vm204_vm1, %v175_v8 }
  0x1e   : > { %209 = vst.msk [vmem:[#allocation2 + $0x20] sm:$0xff] %vm204_vm1, %v176_v9  ;;  %210 = vst.msk [vmem:[#allocation2 + $0x28] sm:$0xff] %vm204_vm1, %v177_v10 }
  0x1f   : > { %211 = vst.msk [vmem:[#allocation2 + $0x30] sm:$0xff] %vm204_vm1, %v178_v13  ;;  %212 = vst.msk [vmem:[#allocation2 + $0x38] sm:$0xff] %vm204_vm1, %v179_v15  ;;  %v196_v13 = vld [vmem:[%s8477_s21 + $0xc0] sm:$0xff]  ;;  %v198_v15 = vld [vmem:[%s8477_s21 + $0xd0] sm:$0xff] }
  0x20   : > { %213 = vst.msk [vmem:[#allocation2 + $0x40] sm:$0xff] %vm204_vm1, %v180_v16  ;;  %214 = vst.msk [vmem:[#allocation2 + $0x48] sm:$0xff] %vm204_vm1, %v181_v17  ;;  %v199_v16 = vld [vmem:[%s8477_s21 + $0xd8] sm:$0xff]  ;;  %v200_v17 = vld [vmem:[%s8477_s21 + $0xe0] sm:$0xff] }
  0x21   : > { %215 = vst.msk [vmem:[#allocation2 + $0x50] sm:$0xff] %vm204_vm1, %v182_v18  ;;  %216 = vst.msk [vmem:[#allocation2 + $0x58] sm:$0xff] %vm204_vm1, %v183_v19  ;;  %v201_v18 = vld [vmem:[%s8477_s21 + $0xe8] sm:$0xff] }
  0x22   : > { %217 = vst.msk [vmem:[#allocation2 + $0x60] sm:$0xff] %vm204_vm1, %v184_v20  ;;  %218 = vst.msk [vmem:[#allocation2 + $0x68] sm:$0xff] %vm204_vm1, %v185_v21 }
  0x23   : > { %219 = vst.msk [vmem:[#allocation2 + $0x70] sm:$0xff] %vm204_vm1, %v186_v22  ;;  %220 = vst.msk [vmem:[#allocation2 + $0x78] sm:$0xff] %vm204_vm1, %v187_v23  ;;  %v282_v30 = vld [vmem:[#allocation2] sm:$0xff]  ;;  %v283_v31 = vld [vmem:[#allocation2 + $0x8] sm:$0xff]  ;;  %v743_v23 = vsel %vm529_vm0, %v8427_v3, 0 }
  0x24   : > { %221 = vst.msk [vmem:[#allocation2 + $0x80] sm:$0xff] %vm204_vm1, %v188_v24  ;;  %222 = vst.msk [vmem:[#allocation2 + $0x88] sm:$0xff] %vm204_vm1, %v189_v25  ;;  %v284_v32 = vld [vmem:[#allocation2 + $0x10] sm:$0xff]  ;;  %v314_v33 = vmax.f32 %v282_v30, 0.0  ;;  %v315_v34 = vmax.f32 %v283_v31, 0.0  ;;  %v285_v35 = vld [vmem:[#allocation2 + $0x18] sm:$0xff] }
  0x25   : > { %223 = vst.msk [vmem:[#allocation2 + $0x90] sm:$0xff] %vm204_vm1, %v190_v26  ;;  %224 = vst.msk [vmem:[#allocation2 + $0x98] sm:$0xff] %vm204_vm1, %v191_v27  ;;  %v316_v36 = vmax.f32 %v284_v32, 0.0  ;;  %v286_v37 = vld [vmem:[#allocation2 + $0x20] sm:$0xff]  ;;  %v287_v38 = vld [vmem:[#allocation2 + $0x28] sm:$0xff]  ;;  %v317_v39 = vmax.f32 %v285_v35, 0.0 }
  0x26   : > { %225 = vst.msk [vmem:[#allocation2 + $0xa0] sm:$0xff] %vm204_vm1, %v192_v28  ;;  %226 = vst.msk [vmem:[#allocation2 + $0xa8] sm:$0xff] %vm204_vm1, %v193_v29  ;;  %v318_v40 = vmax.f32 %v286_v37, 0.0  ;;  %v319_v41 = vmax.f32 %v287_v38, 0.0  ;;  %v288_v42 = vld [vmem:[#allocation2 + $0x30] sm:$0xff]  ;;  %v289_v45 = vld [vmem:[#allocation2 + $0x38] sm:$0xff] }
  0x27   : > { %347 = vst.msk [vmem:[#allocation3 + $0x19] sm:$0xff] %vm204_vm1, %v314_v33  ;;  %348 = vst.msk [vmem:[#allocation3 + $0x21] sm:$0xff] %vm204_vm1, %v315_v34  ;;  %v320_v46 = vmax.f32 %v288_v42, 0.0  ;;  %v290_v47 = vld [vmem:[#allocation2 + $0x40] sm:$0xff]  ;;  %v291_v48 = vld [vmem:[#allocation2 + $0x48] sm:$0xff]  ;;  %v321_v49 = vmax.f32 %v289_v45, 0.0 }
  0x28   : > { %349 = vst.msk [vmem:[#allocation3 + $0x31] sm:$0xff] %vm204_vm1, %v316_v36  ;;  %227 = vst.msk [vmem:[#allocation2 + $0xb0] sm:$0xff] %vm204_vm1, %v194_v43  ;;  %v322_v50 = vmax.f32 %v290_v47, 0.0  ;;  %v323_v51 = vmax.f32 %v291_v48, 0.0  ;;  %v292_v52 = vld [vmem:[#allocation2 + $0x50] sm:$0xff]  ;;  %v293_v53 = vld [vmem:[#allocation2 + $0x58] sm:$0xff] }
  0x29   : > { %228 = vst.msk [vmem:[#allocation2 + $0xb8] sm:$0xff] %vm204_vm1, %v195_v44  ;;  %350 = vst.msk [vmem:[#allocation3 + $0x39] sm:$0xff] %vm204_vm1, %v317_v39  ;;  %v294_v54 = vld [vmem:[#allocation2 + $0x60] sm:$0xff]  ;;  %v324_v55 = vmax.f32 %v292_v52, 0.0  ;;  %v325_v56 = vmax.f32 %v293_v53, 0.0  ;;  %v295_v57 = vld [vmem:[#allocation2 + $0x68] sm:$0xff] }
  0x2a   : > { %351 = vst.msk [vmem:[#allocation3 + $0x49] sm:$0xff] %vm204_vm1, %v318_v40  ;;  %352 = vst.msk [vmem:[#allocation3 + $0x51] sm:$0xff] %vm204_vm1, %v319_v41  ;;  %v326_v58 = vmax.f32 %v294_v54, 0.0  ;;  %v296_v59 = vld [vmem:[#allocation2 + $0x70] sm:$0xff]  ;;  %v297_v60 = vld [vmem:[#allocation2 + $0x78] sm:$0xff]  ;;  %v327_v61 = vmax.f32 %v295_v57, 0.0 }
  0x2b   : > { %353 = vst.msk [vmem:[#allocation3 + $0x61] sm:$0xff] %vm204_vm1, %v320_v46  ;;  %354 = vst.msk [vmem:[#allocation3 + $0x69] sm:$0xff] %vm204_vm1, %v321_v49  ;;  %v328_v62 = vmax.f32 %v296_v59, 0.0  ;;  %v329_v63 = vmax.f32 %v297_v60, 0.0  ;;  %v298_v0 = vld [vmem:[#allocation2 + $0x80] sm:$0xff]  ;;  %v299_v1 = vld [vmem:[#allocation2 + $0x88] sm:$0xff] }
  0x2c   : > { %355 = vst.msk [vmem:[#allocation3 + $0x79] sm:$0xff] %vm204_vm1, %v322_v50  ;;  %356 = vst.msk [vmem:[#allocation3 + $0x81] sm:$0xff] %vm204_vm1, %v323_v51  ;;  %v300_v2 = vld [vmem:[#allocation2 + $0x90] sm:$0xff]  ;;  %v330_v4 = vmax.f32 %v298_v0, 0.0  ;;  %v331_v5 = vmax.f32 %v299_v1, 0.0  ;;  %v301_v6 = vld [vmem:[#allocation2 + $0x98] sm:$0xff] }
  0x2d   : > { %357 = vst.msk [vmem:[#allocation3 + $0x91] sm:$0xff] %vm204_vm1, %v324_v55  ;;  %358 = vst.msk [vmem:[#allocation3 + $0x99] sm:$0xff] %vm204_vm1, %v325_v56  ;;  %v332_v7 = vmax.f32 %v300_v2, 0.0  ;;  %v302_v8 = vld [vmem:[#allocation2 + $0xa0] sm:$0xff]  ;;  %v303_v9 = vld [vmem:[#allocation2 + $0xa8] sm:$0xff]  ;;  %v333_v10 = vmax.f32 %v301_v6, 0.0 }
  0x2e   : > { %359 = vst.msk [vmem:[#allocation3 + $0xa9] sm:$0xff] %vm204_vm1, %v326_v58  ;;  %360 = vst.msk [vmem:[#allocation3 + $0xb1] sm:$0xff] %vm204_vm1, %v327_v61  ;;  %v334_v11 = vmax.f32 %v302_v8, 0.0  ;;  %v335_v12 = vmax.f32 %v303_v9, 0.0  ;;  %v430_v19 = vld [vmem:[#allocation3 + $0x19] sm:$0xff]  ;;  %v431_v20 = vld [vmem:[#allocation3 + $0x21] sm:$0xff] }
  0x2f   : > { %361 = vst.msk [vmem:[#allocation3 + $0xc1] sm:$0xff] %vm204_vm1, %v328_v62  ;;  %362 = vst.msk [vmem:[#allocation3 + $0xc9] sm:$0xff] %vm204_vm1, %v329_v63  ;;  %v432_v21 = vld [vmem:[#allocation3 + $0x31] sm:$0xff]  ;;  %v8562_v22 = vpack.c.bf16 %v431_v20, %v430_v19  ;;  %v8571_v28 = vld [vmem:[%s9601_s1 + $0x4] sm:$0x3] }
  0x30   : > { %363 = vst.msk [vmem:[#allocation3 + $0xd9] sm:$0xff] %vm204_vm1, %v330_v4  ;;  %364 = vst.msk [vmem:[#allocation3 + $0xe1] sm:$0xff] %vm204_vm1, %v331_v5  ;;  %v433_v24 = vld [vmem:[#allocation3 + $0x39] sm:$0xff]  ;;  %v304_v26 = vld [vmem:[#allocation2 + $0xb0] sm:$0xff] }
  0x31   : > { %365 = vst.msk [vmem:[#allocation3 + $0xf1] sm:$0xff] %vm204_vm1, %v332_v7  ;;  %229 = vst.msk [vmem:[#allocation2 + $0xc0] sm:$0xff] %vm204_vm1, %v196_v13  ;;  %v8566_v25 = vpack.c.bf16 %v433_v24, %v432_v21  ;;  %v305_v27 = vld [vmem:[#allocation2 + $0xb8] sm:$0xff]  ;;  %7154 = vmatmul.mubr.msk.bf16.vlgmr.msra.gmra.mrb[0].mxu0 %vm204_vm1, %v8562_v22  ;;  %v336_v29 = vmax.f32 %v304_v26, 0.0  ;;  %v434_v3 = vld [vmem:[#allocation3 + $0x49] sm:$0xff] }
  0x32   : > { %230 = vst.msk [vmem:[#allocation2 + $0xc8] sm:$0xff] %vm204_vm1, %v197_v14  ;;  %231 = vst.msk [vmem:[#allocation2 + $0xd0] sm:$0xff] %vm204_vm1, %v198_v15  ;;  %v337_v30 = vmax.f32 %v305_v27, 0.0  ;;  %7186 = vmatpush3.bf16.msra.mxu0 %v743_v23  ;;  %v435_v31 = vld [vmem:[#allocation3 + $0x51] sm:$0xff]  ;;  %v436_v32 = vld [vmem:[#allocation3 + $0x61] sm:$0xff] }
  0x33   : > { %366 = vst.msk [vmem:[#allocation3 + $0xf9] sm:$0xff] %vm204_vm1, %v333_v10  ;;  %367 = vst.msk [vmem:[#allocation3 + $0x109] sm:$0xff] %vm204_vm1, %v334_v11  ;;  %7157 = vmatprep.mubr.msk.bf16.mxu0 %vm204_vm1, %v8566_v25  ;;  %v437_v33 = vld [vmem:[#allocation3 + $0x69] sm:$0xff]  ;;  %8345 = vmatprep.subr.msk.bf16.mxu0 %vm529_vm0, %v8571_v28  ;;  %v8581_v34 = vpack.c.bf16 %v435_v31, %v434_v3  ;;  %v438_v48 = vld [vmem:[#allocation3 + $0x79] sm:$0xff]  ;;  %v1004_v3 = vsel %vm529_vm0, %v8571_v28, 0 }
  0x34   : > { %368 = vst.msk [vmem:[#allocation3 + $0x111] sm:$0xff] %vm204_vm1, %v335_v12  ;;  %232 = vst.msk [vmem:[#allocation2 + $0xd8] sm:$0xff] %vm204_vm1, %v199_v16  ;;  %v8583_v35 = vpack.c.bf16 %v437_v33, %v436_v32  ;;  %v439_v49 = vld [vmem:[#allocation3 + $0x81] sm:$0xff]  ;;  %v440_v50 = vld [vmem:[#allocation3 + $0x91] sm:$0xff] }
  0x35   : > { %233 = vst.msk [vmem:[#allocation2 + $0xe0] sm:$0xff] %vm204_vm1, %v200_v17  ;;  %234 = vst.msk [vmem:[#allocation2 + $0xe8] sm:$0xff] %vm204_vm1, %v201_v18  ;;  %v441_v51 = vld [vmem:[#allocation3 + $0x99] sm:$0xff]  ;;  %v8595_v52 = vpack.c.bf16 %v439_v49, %v438_v48  ;;  %v442_v54 = vld [vmem:[#allocation3 + $0xa9] sm:$0xff] }
  0x36   : > { %369 = vst.msk [vmem:[#allocation3 + $0x121] sm:$0xff] %vm204_vm1, %v336_v29  ;;  %370 = vst.msk [vmem:[#allocation3 + $0x129] sm:$0xff] %vm204_vm1, %v337_v30  ;;  %v8597_v53 = vpack.c.bf16 %v441_v51, %v440_v50  ;;  %v443_v55 = vld [vmem:[#allocation3 + $0xb1] sm:$0xff]  ;;  %v444_v56 = vld [vmem:[#allocation3 + $0xc1] sm:$0xff] }
  0x37   : > { %v445_v57 = vld [vmem:[#allocation3 + $0xc9] sm:$0xff]  ;;  %v8603_v58 = vpack.c.bf16 %v443_v55, %v442_v54  ;;  %v446_v60 = vld [vmem:[#allocation3 + $0xd9] sm:$0xff]  ;;  %v447_v61 = vld [vmem:[#allocation3 + $0xe1] sm:$0xff] }
  0x38   : > { %v306_v36 = vld [vmem:[#allocation2 + $0xc0] sm:$0xff]  ;;  %v8605_v59 = vpack.c.bf16 %v445_v57, %v444_v56  ;;  %v448_v62 = vld [vmem:[#allocation3 + $0xf1] sm:$0xff]  ;;  %v8611_v0 = vpack.c.bf16 %v447_v61, %v446_v60  ;;  %v380_v18 = vld [vmem:[#allocation3 + $0x8] sm:$0xff] }
  0x39   : > { %v307_v37 = vld [vmem:[#allocation2 + $0xc8] sm:$0xff]  ;;  %v308_v38 = vld [vmem:[#allocation2 + $0xd0] sm:$0xff]  ;;  %v338_v39 = vmax.f32 %v306_v36, 0.0  ;;  %7158 = vmatmul.mubr.msk.bf16.gmra.mrb[4].mxu0 %vm204_vm1, %v8581_v34  ;;  %v379_v17 = vld [vmem:[#allocation3] sm:$0xff] }
  0x3a   : > { %v339_v40 = vmax.f32 %v307_v37, 0.0  ;;  %v340_v42 = vmax.f32 %v308_v38, 0.0  ;;  %7161 = vmatprep.mubr.msk.bf16.mxu0 %vm204_vm1, %v8583_v35  ;;  %v449_v63 = vld [vmem:[#allocation3 + $0xf9] sm:$0xff]  ;;  %v450_v2 = vld [vmem:[#allocation3 + $0x109] sm:$0xff]  ;;  %v411_v20 = vpack.c.bf16 %v380_v18, %v379_v17 }
  0x3b   : > { %v309_v41 = vld [vmem:[#allocation2 + $0xd8] sm:$0xff]  ;;  %371 = vst.msk [vmem:[#allocation3 + $0x139] sm:$0xff] %vm204_vm1, %v338_v39  ;;  %v8613_v1 = vpack.c.bf16 %v449_v63, %v448_v62  ;;  %v382_v23 = vld [vmem:[#allocation3 + $0x20] sm:$0xff]  ;;  %v383_v24 = vld [vmem:[#allocation3 + $0x30] sm:$0xff] }
  0x3c   : > { %v310_v43 = vld [vmem:[#allocation2 + $0xe0] sm:$0xff]  ;;  %v311_v44 = vld [vmem:[#allocation2 + $0xe8] sm:$0xff]  ;;  %v341_v45 = vmax.f32 %v309_v41, 0.0  ;;  %372 = vst.msk [vmem:[#allocation3 + $0x141] sm:$0xff] %vm204_vm1, %v339_v40  ;;  %373 = vst.msk [vmem:[#allocation3 + $0x151] sm:$0xff] %vm204_vm1, %v340_v42 }
  0x3d   : > { %v342_v46 = vmax.f32 %v310_v43, 0.0  ;;  %v343_v47 = vmax.f32 %v311_v44, 0.0  ;;  %v451_v4 = vld [vmem:[#allocation3 + $0x111] sm:$0xff]  ;;  %v452_v5 = vld [vmem:[#allocation3 + $0x121] sm:$0xff]  ;;  %v453_v6 = vld [vmem:[#allocation3 + $0x129] sm:$0xff] }
  0x3e   : > { %374 = vst.msk [vmem:[#allocation3 + $0x159] sm:$0xff] %vm204_vm1, %v341_v45  ;;  %v8619_v7 = vpack.c.bf16 %v451_v4, %v450_v2  ;;  %v8621_v8 = vpack.c.bf16 %v453_v6, %v452_v5  ;;  %v381_v21 = vld [vmem:[#allocation3 + $0x18] sm:$0xff]  ;;  %v8643_v27 = vld [vmem:[%s9601_s1 + $0x4] ss:$0 sps:$4 sm:$0xcc]   ;;  %v385_v32 = vld [vmem:[#allocation3 + $0x48] sm:$0xff] }
  0x3f   : > { %375 = vst.msk [vmem:[#allocation3 + $0x169] sm:$0xff] %vm204_vm1, %v342_v46  ;;  %376 = vst.msk [vmem:[#allocation3 + $0x171] sm:$0xff] %vm204_vm1, %v343_v47  ;;  %v384_v26 = vld [vmem:[#allocation3 + $0x38] sm:$0xff]  ;;  %v8645_v29 = vpack.c.bf16 %v382_v23, %v381_v21  ;;  %v1251_v31 = vrot.slane %v8643_v27, 2  ;;  %v386_v33 = vld [vmem:[#allocation3 + $0x50] sm:$0xff] }
  0x40   : > { %v8647_v30 = vpack.c.bf16 %v384_v26, %v383_v24  ;;  %v387_v36 = vld [vmem:[#allocation3 + $0x60] sm:$0xff]  ;;  %v388_v37 = vld [vmem:[#allocation3 + $0x68] sm:$0xff]  ;;  %v8659_v38 = vpack.c.bf16 %v386_v33, %v385_v32  ;;  %v389_v39 = vld [vmem:[#allocation3 + $0x78] sm:$0xff] }
  0x41   : > { %7162 = vmatmul.mubr.msk.bf16.gmra.mrb[8].mxu0 %vm204_vm1, %v8595_v52  ;;  %v8661_v28 = vpack.c.bf16 %v388_v37, %v387_v36  ;;  %v390_v40 = vld [vmem:[#allocation3 + $0x80] sm:$0xff]  ;;  %v391_v41 = vld [vmem:[#allocation3 + $0x90] sm:$0xff]  ;;  %v392_v42 = vld [vmem:[#allocation3 + $0x98] sm:$0xff] }
  0x42   : > { %7165 = vmatprep.mubr.msk.bf16.mxu0 %vm204_vm1, %v8597_v53  ;;  %v454_v9 = vld [vmem:[#allocation3 + $0x139] sm:$0xff]  ;;  %v8667_v43 = vpack.c.bf16 %v390_v40, %v389_v39  ;;  %v8669_v44 = vpack.c.bf16 %v392_v42, %v391_v41  ;;  %v393_v45 = vld [vmem:[#allocation3 + $0xa8] sm:$0xff]  ;;  %v394_v46 = vld [vmem:[#allocation3 + $0xb0] sm:$0xff] }
  0x43   : > { %v455_v10 = vld [vmem:[#allocation3 + $0x141] sm:$0xff]  ;;  %v456_v11 = vld [vmem:[#allocation3 + $0x151] sm:$0xff]  ;;  %v8675_v49 = vpack.c.bf16 %v394_v46, %v393_v45  ;;  %v1301_v46 = vsel %vm529_vm0, %v1251_v31, 0 }
  0x44   : > { %v8627_v13 = vpack.c.bf16 %v455_v10, %v454_v9  ;;  %v395_v47 = vld [vmem:[#allocation3 + $0xc0] sm:$0xff]  ;;  %v396_v48 = vld [vmem:[#allocation3 + $0xc8] sm:$0xff]  ;;  %v397_v51 = vld [vmem:[#allocation3 + $0xd8] sm:$0xff] }
  0x45   : > { %v457_v12 = vld [vmem:[#allocation3 + $0x159] sm:$0xff]  ;;  %v8677_v50 = vpack.c.bf16 %v396_v48, %v395_v47  ;;  %v399_v55 = vld [vmem:[#allocation3 + $0xf0] sm:$0xff]  ;;  %v401_v61 = vld [vmem:[#allocation3 + $0x108] sm:$0xff] }
  0x46   : > { %v8629_v14 = vpack.c.bf16 %v457_v12, %v456_v11  ;;  %v458_v15 = vld [vmem:[#allocation3 + $0x169] sm:$0xff]  ;;  %v459_v16 = vld [vmem:[#allocation3 + $0x171] sm:$0xff]  ;;  %v398_v54 = vld [vmem:[#allocation3 + $0xe0] sm:$0xff] }
  0x47   : > { %v8635_v19 = vpack.c.bf16 %v459_v16, %v458_v15  ;;  %v400_v56 = vld [vmem:[#allocation3 + $0xf8] sm:$0xff]  ;;  %v8683_v57 = vpack.c.bf16 %v398_v54, %v397_v51  ;;  %v402_v62 = vld [vmem:[#allocation3 + $0x110] sm:$0xff]  ;;  %v403_v63 = vld [vmem:[#allocation3 + $0x120] sm:$0xff] }
  0x48   : > { %v8685_v60 = vpack.c.bf16 %v400_v56, %v399_v55  ;;  %v404_v2 = vld [vmem:[#allocation3 + $0x128] sm:$0xff]  ;;  %v202_v4 = vld [vmem:[%s8477_s21 + $0xf0] sm:$0xff]  ;;  %v203_v5 = vld [vmem:[%s8477_s21 + $0xf8] sm:$0xff]  ;;  %v8693_v6 = vpack.c.bf16 %v402_v62, %v401_v61 }
  0x49   : > { %7166 = vmatmul.mubr.msk.bf16.gmra.mrb[12].mxu0 %vm204_vm1, %v8603_v58  ;;  %235 = vst.msk [vmem:[#allocation2 + $0xf0] sm:$0xff] %vm204_vm1, %v202_v4  ;;  %236 = vst.msk [vmem:[#allocation2 + $0xf8] sm:$0xff] %vm204_vm1, %v203_v5  ;;  %v8697_v9 = vpack.c.bf16 %v404_v2, %v403_v63  ;;  %v405_v10 = vld [vmem:[#allocation3 + $0x138] sm:$0xff]  ;;  %v406_v11 = vld [vmem:[#allocation3 + $0x140] sm:$0xff] }
  0x4a   : > { %7169 = vmatprep.mubr.msk.bf16.mxu0 %vm204_vm1, %v8605_v59  ;;  %v407_v12 = vld [vmem:[#allocation3 + $0x150] sm:$0xff]  ;;  %v408_v15 = vld [vmem:[#allocation3 + $0x158] sm:$0xff]  ;;  %v8703_v18 = vpack.c.bf16 %v406_v11, %v405_v10  ;;  %v409_v24 = vld [vmem:[#allocation3 + $0x168] sm:$0xff] }
  0x4b   : > { %v8705_v23 = vpack.c.bf16 %v408_v15, %v407_v12  ;;  %v410_v26 = vld [vmem:[#allocation3 + $0x170] sm:$0xff]  ;;  %v908_v37 = vld [vmem:[#allocation3 + $0x1a] sm:$0xff]  ;;  %v909_v39 = vld [vmem:[#allocation3 + $0x22] sm:$0xff] }
  0x4c   : > { %v907_v32 = vld [vmem:[#allocation3 + $0xa] sm:$0xff]  ;;  %v8713_v33 = vpack.c.bf16 %v410_v26, %v409_v24  ;;  %v910_v40 = vld [vmem:[#allocation3 + $0x32] sm:$0xff]  ;;  %v911_v41 = vld [vmem:[#allocation3 + $0x3a] sm:$0xff]  ;;  %v8718_v42 = vpack.c.bf16 %v909_v39, %v908_v37 }
  0x4d   : > { %v8720_v45 = vpack.c.bf16 %v911_v41, %v910_v40  ;;  %v1544_v47 = vld [vmem:[%s9601_s1 + $0x8] sm:$0x3]  ;;  %v912_v48 = vld [vmem:[#allocation3 + $0x4a] sm:$0xff]  ;;  %v913_v51 = vld [vmem:[#allocation3 + $0x52] sm:$0xff] }
  0x4e   : > { %v914_v54 = vld [vmem:[#allocation3 + $0x62] sm:$0xff]  ;;  %v915_v55 = vld [vmem:[#allocation3 + $0x6a] sm:$0xff]  ;;  %v8733_v27 = vpack.c.bf16 %v913_v51, %v912_v48  ;;  %v916_v56 = vld [vmem:[#allocation3 + $0x7a] sm:$0xff] }
  0x4f   : > { %v917_v61 = vld [vmem:[#allocation3 + $0x82] sm:$0xff]  ;;  %v918_v62 = vld [vmem:[#allocation3 + $0x92] sm:$0xff]  ;;  %v919_v63 = vld [vmem:[#allocation3 + $0x9a] sm:$0xff] }
  0x50   : > { %v312_v16 = vld [vmem:[#allocation2 + $0xf0] sm:$0xff]  ;;  %v313_v17 = vld [vmem:[#allocation2 + $0xf8] sm:$0xff]  ;;  %v8741_v2 = vpack.c.bf16 %v917_v61, %v916_v56  ;;  %v8743_v4 = vpack.c.bf16 %v919_v63, %v918_v62  ;;  %v922_v11 = vld [vmem:[#allocation3 + $0xc2] sm:$0xff] }
  0x51   : > { %7170 = vmatmul.mubr.msk.bf16.gmra.mrb[16].mxu0 %vm204_vm1, %v8611_v0  ;;  %v345_v21 = vmax.f32 %v313_v17, 0.0  ;;  %v920_v5 = vld [vmem:[#allocation3 + $0xaa] sm:$0xff]  ;;  %v921_v10 = vld [vmem:[#allocation3 + $0xb2] sm:$0xff]  ;;  %v924_v17 = vld [vmem:[#allocation3 + $0xda] sm:$0xff] }
  0x52   : > { %7173 = vmatprep.mubr.msk.bf16.mxu0 %vm204_vm1, %v8613_v1  ;;  %v923_v12 = vld [vmem:[#allocation3 + $0xca] sm:$0xff]  ;;  %v8749_v15 = vpack.c.bf16 %v921_v10, %v920_v5  ;;  %v927_v24 = vld [vmem:[#allocation3 + $0xfa] sm:$0xff]  ;;  %v930_v37 = vld [vmem:[#allocation3 + $0x122] sm:$0xff]  ;;  %v1594_v10 = vsel %vm529_vm0, %v1544_v47, 0 }
  0x53   : > { %378 = vst.msk [vmem:[#allocation3 + $0x189] sm:$0xff] %vm204_vm1, %v345_v21  ;;  %v926_v21 = vld [vmem:[#allocation3 + $0xf2] sm:$0xff]  ;;  %v931_v39 = vld [vmem:[#allocation3 + $0x12a] sm:$0xff]  ;;  %v933_v48 = vld [vmem:[#allocation3 + $0x142] sm:$0xff] }
  0x54   : > { %v8767_v41 = vpack.c.bf16 %v931_v39, %v930_v37  ;;  %v934_v51 = vld [vmem:[#allocation3 + $0x152] sm:$0xff]  ;;  %v936_v61 = vld [vmem:[#allocation3 + $0x16a] sm:$0xff]  ;;  %v8374_v5 = vld [vmem:[%s9601_s1 + $0x8] ss:$0 sps:$4 sm:$0xcc]  }
  0x55   : > { %v937_v62 = vld [vmem:[#allocation3 + $0x172] sm:$0xff] }
  0x56   : > { %v8781_v63 = vpack.c.bf16 %v937_v62, %v936_v61 }
  0x59   : > { %7174 = vmatmul.mubr.msk.bf16.gmra.mrb[20].mxu0 %vm204_vm1, %v8619_v7 }
  0x5a   : > { %7177 = vmatprep.mubr.msk.bf16.mxu0 %vm204_vm1, %v8621_v8 }
  0x61   : > { %7178 = vmatmul.mubr.msk.bf16.gmra.mrb[24].mxu0 %vm204_vm1, %v8627_v13 }
  0x62   : > { %7181 = vmatprep.mubr.msk.bf16.mxu0 %vm204_vm1, %v8629_v14 }
  0x69   : > { %7182 = vmatmul.mubr.msk.bf16.gmra.mrb[28].mxu0 %vm204_vm1, %v8635_v19 }
  0x6a   : > { %7187 = vmatprep.mubr.msk.bf16.mxu0 %vm204_vm1, %v411_v20  ;;  %v344_v20 = vmax.f32 %v312_v16, 0.0  ;;  %v8751_v16 = vpack.c.bf16 %v923_v12, %v922_v11  ;;  %v1841_v11 = vrot.slane %v8374_v5, 2  ;;  %v2398_v5 = vld [vmem:[#allocation3 + $0x109] sm:$0xff] }
  0x6c   : > { %377 = vst.msk [vmem:[#allocation3 + $0x181] sm:$0xff] %vm204_vm1, %v344_v20  ;;  %v925_v20 = vld [vmem:[#allocation3 + $0xe2] sm:$0xff] }
  0x6d   : > { %v8757_v26 = vpack.c.bf16 %v925_v20, %v924_v17  ;;  %v1891_v17 = vsel %vm529_vm0, %v1841_v11, 0  ;;  %v2135_v20 = vld [vmem:[%s9601_s1 + $0xc] sm:$0x3] }
  0x71   : > { %7188 = vmatmul.mubr.msk.bf16.vlgmr.msra.gmra.mrb[0].mxu0 %vm204_vm1, %v8645_v29 }
  0x72   : > { %7220 = vmatpush3.bf16.msra.mxu0 %v1004_v3  ;;  %7191 = vmatprep.mubr.msk.bf16.mxu0 %vm204_vm1, %v8647_v30  ;;  %v906_v3 = vld [vmem:[#allocation3 + $0x2] sm:$0xff] }
  0x73   : > { %8346 = vmatprep.subr.msk.bf16.mxu0 %vm529_vm0, %v1251_v31  ;;  %v938_v36 = vpack.c.bf16 %v907_v32, %v906_v3  ;;  %v8735_v31 = vpack.c.bf16 %v915_v55, %v914_v54  ;;  %v8759_v3 = vpack.c.bf16 %v927_v24, %v926_v21  ;;  %v928_v32 = vld [vmem:[#allocation3 + $0x10a] sm:$0xff]  ;;  %v935_v54 = vld [vmem:[#allocation3 + $0x15a] sm:$0xff] }
  0x74   : > { %v8775_v56 = vpack.c.bf16 %v935_v54, %v934_v51  ;;  %v2390_v21 = vld [vmem:[#allocation3 + $0xa9] sm:$0xff]  ;;  %v2391_v24 = vld [vmem:[#allocation3 + $0xb1] sm:$0xff]  ;;  %v2397_v54 = vld [vmem:[#allocation3 + $0xf9] sm:$0xff] }
  0x75   : > { %v2417_v37 = vpack.c.bf16 %v2391_v24, %v2390_v21  ;;  %v2396_v51 = vld [vmem:[#allocation3 + $0xf1] sm:$0xff] }
  0x76   : > { %v2420_v62 = vpack.c.bf16 %v2397_v54, %v2396_v51 }
  0x79   : > { %7192 = vmatmul.mubr.msk.bf16.gmra.mrb[4].mxu0 %vm204_vm1, %v8659_v38 }
  0x7a   : > { %7195 = vmatprep.mubr.msk.bf16.mxu0 %vm204_vm1, %v8661_v28 }
  0x81   : > { %7196 = vmatmul.mubr.msk.bf16.gmra.mrb[8].mxu0 %vm204_vm1, %v8667_v43 }
  0x82   : > { %7199 = vmatprep.mubr.msk.bf16.mxu0 %vm204_vm1, %v8669_v44 }
  0x89   : > { %7200 = vmatmul.mubr.msk.bf16.gmra.mrb[12].mxu0 %vm204_vm1, %v8675_v49 }
  0x8a   : > { %7203 = vmatprep.mubr.msk.bf16.mxu0 %vm204_vm1, %v8677_v50 }
  0x91   : > { %7204 = vmatmul.mubr.msk.bf16.gmra.mrb[16].mxu0 %vm204_vm1, %v8683_v57 }
  0x92   : > { %7207 = vmatprep.mubr.msk.bf16.mxu0 %vm204_vm1, %v8685_v60 }
  0x99   : > { %7208 = vmatmul.mubr.msk.bf16.gmra.mrb[20].mxu0 %vm204_vm1, %v8693_v6 }
  0x9a   : > { %7211 = vmatprep.mubr.msk.bf16.mxu0 %vm204_vm1, %v8697_v9 }
  0xa1   : > { %7212 = vmatmul.mubr.msk.bf16.gmra.mrb[24].mxu0 %vm204_vm1, %v8703_v18 }
  0xa2   : > { %7215 = vmatprep.mubr.msk.bf16.mxu0 %vm204_vm1, %v8705_v23 }
  0xa9   : > { %7216 = vmatmul.mubr.msk.bf16.gmra.mrb[28].mxu0 %vm204_vm1, %v8713_v33 }
  0xaa   : > { %7221 = vmatprep.mubr.msk.bf16.mxu0 %vm204_vm1, %v938_v36  ;;  %v929_v36 = vld [vmem:[#allocation3 + $0x112] sm:$0xff] }
  0xab   : > { %v8765_v40 = vpack.c.bf16 %v929_v36, %v928_v32  ;;  %v2392_v32 = vld [vmem:[#allocation3 + $0xc1] sm:$0xff]  ;;  %v2393_v36 = vld [vmem:[#allocation3 + $0xc9] sm:$0xff] }
  0xac   : > { %v2418_v39 = vpack.c.bf16 %v2393_v36, %v2392_v32 }
  0xb1   : > { %7222 = vmatmul.mubr.msk.bf16.vlgmr.msra.gmra.mrb[0].mxu0 %vm204_vm1, %v8718_v42 }
  0xb2   : > { %7254 = vmatpush3.bf16.msra.mxu0 %v1301_v46  ;;  %7225 = vmatprep.mubr.msk.bf16.mxu0 %vm204_vm1, %v8720_v45  ;;  %v932_v46 = vld [vmem:[#allocation3 + $0x13a] sm:$0xff] }
  0xb3   : > { %8347 = vmatprep.subr.msk.bf16.mxu0 %vm529_vm0, %v1544_v47  ;;  %v8773_v55 = vpack.c.bf16 %v933_v48, %v932_v46  ;;  %v1230_v47 = vld [vmem:[#allocation3 + $0x188] sm:$0xff]  ;;  %v2394_v46 = vld [vmem:[#allocation3 + $0xd9] sm:$0xff] }
  0xb4   : > { %v2395_v48 = vld [vmem:[#allocation3 + $0xe1] sm:$0xff] }
  0xb5   : > { %v2419_v61 = vpack.c.bf16 %v2395_v48, %v2394_v46 }
  0xb9   : > { %7226 = vmatmul.mubr.msk.bf16.gmra.mrb[4].mxu0 %vm204_vm1, %v8733_v27 }
  0xba   : > { %7229 = vmatprep.mubr.msk.bf16.mxu0 %vm204_vm1, %v8735_v31 }
  0xc1   : > { %7230 = vmatmul.mubr.msk.bf16.gmra.mrb[8].mxu0 %vm204_vm1, %v8741_v2 }
  0xc2   : > { %7233 = vmatprep.mubr.msk.bf16.mxu0 %vm204_vm1, %v8743_v4 }
  0xc9   : > { %7234 = vmatmul.mubr.msk.bf16.gmra.mrb[12].mxu0 %vm204_vm1, %v8749_v15 }
  0xca   : > { %7237 = vmatprep.mubr.msk.bf16.mxu0 %vm204_vm1, %v8751_v16 }
  0xd1   : > { %7238 = vmatmul.mubr.msk.bf16.gmra.mrb[16].mxu0 %vm204_vm1, %v8757_v26 }
  0xd2   : > { %7241 = vmatprep.mubr.msk.bf16.mxu0 %vm204_vm1, %v8759_v3 }
  0xd9   : > { %7242 = vmatmul.mubr.msk.bf16.gmra.mrb[20].mxu0 %vm204_vm1, %v8765_v40 }
  0xda   : > { %7245 = vmatprep.mubr.msk.bf16.mxu0 %vm204_vm1, %v8767_v41 }
  0xe1   : > { %7246 = vmatmul.mubr.msk.bf16.gmra.mrb[24].mxu0 %vm204_vm1, %v8773_v55 }
  0xe2   : > { %7249 = vmatprep.mubr.msk.bf16.mxu0 %vm204_vm1, %v8775_v56 }
  0xe9   : > { %7250 = vmatmul.mubr.msk.bf16.gmra.mrb[28].mxu0 %vm204_vm1, %v8781_v63 }
  0xea   : > { %7255 = vmatprep.mubr.msk.bf16.mxu0 %vm204_vm1, %v8645_v29  ;;  %v1229_v29 = vld [vmem:[#allocation3 + $0x180] sm:$0xff] }
  0xeb   : > { %v8820_v12 = vpack.c.bf16 %v1230_v47, %v1229_v29  ;;  %v2401_v29 = vld [vmem:[#allocation3 + $0x129] sm:$0xff] }
  0xf1   : > { %7256 = vmatmul.mubr.msk.bf16.vlgmr.msra.gmra.mrb[0].mxu0 %vm204_vm1, %v8647_v30 }
  0xf2   : > { %7288 = vmatpush3.bf16.msra.mxu0 %v1594_v10  ;;  %7259 = vmatprep.mubr.msk.bf16.mxu0 %vm204_vm1, %v8659_v38  ;;  %v2399_v10 = vld [vmem:[#allocation3 + $0x111] sm:$0xff] }
  0xf3   : > { %8348 = vmatprep.subr.msk.bf16.mxu0 %vm529_vm0, %v1841_v11  ;;  %v2400_v11 = vld [vmem:[#allocation3 + $0x121] sm:$0xff]  ;;  %v2421_v47 = vpack.c.bf16 %v2399_v10, %v2398_v5 }
  0xf9   : > { %7260 = vmatmul.mubr.msk.bf16.gmra.mrb[4].mxu0 %vm204_vm1, %v8661_v28 }
  0xfa   : > { %7263 = vmatprep.mubr.msk.bf16.mxu0 %vm204_vm1, %v8667_v43 }
 0x101   : > { %7264 = vmatmul.mubr.msk.bf16.gmra.mrb[8].mxu0 %vm204_vm1, %v8669_v44 }
 0x102   : > { %7267 = vmatprep.mubr.msk.bf16.mxu0 %vm204_vm1, %v8675_v49 }
 0x109   : > { %7268 = vmatmul.mubr.msk.bf16.gmra.mrb[12].mxu0 %vm204_vm1, %v8677_v50 }
 0x10a   : > { %7271 = vmatprep.mubr.msk.bf16.mxu0 %vm204_vm1, %v8683_v57 }
 0x111   : > { %7272 = vmatmul.mubr.msk.bf16.gmra.mrb[16].mxu0 %vm204_vm1, %v8685_v60 }
 0x112   : > { %7275 = vmatprep.mubr.msk.bf16.mxu0 %vm204_vm1, %v8693_v6 }
 0x119   : > { %7276 = vmatmul.mubr.msk.bf16.gmra.mrb[20].mxu0 %vm204_vm1, %v8697_v9 }
 0x11a   : > { %7279 = vmatprep.mubr.msk.bf16.mxu0 %vm204_vm1, %v8703_v18 }
 0x121   : > { %7280 = vmatmul.mubr.msk.bf16.gmra.mrb[24].mxu0 %vm204_vm1, %v8705_v23 }
 0x122   : > { %7283 = vmatprep.mubr.msk.bf16.mxu0 %vm204_vm1, %v8713_v33 }
 0x129   : > { %7284 = vmatmul.mubr.msk.bf16.gmra.mrb[28].mxu0 %vm204_vm1, %v8820_v12 }
 0x12a   : > { %7289 = vmatprep.mubr.msk.bf16.mxu0 %vm204_vm1, %v8562_v22  ;;  %v1526_v22 = vld [vmem:[#allocation3 + $0x181] sm:$0xff] }
 0x131   : > { %7290 = vmatmul.mubr.msk.bf16.vlgmr.msra.gmra.mrb[0].mxu0 %vm204_vm1, %v8566_v25  ;;  %v1527_v25 = vld [vmem:[#allocation3 + $0x189] sm:$0xff] }
 0x132   : > { %7322 = vmatpush3.bf16.msra.mxu0 %v1891_v17  ;;  %7293 = vmatprep.mubr.msk.bf16.mxu0 %vm204_vm1, %v8581_v34  ;;  %v8859_v34 = vpack.c.bf16 %v1527_v25, %v1526_v22  ;;  %v2402_v17 = vld [vmem:[#allocation3 + $0x139] sm:$0xff]  ;;  %v2404_v22 = vld [vmem:[#allocation3 + $0x151] sm:$0xff] }
 0x133   : > { %8349 = vmatprep.subr.msk.bf16.mxu0 %vm529_vm0, %v2135_v20  ;;  %v2405_v25 = vld [vmem:[#allocation3 + $0x159] sm:$0xff] }
 0x139   : > { %7294 = vmatmul.mubr.msk.bf16.gmra.mrb[4].mxu0 %vm204_vm1, %v8583_v35  ;;  %v8375_v35 = vld [vmem:[%s9601_s1 + $0xc] ss:$0 sps:$4 sm:$0xcc]  }
 0x13a   : > { %7297 = vmatprep.mubr.msk.bf16.mxu0 %vm204_vm1, %v8595_v52  ;;  %v2185_v52 = vsel %vm529_vm0, %v2135_v20, 0  ;;  %v2403_v20 = vld [vmem:[#allocation3 + $0x141] sm:$0xff] }
 0x141   : > { %7298 = vmatmul.mubr.msk.bf16.gmra.mrb[8].mxu0 %vm204_vm1, %v8597_v53  ;;  %v2432_v53 = vrot.slane %v8375_v35, 2  ;;  %v2423_v35 = vpack.c.bf16 %v2403_v20, %v2402_v17 }
 0x142   : > { %7301 = vmatprep.mubr.msk.bf16.mxu0 %vm204_vm1, %v8603_v58  ;;  %v1819_v58 = vld [vmem:[#allocation3 + $0x182] sm:$0xff] }
 0x149   : > { %7302 = vmatmul.mubr.msk.bf16.gmra.mrb[12].mxu0 %vm204_vm1, %v8605_v59  ;;  %v1820_v59 = vld [vmem:[#allocation3 + $0x18a] sm:$0xff] }
 0x14a   : > { %7305 = vmatprep.mubr.msk.bf16.mxu0 %vm204_vm1, %v8611_v0  ;;  %v8898_v0 = vpack.c.bf16 %v1820_v59, %v1819_v58  ;;  %v2407_v58 = vld [vmem:[#allocation3 + $0x171] sm:$0xff] }
 0x151   : > { %7306 = vmatmul.mubr.msk.bf16.gmra.mrb[16].mxu0 %vm204_vm1, %v8613_v1  ;;  %v2482_v1 = vsel %vm529_vm0, %v2432_v53, 0 }
 0x152   : > { %7309 = vmatprep.mubr.msk.bf16.mxu0 %vm204_vm1, %v8619_v7  ;;  %v2725_v7 = vld [vmem:[%s9601_s1 + $0x10] sm:$0x3] }
 0x159   : > { %7310 = vmatmul.mubr.msk.bf16.gmra.mrb[20].mxu0 %vm204_vm1, %v8621_v8  ;;  %v2117_v8 = vld [vmem:[#allocation3 + $0x198] sm:$0xff] }
 0x15a   : > { %7313 = vmatprep.mubr.msk.bf16.mxu0 %vm204_vm1, %v8627_v13  ;;  %v2118_v13 = vld [vmem:[#allocation3 + $0x1a0] sm:$0xff] }
 0x161   : > { %7314 = vmatmul.mubr.msk.bf16.gmra.mrb[24].mxu0 %vm204_vm1, %v8629_v14  ;;  %v2380_v14 = vld [vmem:[#allocation3 + $0x31] sm:$0xff] }
 0x162   : > { %7317 = vmatprep.mubr.msk.bf16.mxu0 %vm204_vm1, %v8635_v19  ;;  %v2381_v19 = vld [vmem:[#allocation3 + $0x39] sm:$0xff] }
 0x169   : > { %7318 = vmatmul.mubr.msk.bf16.gmra.mrb[28].mxu0 %vm204_vm1, %v8859_v34 }
 0x16a   : > { %7323 = vmatprep.mubr.msk.bf16.mxu0 %vm204_vm1, %v8718_v42 }
 0x171   : > { %7324 = vmatmul.mubr.msk.bf16.vlgmr.msra.gmra.mrb[0].mxu0 %vm204_vm1, %v8720_v45 }
 0x172   : > { %7356 = vmatpush3.bf16.msra.mxu0 %v2185_v52  ;;  %7327 = vmatprep.mubr.msk.bf16.mxu0 %vm204_vm1, %v8733_v27  ;;  %v2424_v52 = vpack.c.bf16 %v2405_v25, %v2404_v22 }
 0x173   : > { %8350 = vmatprep.subr.msk.bf16.mxu0 %vm529_vm0, %v2432_v53  ;;  %v2406_v53 = vld [vmem:[#allocation3 + $0x169] sm:$0xff] }
 0x174   : > { %v2425_v59 = vpack.c.bf16 %v2407_v58, %v2406_v53 }
 0x179   : > { %7328 = vmatmul.mubr.msk.bf16.gmra.mrb[4].mxu0 %vm204_vm1, %v8735_v31 }
 0x17a   : > { %7331 = vmatprep.mubr.msk.bf16.mxu0 %vm204_vm1, %v8741_v2 }
 0x181   : > { %7332 = vmatmul.mubr.msk.bf16.gmra.mrb[8].mxu0 %vm204_vm1, %v8743_v4 }
 0x182   : > { %7335 = vmatprep.mubr.msk.bf16.mxu0 %vm204_vm1, %v8749_v15 }
 0x189   : > { %7336 = vmatmul.mubr.msk.bf16.gmra.mrb[12].mxu0 %vm204_vm1, %v8751_v16 }
 0x18a   : > { %7339 = vmatprep.mubr.msk.bf16.mxu0 %vm204_vm1, %v8757_v26 }
 0x191   : > { %7340 = vmatmul.mubr.msk.bf16.gmra.mrb[16].mxu0 %vm204_vm1, %v8759_v3 }
 0x192   : > { %7343 = vmatprep.mubr.msk.bf16.mxu0 %vm204_vm1, %v8765_v40 }
 0x199   : > { %7344 = vmatmul.mubr.msk.bf16.gmra.mrb[20].mxu0 %vm204_vm1, %v8767_v41 }
 0x19a   : > { %7347 = vmatprep.mubr.msk.bf16.mxu0 %vm204_vm1, %v8773_v55 }
 0x1a1   : > { %7348 = vmatmul.mubr.msk.bf16.gmra.mrb[24].mxu0 %vm204_vm1, %v8775_v56 }
 0x1a2   : > { %7351 = vmatprep.mubr.msk.bf16.mxu0 %vm204_vm1, %v8781_v63 }
 0x1a9   : > { %7352 = vmatmul.mubr.msk.bf16.gmra.mrb[28].mxu0 %vm204_vm1, %v8898_v0 }
 0x1aa   : > { %7357 = vmatprep.mubr.msk.bf16.mxu0 %vm204_vm1, %v8647_v30  ;;  %v2134_v30 = vpack.c.bf16 %v2118_v13, %v2117_v8 }
 0x1b1   : > { %7358 = vmatmul.mubr.msk.bf16.vlgmr.msra.gmra.mrb[0].mxu0 %vm204_vm1, %v8659_v38  ;;  %v2412_v38 = vpack.c.bf16 %v2381_v19, %v2380_v14 }
 0x1b2   : > { %7390 = vmatpush3.bf16.msra.mxu0 %v2482_v1  ;;  %7361 = vmatprep.mubr.msk.bf16.mxu0 %vm204_vm1, %v8661_v28  ;;  %v2382_v28 = vld [vmem:[#allocation3 + $0x49] sm:$0xff]  ;;  %v2410_v1 = vld [vmem:[#allocation3 + $0x199] sm:$0xff] }
 0x1b3   : > { %8351 = vmatprep.subr.msk.bf16.mxu0 %vm529_vm0, %v2725_v7 }
 0x1b9   : > { %7362 = vmatmul.mubr.msk.bf16.gmra.mrb[4].mxu0 %vm204_vm1, %v8667_v43  ;;  %v2383_v43 = vld [vmem:[#allocation3 + $0x51] sm:$0xff] }
 0x1ba   : > { %7365 = vmatprep.mubr.msk.bf16.mxu0 %vm204_vm1, %v8669_v44  ;;  %v2384_v44 = vld [vmem:[#allocation3 + $0x61] sm:$0xff] }
 0x1c1   : > { %7366 = vmatmul.mubr.msk.bf16.gmra.mrb[8].mxu0 %vm204_vm1, %v8675_v49  ;;  %v2385_v49 = vld [vmem:[#allocation3 + $0x69] sm:$0xff] }
 0x1c2   : > { %7369 = vmatprep.mubr.msk.bf16.mxu0 %vm204_vm1, %v8677_v50  ;;  %v2413_v50 = vpack.c.bf16 %v2383_v43, %v2382_v28 }
 0x1c9   : > { %7370 = vmatmul.mubr.msk.bf16.gmra.mrb[12].mxu0 %vm204_vm1, %v8683_v57  ;;  %v2414_v57 = vpack.c.bf16 %v2385_v49, %v2384_v44 }
 0x1ca   : > { %7373 = vmatprep.mubr.msk.bf16.mxu0 %vm204_vm1, %v8685_v60  ;;  %v2775_v60 = vsel %vm529_vm0, %v2725_v7, 0  ;;  %v2411_v7 = vld [vmem:[#allocation3 + $0x1a1] sm:$0xff] }
 0x1cb   : > { %v2427_v8 = vpack.c.bf16 %v2411_v7, %v2410_v1 }
 0x1d1   : > { %7374 = vmatmul.mubr.msk.bf16.gmra.mrb[16].mxu0 %vm204_vm1, %v8693_v6  ;;  %v2386_v6 = vld [vmem:[#allocation3 + $0x79] sm:$0xff] }
 0x1d2   : > { %7377 = vmatprep.mubr.msk.bf16.mxu0 %vm204_vm1, %v8697_v9  ;;  %v2387_v9 = vld [vmem:[#allocation3 + $0x81] sm:$0xff] }
 0x1d9   : > { %7378 = vmatmul.mubr.msk.bf16.gmra.mrb[20].mxu0 %vm204_vm1, %v8703_v18  ;;  %v2388_v18 = vld [vmem:[#allocation3 + $0x91] sm:$0xff] }
 0x1da   : > { %7381 = vmatprep.mubr.msk.bf16.mxu0 %vm204_vm1, %v8705_v23  ;;  %v2389_v23 = vld [vmem:[#allocation3 + $0x99] sm:$0xff] }
 0x1db   : > { %v2416_v42 = vpack.c.bf16 %v2389_v23, %v2388_v18 }
 0x1e1   : > { %7382 = vmatmul.mubr.msk.bf16.gmra.mrb[24].mxu0 %vm204_vm1, %v8713_v33  ;;  %v2415_v33 = vpack.c.bf16 %v2387_v9, %v2386_v6 }
 0x1e2   : > { %7385 = vmatprep.mubr.msk.bf16.mxu0 %vm204_vm1, %v8820_v12  ;;  %v2422_v12 = vpack.c.bf16 %v2401_v29, %v2400_v11 }
 0x1e9   : > { %7386 = vmatmul.mubr.msk.bf16.gmra.mrb[28].mxu0 %vm204_vm1, %v2134_v30 }
 0x1ea   : > { %7391 = vmatprep.mubr.msk.bf16.mxu0 %vm204_vm1, %v2412_v38 }
 0x1f1   : > { %7392 = vmatmul.mubr.msk.bf16.vlgmr.msra.gmra.mrb[0].mxu0 %vm204_vm1, %v2413_v50 }
 0x1f2   : > { %7424 = vmatpush3.bf16.msra.mxu0 %v2775_v60  ;;  %7395 = vmatprep.mubr.msk.bf16.mxu0 %vm204_vm1, %v2414_v57 }
 0x1f9   : > { %7396 = vmatmul.mubr.msk.bf16.gmra.mrb[4].mxu0 %vm204_vm1, %v2415_v33 }
 0x1fa   : > { %7399 = vmatprep.mubr.msk.bf16.mxu0 %vm204_vm1, %v2416_v42 }
 0x201   : > { %7400 = vmatmul.mubr.msk.bf16.gmra.mrb[8].mxu0 %vm204_vm1, %v2417_v37 }
 0x202   : > { %7403 = vmatprep.mubr.msk.bf16.mxu0 %vm204_vm1, %v2418_v39 }
 0x209   : > { %7404 = vmatmul.mubr.msk.bf16.gmra.mrb[12].mxu0 %vm204_vm1, %v2419_v61 }
 0x20a   : > { %7407 = vmatprep.mubr.msk.bf16.mxu0 %vm204_vm1, %v2420_v62 }
 0x211   : > { %7408 = vmatmul.mubr.msk.bf16.gmra.mrb[16].mxu0 %vm204_vm1, %v2421_v47 }
 0x212   : > { %7411 = vmatprep.mubr.msk.bf16.mxu0 %vm204_vm1, %v2422_v12 }
 0x219   : > { %7412 = vmatmul.mubr.msk.bf16.gmra.mrb[20].mxu0 %vm204_vm1, %v2423_v35 }
 0x21a   : > { %7415 = vmatprep.mubr.msk.bf16.mxu0 %vm204_vm1, %v2424_v52 }
 0x221   : > { %7416 = vmatmul.mubr.msk.bf16.gmra.mrb[24].mxu0 %vm204_vm1, %v2425_v59 }
 0x222   : > { %7419 = vmatprep.mubr.msk.bf16.mxu0 %vm204_vm1, %v8859_v34 }
 0x229   : > { %7420 = vmatmul.mubr.msk.bf16.gmra.mrb[28].mxu0 %vm204_vm1, %v2427_v8 }
 0x22a   : > { %7425 = vmatprep.mubr.msk.bf16.mxu0 %vm204_vm1, %v8720_v45  ;;  %v2707_v45 = vld [vmem:[#allocation3 + $0x19a] sm:$0xff] }
 0x231   : > { %7426 = vmatmul.mubr.msk.bf16.vlgmr.msra.gmra.mrb[0].mxu0 %vm204_vm1, %v8733_v27  ;;  %v2708_v27 = vld [vmem:[#allocation3 + $0x1a2] sm:$0xff] }
 0x232   : > { %7429 = vmatprep.mubr.msk.bf16.mxu0 %vm204_vm1, %v8735_v31  ;;  %v2724_v31 = vpack.c.bf16 %v2708_v27, %v2707_v45 }
 0x239   : > { %7430 = vmatmul.mubr.msk.bf16.gmra.mrb[4].mxu0 %vm204_vm1, %v8741_v2  ;;  %v3018_v2 = vld [vmem:[%s9602_s2] sm:$0xf] }
 0x23a   : > { %7433 = vmatprep.mubr.msk.bf16.mxu0 %vm204_vm1, %v8743_v4  ;;  %8352 = vmatprep.subr.msk.bf16.mxu1 %vm3068_vm4, %v3018_v2  ;;  %v3070_v4 = vsel %vm3068_vm4, %v3018_v2, 0 }
 0x23b   : > { %7458 = vmatpush3.bf16.msra.mxu1 %v3070_v4 }
 0x241   : > { %7434 = vmatmul.mubr.msk.bf16.gmra.mrb[8].mxu0 %vm204_vm1, %v8749_v15  ;;  %v8376_v15 = vld [vmem:[%s9601_s1 + $0x14] ss:$0 sps:$4 sm:$0xcc]  }
 0x242   : > { %7437 = vmatprep.mubr.msk.bf16.mxu0 %vm204_vm1, %v8751_v16  ;;  %v3527_v16 = vrot.slane %v8376_v15, 2 }
 0x244   : > { %8353 = vmatprep.subr.msk.bf16.mxu1 %vm529_vm0, %v3527_v16  ;;  %v3577_v14 = vsel %vm529_vm0, %v3527_v16, 0 }
 0x249   : > { %7438 = vmatmul.mubr.msk.bf16.gmra.mrb[12].mxu0 %vm204_vm1, %v8757_v26 }
 0x24a   : > { %7441 = vmatprep.mubr.msk.bf16.mxu0 %vm204_vm1, %v8759_v3 }
 0x251   : > { %7442 = vmatmul.mubr.msk.bf16.gmra.mrb[16].mxu0 %vm204_vm1, %v8765_v40 }
 0x252   : > { %7445 = vmatprep.mubr.msk.bf16.mxu0 %vm204_vm1, %v8767_v41 }
 0x259   : > { %7446 = vmatmul.mubr.msk.bf16.gmra.mrb[20].mxu0 %vm204_vm1, %v8773_v55 }
 0x25a   : > { %7449 = vmatprep.mubr.msk.bf16.mxu0 %vm204_vm1, %v8775_v56 }
 0x261   : > { %7450 = vmatmul.mubr.msk.bf16.gmra.mrb[24].mxu0 %vm204_vm1, %v8781_v63 }
 0x262   : > { %7453 = vmatprep.mubr.msk.bf16.mxu0 %vm204_vm1, %v8898_v0 }
 0x269   : > { %7454 = vmatmul.mubr.msk.bf16.gmra.mrb[28].mxu0 %vm204_vm1, %v2724_v31 }
 0x304   : > { %v7427_v26 = vpop.f32.mrb[0].mxu0 }
 0x305   : > { %v2811_v3 = vpop.f32.mrb[1].mxu0  ;;  %v2972_v41 = vmax.f32 %v7427_v26, 0.0 }
 0x306   : > { %v7428_v40 = vpop.f32.mrb[2].mxu0  ;;  %v2970_v63 = vmax.f32 %v2811_v3, 0.0 }
 0x307   : > { %v2973_v55 = vmax.f32 %v7428_v40, 0.0  ;;  %v2814_v56 = vpop.f32.mrb[3].mxu0 }
 0x308   : > { %v2971_v34 = vmax.f32 %v2814_v56, 0.0 }
 0x309   : > { %v3003_v0 = vpack.c.bf16 %v2973_v55, %v2972_v41 }
 0x30a   : > { %v3002_v13 = vpack.c.bf16 %v2971_v34, %v2970_v63 }
 0x30c   : > { %v7431_v19 = vpop.f32.mrb[4].mxu0  ;;  %7459 = vmatprep.mubr.msk.bf16.mxu1 %vm3019_vm5, %v3002_v13 }
 0x30d   : > { %v2827_v30 = vpop.f32.mrb[5].mxu0  ;;  %7460 = vmatmul.mubr.msk.bf16.vlgmr.msra.gmra.mrb[0].mxu1 %vm3019_vm5, %v3003_v0  ;;  %v2976_v28 = vmax.f32 %v7431_v19, 0.0 }
 0x30e   : > { %v7432_v38 = vpop.f32.mrb[6].mxu0  ;;  %7492 = vmatpush3.bf16.msra.mxu1 %v3577_v14  ;;  %v2974_v49 = vmax.f32 %v2827_v30, 0.0 }
 0x30f   : > { %v2977_v43 = vmax.f32 %v7432_v38, 0.0  ;;  %v2830_v44 = vpop.f32.mrb[7].mxu0 }
 0x310   : > { %v2975_v50 = vmax.f32 %v2830_v44, 0.0 }
 0x311   : > { %v3005_v57 = vpack.c.bf16 %v2977_v43, %v2976_v28 }
 0x312   : > { %v3004_v60 = vpack.c.bf16 %v2975_v50, %v2974_v49  ;;  %v3475_v49 = vld [vmem:[#allocation3 + $0x1] sm:$0xff]  ;;  %v3476_v50 = vld [vmem:[#allocation3 + $0x9] sm:$0xff] }
 0x314   : > { %v7435_v6 = vpop.f32.mrb[8].mxu0  ;;  %7463 = vmatprep.mubr.msk.bf16.mxu1 %vm3019_vm5, %v3004_v60  ;;  %v9017_v60 = vld [vmem:[%s9601_s1 + $0x14] sm:$0x3] }
 0x315   : > { %v2843_v9 = vpop.f32.mrb[9].mxu0  ;;  %7464 = vmatmul.mubr.msk.bf16.gmra.mrb[4].mxu1 %vm3019_vm5, %v3005_v57  ;;  %v2980_v23 = vmax.f32 %v7435_v6, 0.0  ;;  %v3507_v57 = vpack.c.bf16 %v3476_v50, %v3475_v49  ;;  %8354 = vmatprep.subr.msk.bf16.mxu1 %vm529_vm0, %v9017_v60  ;;  %v3235_v6 = vld [vmem:[#allocation2 + $0x10] sm:$0xff]  ;;  %v3789_v49 = vsel %vm529_vm0, %v9017_v60, 0 }
 0x316   : > { %v7436_v18 = vpop.f32.mrb[10].mxu0  ;;  %v2978_v21 = vmax.f32 %v2843_v9, 0.0  ;;  %v3233_v9 = vld [vmem:[#allocation2] sm:$0xff] }
 0x317   : > { %v2981_v33 = vmax.f32 %v7436_v18, 0.0  ;;  %v2846_v42 = vpop.f32.mrb[11].mxu0 }
 0x318   : > { %v2979_v24 = vmax.f32 %v2846_v42, 0.0 }
 0x319   : > { %v3007_v32 = vpack.c.bf16 %v2981_v33, %v2980_v23  ;;  %v3236_v23 = vld [vmem:[#allocation2 + $0x18] sm:$0xff] }
 0x31a   : > { %v3006_v36 = vpack.c.bf16 %v2979_v24, %v2978_v21  ;;  %v3234_v21 = vld [vmem:[#allocation2 + $0x8] sm:$0xff] }
 0x31c   : > { %v7439_v37 = vpop.f32.mrb[12].mxu0  ;;  %7467 = vmatprep.mubr.msk.bf16.mxu1 %vm3019_vm5, %v3006_v36 }
 0x31d   : > { %v2859_v39 = vpop.f32.mrb[13].mxu0  ;;  %7468 = vmatmul.mubr.msk.bf16.gmra.mrb[8].mxu1 %vm3019_vm5, %v3007_v32  ;;  %v2984_v48 = vmax.f32 %v7439_v37, 0.0 }
 0x31e   : > { %v7440_v46 = vpop.f32.mrb[14].mxu0  ;;  %v2982_v61 = vmax.f32 %v2859_v39, 0.0 }
 0x31f   : > { %v2985_v51 = vmax.f32 %v7440_v46, 0.0  ;;  %v2862_v54 = vpop.f32.mrb[15].mxu0  ;;  %v3239_v46 = vld [vmem:[#allocation2 + $0x30] sm:$0xff] }
 0x320   : > { %v2983_v62 = vmax.f32 %v2862_v54, 0.0  ;;  %v3240_v54 = vld [vmem:[#allocation2 + $0x38] sm:$0xff] }
 0x321   : > { %v3009_v5 = vpack.c.bf16 %v2985_v51, %v2984_v48  ;;  %v3237_v48 = vld [vmem:[#allocation2 + $0x20] sm:$0xff] }
 0x322   : > { %v3008_v10 = vpack.c.bf16 %v2983_v62, %v2982_v61 }
 0x324   : > { %v7443_v11 = vpop.f32.mrb[16].mxu0  ;;  %7471 = vmatprep.mubr.msk.bf16.mxu1 %vm3019_vm5, %v3008_v10 }
 0x325   : > { %v2875_v29 = vpop.f32.mrb[17].mxu0  ;;  %7472 = vmatmul.mubr.msk.bf16.gmra.mrb[12].mxu1 %vm3019_vm5, %v3009_v5  ;;  %v2988_v12 = vmax.f32 %v7443_v11, 0.0  ;;  %v3238_v5 = vld [vmem:[#allocation2 + $0x28] sm:$0xff] }
 0x326   : > { %v7444_v47 = vpop.f32.mrb[18].mxu0  ;;  %v2986_v22 = vmax.f32 %v2875_v29, 0.0 }
 0x327   : > { %v2989_v17 = vmax.f32 %v7444_v47, 0.0  ;;  %v2878_v20 = vpop.f32.mrb[19].mxu0 }
 0x328   : > { %v2987_v25 = vmax.f32 %v2878_v20, 0.0 }
 0x329   : > { %v3011_v35 = vpack.c.bf16 %v2989_v17, %v2988_v12 }
 0x32a   : > { %v3010_v52 = vpack.c.bf16 %v2987_v25, %v2986_v22 }
 0x32c   : > { %v7447_v53 = vpop.f32.mrb[20].mxu0  ;;  %7475 = vmatprep.mubr.msk.bf16.mxu1 %vm3019_vm5, %v3010_v52 }
 0x32d   : > { %v2891_v58 = vpop.f32.mrb[21].mxu0  ;;  %7476 = vmatmul.mubr.msk.bf16.gmra.mrb[16].mxu1 %vm3019_vm5, %v3011_v35  ;;  %v2992_v1 = vmax.f32 %v7447_v53, 0.0 }
 0x32e   : > { %v7448_v59 = vpop.f32.mrb[22].mxu0  ;;  %v2990_v45 = vmax.f32 %v2891_v58, 0.0 }
 0x32f   : > { %v2993_v7 = vmax.f32 %v7448_v59, 0.0  ;;  %v2894_v8 = vpop.f32.mrb[23].mxu0  ;;  %v3243_v59 = vld [vmem:[#allocation2 + $0x50] sm:$0xff] }
 0x330   : > { %v2991_v27 = vmax.f32 %v2894_v8, 0.0  ;;  %v3244_v8 = vld [vmem:[#allocation2 + $0x58] sm:$0xff] }
 0x331   : > { %v3013_v31 = vpack.c.bf16 %v2993_v7, %v2992_v1  ;;  %v3241_v1 = vld [vmem:[#allocation2 + $0x40] sm:$0xff] }
 0x332   : > { %v3012_v2 = vpack.c.bf16 %v2991_v27, %v2990_v45 }
 0x334   : > { %v7451_v4 = vpop.f32.mrb[24].mxu0  ;;  %7479 = vmatprep.mubr.msk.bf16.mxu1 %vm3019_vm5, %v3012_v2 }
 0x335   : > { %v2907_v15 = vpop.f32.mrb[25].mxu0  ;;  %7480 = vmatmul.mubr.msk.bf16.gmra.mrb[20].mxu1 %vm3019_vm5, %v3013_v31  ;;  %v2996_v26 = vmax.f32 %v7451_v4, 0.0  ;;  %v3242_v31 = vld [vmem:[#allocation2 + $0x48] sm:$0xff] }
 0x336   : > { %v7452_v16 = vpop.f32.mrb[26].mxu0  ;;  %v2994_v41 = vmax.f32 %v2907_v15, 0.0 }
 0x337   : > { %v2997_v3 = vmax.f32 %v7452_v16, 0.0  ;;  %v2910_v40 = vpop.f32.mrb[27].mxu0 }
 0x338   : > { %v2995_v55 = vmax.f32 %v2910_v40, 0.0 }
 0x339   : > { %v3015_v56 = vpack.c.bf16 %v2997_v3, %v2996_v26 }
 0x33a   : > { %v3014_v63 = vpack.c.bf16 %v2995_v55, %v2994_v41 }
 0x33c   : > { %v7455_v34 = vpop.f32.mrb[28].mxu0  ;;  %7483 = vmatprep.mubr.msk.bf16.mxu1 %vm3019_vm5, %v3014_v63 }
 0x33d   : > { %v2923_v0 = vpop.f32.mrb[29].mxu0  ;;  %7484 = vmatmul.mubr.msk.bf16.gmra.mrb[24].mxu1 %vm3019_vm5, %v3015_v56  ;;  %v3000_v14 = vmax.f32 %v7455_v34, 0.0 }
 0x33e   : > { %v7456_v13 = vpop.f32.mrb[30].mxu0  ;;  %v2998_v38 = vmax.f32 %v2923_v0, 0.0 }
 0x33f   : > { %v3001_v19 = vmax.f32 %v7456_v13, 0.0  ;;  %v2926_v30 = vpop.f32.mrb[31].mxu0  ;;  %v3247_v13 = vld [vmem:[#allocation2 + $0x70] sm:$0xff] }
 0x340   : > { %v2999_v28 = vmax.f32 %v2926_v30, 0.0 }
 0x341   : > { %v3017_v43 = vpack.c.bf16 %v3001_v19, %v3000_v14  ;;  %v3245_v19 = vld [vmem:[#allocation2 + $0x60] sm:$0xff] }
 0x342   : > { %v3016_v44 = vpack.c.bf16 %v2999_v28, %v2998_v38 }
 0x344   : > { %7487 = vmatprep.mubr.msk.bf16.mxu1 %vm3019_vm5, %v3016_v44 }
 0x345   : > { %7488 = vmatmul.mubr.msk.bf16.gmra.mrb[28].mxu1 %vm3019_vm5, %v3017_v43  ;;  %v3248_v43 = vld [vmem:[#allocation2 + $0x78] sm:$0xff] }
 0x346   : > { %7493 = vmatprep.mubr.msk.bf16.mxu1 %vm204_vm1, %v3507_v57 }
 0x3e0   : > { %v7461_v18 = vpop.f32.mrb[0].mxu1 }
 0x3e1   : > { %v3267_v33 = vadd.f32 %v7461_v18, %v3235_v6  ;;  %v3106_v42 = vpop.f32.mrb[1].mxu1 }
 0x3e2   : > { %v3265_v24 = vadd.f32 %v3233_v9, %v3106_v42  ;;  %v7462_v32 = vpop.f32.mrb[2].mxu1  ;;  %v3246_v9 = vld [vmem:[#allocation2 + $0x68] sm:$0xff] }
 0x3e3   : > { %3299 = vst.msk [vmem:[#allocation2 + $0x10] sm:$0xff] %vm204_vm1, %v3267_v33  ;;  %v3268_v36 = vadd.f32 %v7462_v32, %v3236_v23  ;;  %v3109_v37 = vpop.f32.mrb[3].mxu1  ;;  %v9050_v23 = vld [vmem:[%s9601_s1 + $0x18] sm:$0x3] }
 0x3e4   : > { %3297 = vst.msk [vmem:[#allocation2] sm:$0xff] %vm204_vm1, %v3265_v24  ;;  %v3266_v39 = vadd.f32 %v3234_v21, %v3109_v37 }
 0x3e5   : > { %3300 = vst.msk [vmem:[#allocation2 + $0x18] sm:$0xff] %vm204_vm1, %v3268_v36 }
 0x3e6   : > { %3298 = vst.msk [vmem:[#allocation2 + $0x8] sm:$0xff] %vm204_vm1, %v3266_v39 }
 0x3e8   : > { %v7465_v51 = vpop.f32.mrb[4].mxu1 }
 0x3e9   : > { %v3271_v61 = vadd.f32 %v7465_v51, %v3239_v46  ;;  %v3122_v62 = vpop.f32.mrb[5].mxu1 }
 0x3ea   : > { %v3331_v10 = vld [vmem:[#allocation2 + $0x10] sm:$0xff]  ;;  %v3269_v11 = vadd.f32 %v3237_v48, %v3122_v62  ;;  %v7466_v29 = vpop.f32.mrb[6].mxu1 }
 0x3eb   : > { %v3363_v47 = vmax.f32 %v3331_v10, 0.0  ;;  %v3329_v12 = vld [vmem:[#allocation2] sm:$0xff]  ;;  %3303 = vst.msk [vmem:[#allocation2 + $0x30] sm:$0xff] %vm204_vm1, %v3271_v61  ;;  %v3272_v17 = vadd.f32 %v7466_v29, %v3240_v54  ;;  %v3125_v20 = vpop.f32.mrb[7].mxu1  ;;  %v3251_v61 = vld [vmem:[#allocation2 + $0x90] sm:$0xff] }
 0x3ec   : > { %v3361_v22 = vmax.f32 %v3329_v12, 0.0  ;;  %v3332_v25 = vld [vmem:[#allocation2 + $0x18] sm:$0xff]  ;;  %3301 = vst.msk [vmem:[#allocation2 + $0x20] sm:$0xff] %vm204_vm1, %v3269_v11  ;;  %v3270_v35 = vadd.f32 %v3238_v5, %v3125_v20  ;;  %v3249_v5 = vld [vmem:[#allocation2 + $0x80] sm:$0xff] }
 0x3ed   : > { %3395 = vst.msk [vmem:[#allocation3 + $0x31] sm:$0xff] %vm204_vm1, %v3363_v47  ;;  %v3364_v52 = vmax.f32 %v3332_v25, 0.0  ;;  %v3330_v53 = vld [vmem:[#allocation2 + $0x8] sm:$0xff]  ;;  %3304 = vst.msk [vmem:[#allocation2 + $0x38] sm:$0xff] %vm204_vm1, %v3272_v17  ;;  %v3252_v47 = vld [vmem:[#allocation2 + $0x98] sm:$0xff] }
 0x3ee   : > { %3393 = vst.msk [vmem:[#allocation3 + $0x19] sm:$0xff] %vm204_vm1, %v3361_v22  ;;  %v3362_v58 = vmax.f32 %v3330_v53, 0.0  ;;  %3302 = vst.msk [vmem:[#allocation2 + $0x28] sm:$0xff] %vm204_vm1, %v3270_v35  ;;  %v3250_v25 = vld [vmem:[#allocation2 + $0x88] sm:$0xff] }
 0x3ef   : > { %3396 = vst.msk [vmem:[#allocation3 + $0x39] sm:$0xff] %vm204_vm1, %v3364_v52 }
 0x3f0   : > { %3394 = vst.msk [vmem:[#allocation3 + $0x21] sm:$0xff] %vm204_vm1, %v3362_v58  ;;  %v7469_v7 = vpop.f32.mrb[8].mxu1 }
 0x3f1   : > { %v3275_v45 = vadd.f32 %v7469_v7, %v3243_v59  ;;  %v3138_v27 = vpop.f32.mrb[9].mxu1 }
 0x3f2   : > { %v3335_v2 = vld [vmem:[#allocation2 + $0x30] sm:$0xff]  ;;  %v3273_v4 = vadd.f32 %v3241_v1, %v3138_v27  ;;  %v7470_v15 = vpop.f32.mrb[10].mxu1 }
 0x3f3   : > { %v3367_v16 = vmax.f32 %v3335_v2, 0.0  ;;  %v3333_v26 = vld [vmem:[#allocation2 + $0x20] sm:$0xff]  ;;  %3307 = vst.msk [vmem:[#allocation2 + $0x50] sm:$0xff] %vm204_vm1, %v3275_v45  ;;  %v3276_v3 = vadd.f32 %v7470_v15, %v3244_v8  ;;  %v3141_v40 = vpop.f32.mrb[11].mxu1 }
 0x3f4   : > { %v3365_v41 = vmax.f32 %v3333_v26, 0.0  ;;  %v3336_v55 = vld [vmem:[#allocation2 + $0x38] sm:$0xff]  ;;  %3305 = vst.msk [vmem:[#allocation2 + $0x40] sm:$0xff] %vm204_vm1, %v3273_v4  ;;  %v3274_v56 = vadd.f32 %v3242_v31, %v3141_v40 }
 0x3f5   : > { %3399 = vst.msk [vmem:[#allocation3 + $0x61] sm:$0xff] %vm204_vm1, %v3367_v16  ;;  %v3368_v63 = vmax.f32 %v3336_v55, 0.0  ;;  %v3334_v34 = vld [vmem:[#allocation2 + $0x28] sm:$0xff]  ;;  %3308 = vst.msk [vmem:[#allocation2 + $0x58] sm:$0xff] %vm204_vm1, %v3276_v3  ;;  %v3477_v30 = vld [vmem:[#allocation3 + $0x19] sm:$0xff] }
 0x3f6   : > { %3397 = vst.msk [vmem:[#allocation3 + $0x49] sm:$0xff] %vm204_vm1, %v3365_v41  ;;  %v3366_v0 = vmax.f32 %v3334_v34, 0.0  ;;  %3306 = vst.msk [vmem:[#allocation2 + $0x48] sm:$0xff] %vm204_vm1, %v3274_v56  ;;  %v3480_v14 = vld [vmem:[#allocation3 + $0x39] sm:$0xff]  ;;  %v3479_v50 = vld [vmem:[#allocation3 + $0x31] sm:$0xff] }
 0x3f7   : > { %3400 = vst.msk [vmem:[#allocation3 + $0x69] sm:$0xff] %vm204_vm1, %v3368_v63  ;;  %v3478_v38 = vld [vmem:[#allocation3 + $0x21] sm:$0xff]  ;;  %v9045_v18 = vpack.c.bf16 %v3480_v14, %v3479_v50  ;;  %v3255_v16 = vld [vmem:[#allocation2 + $0xb0] sm:$0xff]  ;;  %v3256_v56 = vld [vmem:[#allocation2 + $0xb8] sm:$0xff] }
 0x3f8   : > { %3398 = vst.msk [vmem:[#allocation3 + $0x51] sm:$0xff] %vm204_vm1, %v3366_v0  ;;  %v7473_v28 = vpop.f32.mrb[12].mxu1  ;;  %v9041_v44 = vpack.c.bf16 %v3478_v38, %v3477_v30  ;;  %v3253_v3 = vld [vmem:[#allocation2 + $0xa0] sm:$0xff]  ;;  %v3254_v14 = vld [vmem:[#allocation2 + $0xa8] sm:$0xff] }
 0x3f9   : > { %v3279_v57 = vadd.f32 %v7473_v28, %v3247_v13  ;;  %v3154_v6 = vpop.f32.mrb[13].mxu1 }
 0x3fa   : > { %v3339_v33 = vld [vmem:[#allocation2 + $0x50] sm:$0xff]  ;;  %v3277_v42 = vadd.f32 %v3245_v19, %v3154_v6  ;;  %v7474_v21 = vpop.f32.mrb[14].mxu1  ;;  %7494 = vmatmul.mubr.msk.bf16.vlgmr.msra.gmra.mrb[32].mxu1 %vm204_vm1, %v9041_v44 }
 0x3fb   : > { %v3371_v24 = vmax.f32 %v3339_v33, 0.0  ;;  %v3337_v32 = vld [vmem:[#allocation2 + $0x40] sm:$0xff]  ;;  %3311 = vst.msk [vmem:[#allocation2 + $0x70] sm:$0xff] %vm204_vm1, %v3279_v57  ;;  %v3280_v60 = vadd.f32 %v7474_v21, %v3248_v43  ;;  %7526 = vmatpush3.bf16.msra.mxu1 %v3789_v49  ;;  %v3157_v36 = vpop.f32.mrb[15].mxu1  ;;  %7497 = vmatprep.mubr.msk.bf16.mxu1 %vm204_vm1, %v9045_v18 }
 0x3fc   : > { %v3369_v37 = vmax.f32 %v3337_v32, 0.0  ;;  %v3340_v39 = vld [vmem:[#allocation2 + $0x58] sm:$0xff]  ;;  %3309 = vst.msk [vmem:[#allocation2 + $0x60] sm:$0xff] %vm204_vm1, %v3277_v42  ;;  %v3278_v46 = vadd.f32 %v3246_v9, %v3157_v36  ;;  %8355 = vmatprep.subr.msk.bf16.mxu1 %vm529_vm0, %v9050_v23  ;;  %v3483_v17 = vld [vmem:[#allocation3 + $0x61] sm:$0xff]  ;;  %v3259_v32 = vld [vmem:[#allocation2 + $0xd0] sm:$0xff] }
 0x3fd   : > { %3403 = vst.msk [vmem:[#allocation3 + $0x91] sm:$0xff] %vm204_vm1, %v3371_v24  ;;  %v3372_v48 = vmax.f32 %v3340_v39, 0.0  ;;  %v3338_v51 = vld [vmem:[#allocation2 + $0x48] sm:$0xff]  ;;  %3312 = vst.msk [vmem:[#allocation2 + $0x78] sm:$0xff] %vm204_vm1, %v3280_v60  ;;  %v3257_v36 = vld [vmem:[#allocation2 + $0xc0] sm:$0xff] }
 0x3fe   : > { %3401 = vst.msk [vmem:[#allocation3 + $0x79] sm:$0xff] %vm204_vm1, %v3369_v37  ;;  %v3370_v54 = vmax.f32 %v3338_v51, 0.0  ;;  %3310 = vst.msk [vmem:[#allocation2 + $0x68] sm:$0xff] %vm204_vm1, %v3278_v46  ;;  %v3484_v62 = vld [vmem:[#allocation3 + $0x69] sm:$0xff] }
 0x3ff   : > { %3404 = vst.msk [vmem:[#allocation3 + $0x99] sm:$0xff] %vm204_vm1, %v3372_v48  ;;  %v3481_v10 = vld [vmem:[#allocation3 + $0x49] sm:$0xff]  ;;  %v3482_v11 = vld [vmem:[#allocation3 + $0x51] sm:$0xff]  ;;  %v9068_v35 = vpack.c.bf16 %v3484_v62, %v3483_v17 }
 0x400   : > { %3402 = vst.msk [vmem:[#allocation3 + $0x81] sm:$0xff] %vm204_vm1, %v3370_v54  ;;  %v7477_v29 = vpop.f32.mrb[16].mxu1  ;;  %v9066_v12 = vpack.c.bf16 %v3482_v11, %v3481_v10  ;;  %v3260_v48 = vld [vmem:[#allocation2 + $0xd8] sm:$0xff] }
 0x401   : > { %v3283_v20 = vadd.f32 %v7477_v29, %v3251_v61  ;;  %v3170_v22 = vpop.f32.mrb[17].mxu1 }
 0x402   : > { %v3343_v52 = vld [vmem:[#allocation2 + $0x70] sm:$0xff]  ;;  %v3281_v53 = vadd.f32 %v3249_v5, %v3170_v22  ;;  %v7478_v58 = vpop.f32.mrb[18].mxu1  ;;  %7498 = vmatmul.mubr.msk.bf16.gmra.mrb[36].mxu1 %vm204_vm1, %v9066_v12  ;;  %v3258_v5 = vld [vmem:[#allocation2 + $0xc8] sm:$0xff] }
 0x403   : > { %v3375_v59 = vmax.f32 %v3343_v52, 0.0  ;;  %v3341_v1 = vld [vmem:[#allocation2 + $0x60] sm:$0xff]  ;;  %3315 = vst.msk [vmem:[#allocation2 + $0x90] sm:$0xff] %vm204_vm1, %v3283_v20  ;;  %v3284_v7 = vadd.f32 %v7478_v58, %v3252_v47  ;;  %v3173_v8 = vpop.f32.mrb[19].mxu1  ;;  %7501 = vmatprep.mubr.msk.bf16.mxu1 %vm204_vm1, %v9068_v35 }
 0x404   : > { %v3373_v45 = vmax.f32 %v3341_v1, 0.0  ;;  %v3344_v27 = vld [vmem:[#allocation2 + $0x78] sm:$0xff]  ;;  %3313 = vst.msk [vmem:[#allocation2 + $0x80] sm:$0xff] %vm204_vm1, %v3281_v53  ;;  %v3282_v31 = vadd.f32 %v3250_v25, %v3173_v8  ;;  %v3263_v8 = vld [vmem:[#allocation2 + $0xf0] sm:$0xff] }
 0x405   : > { %3407 = vst.msk [vmem:[#allocation3 + $0xc1] sm:$0xff] %vm204_vm1, %v3375_v59  ;;  %v3376_v2 = vmax.f32 %v3344_v27, 0.0  ;;  %v3342_v4 = vld [vmem:[#allocation2 + $0x68] sm:$0xff]  ;;  %3316 = vst.msk [vmem:[#allocation2 + $0x98] sm:$0xff] %vm204_vm1, %v3284_v7  ;;  %v3485_v40 = vld [vmem:[#allocation3 + $0x79] sm:$0xff] }
 0x406   : > { %3405 = vst.msk [vmem:[#allocation3 + $0xa9] sm:$0xff] %vm204_vm1, %v3373_v45  ;;  %v3374_v15 = vmax.f32 %v3342_v4, 0.0  ;;  %3314 = vst.msk [vmem:[#allocation2 + $0x88] sm:$0xff] %vm204_vm1, %v3282_v31  ;;  %v3488_v26 = vld [vmem:[#allocation3 + $0x99] sm:$0xff]  ;;  %v3487_v34 = vld [vmem:[#allocation3 + $0x91] sm:$0xff] }
 0x407   : > { %3408 = vst.msk [vmem:[#allocation3 + $0xc9] sm:$0xff] %vm204_vm1, %v3376_v2  ;;  %v3486_v41 = vld [vmem:[#allocation3 + $0x81] sm:$0xff]  ;;  %v9084_v19 = vpack.c.bf16 %v3488_v26, %v3487_v34 }
 0x408   : > { %3406 = vst.msk [vmem:[#allocation3 + $0xb1] sm:$0xff] %vm204_vm1, %v3374_v15  ;;  %v7481_v55 = vpop.f32.mrb[20].mxu1  ;;  %v9082_v63 = vpack.c.bf16 %v3486_v41, %v3485_v40  ;;  %v3261_v27 = vld [vmem:[#allocation2 + $0xe0] sm:$0xff]  ;;  %v3264_v15 = vld [vmem:[#allocation2 + $0xf8] sm:$0xff]  ;;  %v3262_v41 = vld [vmem:[#allocation2 + $0xe8] sm:$0xff] }
 0x409   : > { %v3287_v0 = vadd.f32 %v7481_v55, %v3255_v16  ;;  %v3186_v13 = vpop.f32.mrb[21].mxu1 }
 0x40a   : > { %v3347_v30 = vld [vmem:[#allocation2 + $0x90] sm:$0xff]  ;;  %v3285_v38 = vadd.f32 %v3253_v3, %v3186_v13  ;;  %v7482_v28 = vpop.f32.mrb[22].mxu1  ;;  %7502 = vmatmul.mubr.msk.bf16.gmra.mrb[40].mxu1 %vm204_vm1, %v9082_v63 }
 0x40b   : > { %v3379_v43 = vmax.f32 %v3347_v30, 0.0  ;;  %v3345_v49 = vld [vmem:[#allocation2 + $0x80] sm:$0xff]  ;;  %3319 = vst.msk [vmem:[#allocation2 + $0xb0] sm:$0xff] %vm204_vm1, %v3287_v0  ;;  %v3288_v50 = vadd.f32 %v7482_v28, %v3256_v56  ;;  %v3189_v57 = vpop.f32.mrb[23].mxu1  ;;  %7505 = vmatprep.mubr.msk.bf16.mxu1 %vm204_vm1, %v9084_v19 }
 0x40c   : > { %v3377_v6 = vmax.f32 %v3345_v49, 0.0  ;;  %v3348_v9 = vld [vmem:[#allocation2 + $0x98] sm:$0xff]  ;;  %3317 = vst.msk [vmem:[#allocation2 + $0xa0] sm:$0xff] %vm204_vm1, %v3285_v38  ;;  %v3286_v33 = vadd.f32 %v3254_v14, %v3189_v57  ;;  %v3491_v54 = vld [vmem:[#allocation3 + $0xc1] sm:$0xff] }
 0x40d   : > { %3411 = vst.msk [vmem:[#allocation3 + $0xf1] sm:$0xff] %vm204_vm1, %v3379_v43  ;;  %v3380_v42 = vmax.f32 %v3348_v9, 0.0  ;;  %v3346_v21 = vld [vmem:[#allocation2 + $0x88] sm:$0xff]  ;;  %3320 = vst.msk [vmem:[#allocation2 + $0xb8] sm:$0xff] %vm204_vm1, %v3288_v50 }
 0x40e   : > { %3409 = vst.msk [vmem:[#allocation3 + $0xd9] sm:$0xff] %vm204_vm1, %v3377_v6  ;;  %v3378_v24 = vmax.f32 %v3346_v21, 0.0  ;;  %3318 = vst.msk [vmem:[#allocation2 + $0xa8] sm:$0xff] %vm204_vm1, %v3286_v33  ;;  %v3492_v60 = vld [vmem:[#allocation3 + $0xc9] sm:$0xff] }
 0x40f   : > { %3412 = vst.msk [vmem:[#allocation3 + $0xf9] sm:$0xff] %vm204_vm1, %v3380_v42  ;;  %v3489_v37 = vld [vmem:[#allocation3 + $0xa9] sm:$0xff]  ;;  %v3490_v39 = vld [vmem:[#allocation3 + $0xb1] sm:$0xff]  ;;  %v9100_v10 = vpack.c.bf16 %v3492_v60, %v3491_v54 }
 0x410   : > { %3410 = vst.msk [vmem:[#allocation3 + $0xe1] sm:$0xff] %vm204_vm1, %v3378_v24  ;;  %v7485_v46 = vpop.f32.mrb[24].mxu1  ;;  %v9098_v51 = vpack.c.bf16 %v3490_v39, %v3489_v37 }
 0x411   : > { %v3291_v61 = vadd.f32 %v7485_v46, %v3259_v32  ;;  %v3202_v62 = vpop.f32.mrb[25].mxu1 }
 0x412   : > { %v3351_v11 = vld [vmem:[#allocation2 + $0xb0] sm:$0xff]  ;;  %v3289_v29 = vadd.f32 %v3257_v36, %v3202_v62  ;;  %v7486_v47 = vpop.f32.mrb[26].mxu1  ;;  %7506 = vmatmul.mubr.msk.bf16.gmra.mrb[44].mxu1 %vm204_vm1, %v9098_v51 }
 0x413   : > { %v3383_v17 = vmax.f32 %v3351_v11, 0.0  ;;  %v3349_v20 = vld [vmem:[#allocation2 + $0xa0] sm:$0xff]  ;;  %3323 = vst.msk [vmem:[#allocation2 + $0xd0] sm:$0xff] %vm204_vm1, %v3291_v61  ;;  %v3292_v22 = vadd.f32 %v7486_v47, %v3260_v48  ;;  %v3205_v25 = vpop.f32.mrb[27].mxu1  ;;  %7509 = vmatprep.mubr.msk.bf16.mxu1 %vm204_vm1, %v9100_v10 }
 0x414   : > { %v3381_v52 = vmax.f32 %v3349_v20, 0.0  ;;  %v3352_v53 = vld [vmem:[#allocation2 + $0xb8] sm:$0xff]  ;;  %3321 = vst.msk [vmem:[#allocation2 + $0xc0] sm:$0xff] %vm204_vm1, %v3289_v29  ;;  %v3290_v58 = vadd.f32 %v3258_v5, %v3205_v25  ;;  %v3425_v20 = vld [vmem:[#allocation3] sm:$0xff] }
 0x415   : > { %3415 = vst.msk [vmem:[#allocation3 + $0x121] sm:$0xff] %vm204_vm1, %v3383_v17  ;;  %v3384_v59 = vmax.f32 %v3352_v53, 0.0  ;;  %v3350_v1 = vld [vmem:[#allocation2 + $0xa8] sm:$0xff]  ;;  %3324 = vst.msk [vmem:[#allocation2 + $0xd8] sm:$0xff] %vm204_vm1, %v3292_v22  ;;  %v3493_v31 = vld [vmem:[#allocation3 + $0xd9] sm:$0xff] }
 0x416   : > { %3413 = vst.msk [vmem:[#allocation3 + $0x109] sm:$0xff] %vm204_vm1, %v3381_v52  ;;  %v3382_v7 = vmax.f32 %v3350_v1, 0.0  ;;  %3322 = vst.msk [vmem:[#allocation2 + $0xc8] sm:$0xff] %vm204_vm1, %v3290_v58  ;;  %v3496_v45 = vld [vmem:[#allocation3 + $0xf9] sm:$0xff]  ;;  %v3495_v26 = vld [vmem:[#allocation3 + $0xf1] sm:$0xff] }
 0x417   : > { %3416 = vst.msk [vmem:[#allocation3 + $0x129] sm:$0xff] %vm204_vm1, %v3384_v59  ;;  %v3494_v2 = vld [vmem:[#allocation3 + $0xe1] sm:$0xff]  ;;  %v9116_v55 = vpack.c.bf16 %v3496_v45, %v3495_v26  ;;  %v9158_v59 = vld [vmem:[%s9601_s1 + $0x18] ss:$0 sps:$4 sm:$0xcc]  }
 0x418   : > { %3414 = vst.msk [vmem:[#allocation3 + $0x111] sm:$0xff] %vm204_vm1, %v3382_v7  ;;  %v7489_v4 = vpop.f32.mrb[28].mxu1  ;;  %v9114_v16 = vpack.c.bf16 %v3494_v2, %v3493_v31  ;;  %v3426_v22 = vld [vmem:[#allocation3 + $0x8] sm:$0xff]  ;;  %v3428_v1 = vld [vmem:[#allocation3 + $0x20] sm:$0xff]  ;;  %v3430_v7 = vld [vmem:[#allocation3 + $0x38] sm:$0xff]  ;;  %v4297_v2 = vrot.slane %v9158_v59, 2 }
 0x419   : > { %v3295_v3 = vadd.f32 %v7489_v4, %v3263_v8  ;;  %v3218_v40 = vpop.f32.mrb[29].mxu1  ;;  %v3457_v53 = vpack.c.bf16 %v3426_v22, %v3425_v20  ;;  %v3427_v8 = vld [vmem:[#allocation3 + $0x18] sm:$0xff]  ;;  %v3429_v31 = vld [vmem:[#allocation3 + $0x30] sm:$0xff]  ;;  %v3434_v26 = vld [vmem:[#allocation3 + $0x68] sm:$0xff] }
 0x41a   : > { %v3355_v56 = vld [vmem:[#allocation2 + $0xd0] sm:$0xff]  ;;  %v3293_v34 = vadd.f32 %v3261_v27, %v3218_v40  ;;  %v7490_v0 = vpop.f32.mrb[30].mxu1  ;;  %7510 = vmatmul.mubr.msk.bf16.gmra.mrb[48].mxu1 %vm204_vm1, %v9114_v16  ;;  %v9160_v45 = vpack.c.bf16 %v3428_v1, %v3427_v8  ;;  %v4050_v27 = vsel %vm529_vm0, %v9050_v23, 0  ;;  %v9165_v4 = vpack.c.bf16 %v3430_v7, %v3429_v31  ;;  %v3433_v40 = vld [vmem:[#allocation3 + $0x60] sm:$0xff] }
 0x41b   : > { %v3387_v13 = vmax.f32 %v3355_v56, 0.0  ;;  %v3353_v14 = vld [vmem:[#allocation2 + $0xc0] sm:$0xff]  ;;  %3327 = vst.msk [vmem:[#allocation2 + $0xf0] sm:$0xff] %vm204_vm1, %v3295_v3  ;;  %v3296_v30 = vadd.f32 %v7490_v0, %v3264_v15  ;;  %v3221_v38 = vpop.f32.mrb[31].mxu1  ;;  %7513 = vmatprep.mubr.msk.bf16.mxu1 %vm204_vm1, %v9116_v55  ;;  %v3432_v15 = vld [vmem:[#allocation3 + $0x50] sm:$0xff]  ;;  %v3431_v3 = vld [vmem:[#allocation3 + $0x48] sm:$0xff] }
 0x41c   : > { %v3385_v28 = vmax.f32 %v3353_v14, 0.0  ;;  %v3356_v43 = vld [vmem:[#allocation2 + $0xd8] sm:$0xff]  ;;  %3325 = vst.msk [vmem:[#allocation2 + $0xe0] sm:$0xff] %vm204_vm1, %v3293_v34  ;;  %v3294_v49 = vadd.f32 %v3262_v41, %v3221_v38  ;;  %v3499_v24 = vld [vmem:[#allocation3 + $0x121] sm:$0xff]  ;;  %v9174_v23 = vpack.c.bf16 %v3432_v15, %v3431_v3  ;;  %v9176_v41 = vpack.c.bf16 %v3434_v26, %v3433_v40  ;;  %v3437_v14 = vld [vmem:[#allocation3 + $0x90] sm:$0xff] }
 0x41d   : > { %3419 = vst.msk [vmem:[#allocation3 + $0x151] sm:$0xff] %vm204_vm1, %v3387_v13  ;;  %v3388_v50 = vmax.f32 %v3356_v43, 0.0  ;;  %v3354_v57 = vld [vmem:[#allocation2 + $0xc8] sm:$0xff]  ;;  %3328 = vst.msk [vmem:[#allocation2 + $0xf8] sm:$0xff] %vm204_vm1, %v3296_v30  ;;  %v3436_v56 = vld [vmem:[#allocation3 + $0x80] sm:$0xff]  ;;  %v4347_v3 = vsel %vm529_vm0, %v4297_v2, 0 }
 0x41e   : > { %3417 = vst.msk [vmem:[#allocation3 + $0x139] sm:$0xff] %vm204_vm1, %v3385_v28  ;;  %v3386_v6 = vmax.f32 %v3354_v57, 0.0  ;;  %3326 = vst.msk [vmem:[#allocation2 + $0xe8] sm:$0xff] %vm204_vm1, %v3294_v49  ;;  %v3500_v9 = vld [vmem:[#allocation3 + $0x129] sm:$0xff]  ;;  %v3438_v34 = vld [vmem:[#allocation3 + $0x98] sm:$0xff] }
 0x41f   : > { %3420 = vst.msk [vmem:[#allocation3 + $0x159] sm:$0xff] %vm204_vm1, %v3388_v50  ;;  %v3497_v33 = vld [vmem:[#allocation3 + $0x109] sm:$0xff]  ;;  %v3498_v42 = vld [vmem:[#allocation3 + $0x111] sm:$0xff]  ;;  %v9132_v32 = vpack.c.bf16 %v3500_v9, %v3499_v24  ;;  %v9184_v30 = vpack.c.bf16 %v3438_v34, %v3437_v14  ;;  %v3441_v50 = vld [vmem:[#allocation3 + $0xc0] sm:$0xff] }
 0x420   : > { %3418 = vst.msk [vmem:[#allocation3 + $0x141] sm:$0xff] %vm204_vm1, %v3386_v6  ;;  %v9130_v21 = vpack.c.bf16 %v3498_v42, %v3497_v33  ;;  %v3435_v0 = vld [vmem:[#allocation3 + $0x78] sm:$0xff]  ;;  %v3440_v38 = vld [vmem:[#allocation3 + $0xb0] sm:$0xff]  ;;  %v3442_v28 = vld [vmem:[#allocation3 + $0xc8] sm:$0xff] }
 0x421   : > { %v9182_v13 = vpack.c.bf16 %v3436_v56, %v3435_v0  ;;  %v3439_v43 = vld [vmem:[#allocation3 + $0xa8] sm:$0xff]  ;;  %v9192_v57 = vpack.c.bf16 %v3442_v28, %v3441_v50  ;;  %v3444_v6 = vld [vmem:[#allocation3 + $0xe0] sm:$0xff]  ;;  %v3446_v9 = vld [vmem:[#allocation3 + $0xf8] sm:$0xff] }
 0x422   : > { %v3359_v60 = vld [vmem:[#allocation2 + $0xf0] sm:$0xff]  ;;  %7514 = vmatmul.mubr.msk.bf16.gmra.mrb[52].mxu1 %vm204_vm1, %v9130_v21  ;;  %v9190_v49 = vpack.c.bf16 %v3440_v38, %v3439_v43  ;;  %v3443_v33 = vld [vmem:[#allocation3 + $0xd8] sm:$0xff]  ;;  %v3952_v22 = vld [vmem:[#allocation3 + $0x2] sm:$0xff] }
 0x423   : > { %v3391_v36 = vmax.f32 %v3359_v60, 0.0  ;;  %v3357_v37 = vld [vmem:[#allocation2 + $0xe0] sm:$0xff]  ;;  %7517 = vmatprep.mubr.msk.bf16.mxu1 %vm204_vm1, %v9132_v32  ;;  %v9198_v42 = vpack.c.bf16 %v3444_v6, %v3443_v33  ;;  %v3445_v24 = vld [vmem:[#allocation3 + $0xf0] sm:$0xff]  ;;  %v6703_v56 = vld [vmem:[%s9601_s1 + $0x1c] sm:$0x3] }
 0x424   : > { %v3389_v39 = vmax.f32 %v3357_v37, 0.0  ;;  %v3360_v46 = vld [vmem:[#allocation2 + $0xf8] sm:$0xff]  ;;  %v9200_v60 = vpack.c.bf16 %v3446_v9, %v3445_v24  ;;  %v3450_v37 = vld [vmem:[#allocation3 + $0x128] sm:$0xff] }
 0x425   : > { %3423 = vst.msk [vmem:[#allocation3 + $0x181] sm:$0xff] %vm204_vm1, %v3391_v36  ;;  %v3392_v48 = vmax.f32 %v3360_v46, 0.0  ;;  %v3358_v54 = vld [vmem:[#allocation2 + $0xe8] sm:$0xff]  ;;  %v3501_v5 = vld [vmem:[#allocation3 + $0x139] sm:$0xff]  ;;  %v3503_v47 = vld [vmem:[#allocation3 + $0x151] sm:$0xff] }
 0x426   : > { %3421 = vst.msk [vmem:[#allocation3 + $0x169] sm:$0xff] %vm204_vm1, %v3389_v39  ;;  %v3390_v61 = vmax.f32 %v3358_v54, 0.0  ;;  %v3504_v62 = vld [vmem:[#allocation3 + $0x159] sm:$0xff]  ;;  %v3448_v36 = vld [vmem:[#allocation3 + $0x110] sm:$0xff]  ;;  %v3447_v39 = vld [vmem:[#allocation3 + $0x108] sm:$0xff] }
 0x427   : > { %3424 = vst.msk [vmem:[#allocation3 + $0x189] sm:$0xff] %vm204_vm1, %v3392_v48  ;;  %v3502_v11 = vld [vmem:[#allocation3 + $0x141] sm:$0xff]  ;;  %v9144_v17 = vpack.c.bf16 %v3504_v62, %v3503_v47  ;;  %v9206_v46 = vpack.c.bf16 %v3448_v36, %v3447_v39  ;;  %v3454_v62 = vld [vmem:[#allocation3 + $0x158] sm:$0xff]  ;;  %v3453_v47 = vld [vmem:[#allocation3 + $0x150] sm:$0xff] }
 0x428   : > { %3422 = vst.msk [vmem:[#allocation3 + $0x171] sm:$0xff] %vm204_vm1, %v3390_v61  ;;  %v9142_v29 = vpack.c.bf16 %v3502_v11, %v3501_v5  ;;  %v3449_v48 = vld [vmem:[#allocation3 + $0x120] sm:$0xff]  ;;  %v3451_v5 = vld [vmem:[#allocation3 + $0x138] sm:$0xff]  ;;  %v9216_v20 = vpack.c.bf16 %v3454_v62, %v3453_v47  ;;  %v3958_v34 = vld [vmem:[#allocation3 + $0x4a] sm:$0xff] }
 0x429   : > { %v9208_v54 = vpack.c.bf16 %v3450_v37, %v3449_v48  ;;  %v3452_v61 = vld [vmem:[#allocation3 + $0x140] sm:$0xff]  ;;  %v3956_v31 = vld [vmem:[#allocation3 + $0x32] sm:$0xff]  ;;  %v3961_v14 = vld [vmem:[#allocation3 + $0x6a] sm:$0xff] }
 0x42a   : > { %7518 = vmatmul.mubr.msk.bf16.gmra.mrb[56].mxu1 %vm204_vm1, %v9142_v29  ;;  %v9214_v11 = vpack.c.bf16 %v3452_v61, %v3451_v5  ;;  %v3954_v8 = vld [vmem:[#allocation3 + $0x1a] sm:$0xff]  ;;  %v3959_v0 = vld [vmem:[#allocation3 + $0x52] sm:$0xff]  ;;  %v3960_v59 = vld [vmem:[#allocation3 + $0x62] sm:$0xff] }
 0x42b   : > { %7521 = vmatprep.mubr.msk.bf16.mxu1 %vm204_vm1, %v9144_v17  ;;  %v3957_v15 = vld [vmem:[#allocation3 + $0x3a] sm:$0xff]  ;;  %v9244_v38 = vpack.c.bf16 %v3961_v14, %v3960_v59  ;;  %v3963_v43 = vld [vmem:[#allocation3 + $0x82] sm:$0xff]  ;;  %v3964_v50 = vld [vmem:[#allocation3 + $0x92] sm:$0xff] }
 0x42c   : > { %v9232_v40 = vpack.c.bf16 %v3957_v15, %v3956_v31  ;;  %v3962_v28 = vld [vmem:[#allocation3 + $0x7a] sm:$0xff]  ;;  %v3966_v24 = vld [vmem:[#allocation3 + $0xaa] sm:$0xff]  ;;  %v3967_v36 = vld [vmem:[#allocation3 + $0xb2] sm:$0xff] }
 0x42d   : > { %v3505_v25 = vld [vmem:[#allocation3 + $0x169] sm:$0xff]  ;;  %v3965_v6 = vld [vmem:[#allocation3 + $0x9a] sm:$0xff]  ;;  %v9250_v9 = vpack.c.bf16 %v3963_v43, %v3962_v28  ;;  %v9258_v48 = vpack.c.bf16 %v3967_v36, %v3966_v24  ;;  %v3972_v47 = vld [vmem:[#allocation3 + $0xf2] sm:$0xff]  ;;  %v4640_v36 = vsel %vm529_vm0, %v6703_v56, 0 }
 0x42e   : > { %v9252_v33 = vpack.c.bf16 %v3965_v6, %v3964_v50  ;;  %v3968_v37 = vld [vmem:[#allocation3 + $0xc2] sm:$0xff]  ;;  %v3969_v39 = vld [vmem:[#allocation3 + $0xca] sm:$0xff]  ;;  %v3970_v62 = vld [vmem:[#allocation3 + $0xda] sm:$0xff] }
 0x42f   : > { %v3506_v52 = vld [vmem:[#allocation3 + $0x171] sm:$0xff]  ;;  %v9260_v61 = vpack.c.bf16 %v3969_v39, %v3968_v37  ;;  %v3971_v5 = vld [vmem:[#allocation3 + $0xe2] sm:$0xff]  ;;  %v3981_v59 = vld [vmem:[#allocation3 + $0x15a] sm:$0xff] }
 0x430   : > { %v9150_v58 = vpack.c.bf16 %v3506_v52, %v3505_v25  ;;  %v3953_v25 = vld [vmem:[#allocation3 + $0xa] sm:$0xff]  ;;  %v3983_v50 = vld [vmem:[#allocation3 + $0x172] sm:$0xff]  ;;  %v8378_v24 = vld [vmem:[%s9601_s1 + $0x1c] ss:$0 sps:$4 sm:$0xcc]  }
 0x431   : > { %v3456_v52 = vld [vmem:[#allocation3 + $0x170] sm:$0xff]  ;;  %v3984_v1 = vpack.c.bf16 %v3953_v25, %v3952_v22  ;;  %v3973_v22 = vld [vmem:[#allocation3 + $0xfa] sm:$0xff]  ;;  %v9266_v25 = vpack.c.bf16 %v3971_v5, %v3970_v62  ;;  %v4887_v37 = vrot.slane %v8378_v24, 2 }
 0x432   : > { %7522 = vmatmul.mubr.msk.bf16.gmra.mrb[60].mxu1 %vm204_vm1, %v9150_v58  ;;  %v3982_v43 = vld [vmem:[#allocation3 + $0x16a] sm:$0xff]  ;;  %v6738_v5 = vld [vmem:[%s9601_s1 + $0x20] sm:$0x3] }
 0x433   : > { %7527 = vmatprep.mubr.msk.bf16.mxu1 %vm204_vm1, %v3457_v53  ;;  %v3455_v53 = vld [vmem:[#allocation3 + $0x168] sm:$0xff]  ;;  %v9290_v6 = vpack.c.bf16 %v3983_v50, %v3982_v43  ;;  %v4937_v62 = vsel %vm529_vm0, %v4887_v37, 0 }
 0x434   : > { %v9222_v7 = vpack.c.bf16 %v3456_v52, %v3455_v53  ;;  %v9268_v52 = vpack.c.bf16 %v3973_v22, %v3972_v47  ;;  %v3974_v53 = vld [vmem:[#allocation3 + $0x10a] sm:$0xff] }
 0x435   : > { %v4866_v47 = vld [vmem:[#allocation3 + $0x18a] sm:$0xff] }
 0x43a   : > { %7528 = vmatmul.mubr.msk.bf16.vlgmr.msra.gmra.mrb[32].mxu1 %vm204_vm1, %v9160_v45 }
 0x43b   : > { %7560 = vmatpush3.bf16.msra.mxu1 %v4050_v27  ;;  %7531 = vmatprep.mubr.msk.bf16.mxu1 %vm204_vm1, %v9165_v4  ;;  %v3955_v27 = vld [vmem:[#allocation3 + $0x22] sm:$0xff] }
 0x43c   : > { %8356 = vmatprep.subr.msk.bf16.mxu1 %vm529_vm0, %v4297_v2  ;;  %v9227_v26 = vpack.c.bf16 %v3955_v27, %v3954_v8  ;;  %v9242_v2 = vpack.c.bf16 %v3959_v0, %v3958_v34  ;;  %v3976_v8 = vld [vmem:[#allocation3 + $0x122] sm:$0xff]  ;;  %v3977_v27 = vld [vmem:[#allocation3 + $0x12a] sm:$0xff]  ;;  %v3980_v0 = vld [vmem:[#allocation3 + $0x152] sm:$0xff] }
 0x43d   : > { %v9276_v15 = vpack.c.bf16 %v3977_v27, %v3976_v8  ;;  %v3979_v34 = vld [vmem:[#allocation3 + $0x142] sm:$0xff]  ;;  %v9284_v28 = vpack.c.bf16 %v3981_v59, %v3980_v0  ;;  %v5433_v59 = vld [vmem:[#allocation3 + $0x91] sm:$0xff] }
 0x43e   : > { %v5432_v27 = vld [vmem:[#allocation3 + $0x81] sm:$0xff] }
 0x442   : > { %7532 = vmatmul.mubr.msk.bf16.gmra.mrb[36].mxu1 %vm204_vm1, %v9174_v23 }
 0x443   : > { %7535 = vmatprep.mubr.msk.bf16.mxu1 %vm204_vm1, %v9176_v41 }
 0x44a   : > { %7536 = vmatmul.mubr.msk.bf16.gmra.mrb[40].mxu1 %vm204_vm1, %v9182_v13 }
 0x44b   : > { %7539 = vmatprep.mubr.msk.bf16.mxu1 %vm204_vm1, %v9184_v30 }
 0x452   : > { %7540 = vmatmul.mubr.msk.bf16.gmra.mrb[44].mxu1 %vm204_vm1, %v9190_v49 }
 0x453   : > { %7543 = vmatprep.mubr.msk.bf16.mxu1 %vm204_vm1, %v9192_v57 }
 0x45a   : > { %7544 = vmatmul.mubr.msk.bf16.gmra.mrb[48].mxu1 %vm204_vm1, %v9198_v42 }
 0x45b   : > { %7547 = vmatprep.mubr.msk.bf16.mxu1 %vm204_vm1, %v9200_v60 }
 0x462   : > { %7548 = vmatmul.mubr.msk.bf16.gmra.mrb[52].mxu1 %vm204_vm1, %v9206_v46 }
 0x463   : > { %7551 = vmatprep.mubr.msk.bf16.mxu1 %vm204_vm1, %v9208_v54 }
 0x46a   : > { %7552 = vmatmul.mubr.msk.bf16.gmra.mrb[56].mxu1 %vm204_vm1, %v9214_v11 }
 0x46b   : > { %7555 = vmatprep.mubr.msk.bf16.mxu1 %vm204_vm1, %v9216_v20 }
 0x472   : > { %7556 = vmatmul.mubr.msk.bf16.gmra.mrb[60].mxu1 %vm204_vm1, %v9222_v7 }
 0x473   : > { %7561 = vmatprep.mubr.msk.bf16.mxu1 %vm204_vm1, %v3984_v1  ;;  %v3975_v1 = vld [vmem:[#allocation3 + $0x112] sm:$0xff] }
 0x474   : > { %v9274_v31 = vpack.c.bf16 %v3975_v1, %v3974_v53  ;;  %v6773_v1 = vld [vmem:[%s9601_s1 + $0x24] sm:$0x3] }
 0x47a   : > { %7562 = vmatmul.mubr.msk.bf16.vlgmr.msra.gmra.mrb[32].mxu1 %vm204_vm1, %v9227_v26 }
 0x47b   : > { %7594 = vmatpush3.bf16.msra.mxu1 %v4347_v3  ;;  %7565 = vmatprep.mubr.msk.bf16.mxu1 %vm204_vm1, %v9232_v40  ;;  %v3978_v3 = vld [vmem:[#allocation3 + $0x13a] sm:$0xff] }
 0x47c   : > { %8357 = vmatprep.subr.msk.bf16.mxu1 %vm529_vm0, %v6703_v56  ;;  %v9282_v14 = vpack.c.bf16 %v3979_v34, %v3978_v3  ;;  %v4275_v56 = vld [vmem:[#allocation3 + $0x180] sm:$0xff] }
 0x47d   : > { %v5434_v3 = vld [vmem:[#allocation3 + $0x99] sm:$0xff] }
 0x47e   : > { %v5431_v34 = vld [vmem:[#allocation3 + $0x79] sm:$0xff]  ;;  %v5461_v43 = vpack.c.bf16 %v5434_v3, %v5433_v59 }
 0x47f   : > { %v5460_v0 = vpack.c.bf16 %v5432_v27, %v5431_v34 }
 0x482   : > { %7566 = vmatmul.mubr.msk.bf16.gmra.mrb[36].mxu1 %vm204_vm1, %v9242_v2 }
 0x483   : > { %7569 = vmatprep.mubr.msk.bf16.mxu1 %vm204_vm1, %v9244_v38 }
 0x48a   : > { %7570 = vmatmul.mubr.msk.bf16.gmra.mrb[40].mxu1 %vm204_vm1, %v9250_v9 }
 0x48b   : > { %7573 = vmatprep.mubr.msk.bf16.mxu1 %vm204_vm1, %v9252_v33 }
 0x492   : > { %7574 = vmatmul.mubr.msk.bf16.gmra.mrb[44].mxu1 %vm204_vm1, %v9258_v48 }
 0x493   : > { %7577 = vmatprep.mubr.msk.bf16.mxu1 %vm204_vm1, %v9260_v61 }
 0x49a   : > { %7578 = vmatmul.mubr.msk.bf16.gmra.mrb[48].mxu1 %vm204_vm1, %v9266_v25 }
 0x49b   : > { %7581 = vmatprep.mubr.msk.bf16.mxu1 %vm204_vm1, %v9268_v52 }
 0x4a2   : > { %7582 = vmatmul.mubr.msk.bf16.gmra.mrb[52].mxu1 %vm204_vm1, %v9274_v31 }
 0x4a3   : > { %7585 = vmatprep.mubr.msk.bf16.mxu1 %vm204_vm1, %v9276_v15 }
 0x4aa   : > { %7586 = vmatmul.mubr.msk.bf16.gmra.mrb[56].mxu1 %vm204_vm1, %v9282_v14 }
 0x4ab   : > { %7589 = vmatprep.mubr.msk.bf16.mxu1 %vm204_vm1, %v9284_v28 }
 0x4b2   : > { %7590 = vmatmul.mubr.msk.bf16.gmra.mrb[60].mxu1 %vm204_vm1, %v9290_v6 }
 0x4b3   : > { %7595 = vmatprep.mubr.msk.bf16.mxu1 %vm204_vm1, %v9160_v45  ;;  %v4276_v45 = vld [vmem:[#allocation3 + $0x188] sm:$0xff] }
 0x4b4   : > { %v9329_v39 = vpack.c.bf16 %v4276_v45, %v4275_v56 }
 0x4ba   : > { %7596 = vmatmul.mubr.msk.bf16.vlgmr.msra.gmra.mrb[32].mxu1 %vm204_vm1, %v9165_v4 }
 0x4bb   : > { %7628 = vmatpush3.bf16.msra.mxu1 %v4640_v36  ;;  %7599 = vmatprep.mubr.msk.bf16.mxu1 %vm204_vm1, %v9174_v23 }
 0x4bc   : > { %8358 = vmatprep.subr.msk.bf16.mxu1 %vm529_vm0, %v4887_v37 }
 0x4c2   : > { %7600 = vmatmul.mubr.msk.bf16.gmra.mrb[36].mxu1 %vm204_vm1, %v9176_v41 }
 0x4c3   : > { %7603 = vmatprep.mubr.msk.bf16.mxu1 %vm204_vm1, %v9182_v13 }
 0x4ca   : > { %7604 = vmatmul.mubr.msk.bf16.gmra.mrb[40].mxu1 %vm204_vm1, %v9184_v30 }
 0x4cb   : > { %7607 = vmatprep.mubr.msk.bf16.mxu1 %vm204_vm1, %v9190_v49 }
 0x4d2   : > { %7608 = vmatmul.mubr.msk.bf16.gmra.mrb[44].mxu1 %vm204_vm1, %v9192_v57 }
 0x4d3   : > { %7611 = vmatprep.mubr.msk.bf16.mxu1 %vm204_vm1, %v9198_v42 }
 0x4da   : > { %7612 = vmatmul.mubr.msk.bf16.gmra.mrb[48].mxu1 %vm204_vm1, %v9200_v60 }
 0x4db   : > { %7615 = vmatprep.mubr.msk.bf16.mxu1 %vm204_vm1, %v9206_v46 }
 0x4e2   : > { %7616 = vmatmul.mubr.msk.bf16.gmra.mrb[52].mxu1 %vm204_vm1, %v9208_v54 }
 0x4e3   : > { %7619 = vmatprep.mubr.msk.bf16.mxu1 %vm204_vm1, %v9214_v11 }
 0x4ea   : > { %7620 = vmatmul.mubr.msk.bf16.gmra.mrb[56].mxu1 %vm204_vm1, %v9216_v20 }
 0x4eb   : > { %7623 = vmatprep.mubr.msk.bf16.mxu1 %vm204_vm1, %v9222_v7 }
 0x4f2   : > { %7624 = vmatmul.mubr.msk.bf16.gmra.mrb[60].mxu1 %vm204_vm1, %v9329_v39 }
 0x4f3   : > { %7629 = vmatprep.mubr.msk.bf16.mxu1 %vm204_vm1, %v9041_v44  ;;  %v4573_v44 = vld [vmem:[#allocation3 + $0x189] sm:$0xff] }
 0x4fa   : > { %7630 = vmatmul.mubr.msk.bf16.vlgmr.msra.gmra.mrb[32].mxu1 %vm204_vm1, %v9045_v18  ;;  %v4572_v18 = vld [vmem:[#allocation3 + $0x181] sm:$0xff] }
 0x4fb   : > { %7662 = vmatpush3.bf16.msra.mxu1 %v4937_v62  ;;  %7633 = vmatprep.mubr.msk.bf16.mxu1 %vm204_vm1, %v9066_v12  ;;  %v9368_v12 = vpack.c.bf16 %v4573_v44, %v4572_v18 }
 0x4fc   : > { %8359 = vmatprep.subr.msk.bf16.mxu1 %vm529_vm0, %v6738_v5 }
 0x502   : > { %7634 = vmatmul.mubr.msk.bf16.gmra.mrb[36].mxu1 %vm204_vm1, %v9068_v35  ;;  %v8379_v35 = vld [vmem:[%s9601_s1 + $0x20] ss:$0 sps:$4 sm:$0xcc]  }
 0x503   : > { %7637 = vmatprep.mubr.msk.bf16.mxu1 %vm204_vm1, %v9082_v63  ;;  %v5230_v63 = vsel %vm529_vm0, %v6738_v5, 0 }
 0x50a   : > { %7638 = vmatmul.mubr.msk.bf16.gmra.mrb[40].mxu1 %vm204_vm1, %v9084_v19  ;;  %v5477_v19 = vrot.slane %v8379_v35, 2 }
 0x50b   : > { %7641 = vmatprep.mubr.msk.bf16.mxu1 %vm204_vm1, %v9098_v51 }
 0x50c   : > { %v5527_v53 = vsel %vm529_vm0, %v5477_v19, 0 }
 0x512   : > { %7642 = vmatmul.mubr.msk.bf16.gmra.mrb[44].mxu1 %vm204_vm1, %v9100_v10 }
 0x513   : > { %7645 = vmatprep.mubr.msk.bf16.mxu1 %vm204_vm1, %v9114_v16 }
 0x51a   : > { %7646 = vmatmul.mubr.msk.bf16.gmra.mrb[48].mxu1 %vm204_vm1, %v9116_v55 }
 0x51b   : > { %7649 = vmatprep.mubr.msk.bf16.mxu1 %vm204_vm1, %v9130_v21 }
 0x522   : > { %7650 = vmatmul.mubr.msk.bf16.gmra.mrb[52].mxu1 %vm204_vm1, %v9132_v32 }
 0x523   : > { %7653 = vmatprep.mubr.msk.bf16.mxu1 %vm204_vm1, %v9142_v29 }
 0x52a   : > { %7654 = vmatmul.mubr.msk.bf16.gmra.mrb[56].mxu1 %vm204_vm1, %v9144_v17 }
 0x52b   : > { %7657 = vmatprep.mubr.msk.bf16.mxu1 %vm204_vm1, %v9150_v58 }
 0x532   : > { %7658 = vmatmul.mubr.msk.bf16.gmra.mrb[60].mxu1 %vm204_vm1, %v9368_v12 }
 0x533   : > { %7663 = vmatprep.mubr.msk.bf16.mxu1 %vm204_vm1, %v9227_v26  ;;  %v4865_v26 = vld [vmem:[#allocation3 + $0x182] sm:$0xff] }
 0x534   : > { %v9407_v22 = vpack.c.bf16 %v4866_v47, %v4865_v26 }
 0x53a   : > { %7664 = vmatmul.mubr.msk.bf16.vlgmr.msra.gmra.mrb[32].mxu1 %vm204_vm1, %v9232_v40 }
 0x53b   : > { %7696 = vmatpush3.bf16.msra.mxu1 %v5230_v63  ;;  %7667 = vmatprep.mubr.msk.bf16.mxu1 %vm204_vm1, %v9242_v2 }
 0x53c   : > { %8360 = vmatprep.subr.msk.bf16.mxu1 %vm529_vm0, %v5477_v19 }
 0x542   : > { %7668 = vmatmul.mubr.msk.bf16.gmra.mrb[36].mxu1 %vm204_vm1, %v9244_v38 }
 0x543   : > { %7671 = vmatprep.mubr.msk.bf16.mxu1 %vm204_vm1, %v9250_v9 }
 0x54a   : > { %7672 = vmatmul.mubr.msk.bf16.gmra.mrb[40].mxu1 %vm204_vm1, %v9252_v33 }
 0x54b   : > { %7675 = vmatprep.mubr.msk.bf16.mxu1 %vm204_vm1, %v9258_v48 }
 0x552   : > { %7676 = vmatmul.mubr.msk.bf16.gmra.mrb[44].mxu1 %vm204_vm1, %v9260_v61 }
 0x553   : > { %7679 = vmatprep.mubr.msk.bf16.mxu1 %vm204_vm1, %v9266_v25 }
 0x55a   : > { %7680 = vmatmul.mubr.msk.bf16.gmra.mrb[48].mxu1 %vm204_vm1, %v9268_v52 }
 0x55b   : > { %7683 = vmatprep.mubr.msk.bf16.mxu1 %vm204_vm1, %v9274_v31 }
 0x562   : > { %7684 = vmatmul.mubr.msk.bf16.gmra.mrb[52].mxu1 %vm204_vm1, %v9276_v15 }
 0x563   : > { %7687 = vmatprep.mubr.msk.bf16.mxu1 %vm204_vm1, %v9282_v14 }
 0x56a   : > { %7688 = vmatmul.mubr.msk.bf16.gmra.mrb[56].mxu1 %vm204_vm1, %v9284_v28 }
 0x56b   : > { %7691 = vmatprep.mubr.msk.bf16.mxu1 %vm204_vm1, %v9290_v6 }
 0x572   : > { %7692 = vmatmul.mubr.msk.bf16.gmra.mrb[60].mxu1 %vm204_vm1, %v9407_v22 }
 0x573   : > { %7697 = vmatprep.mubr.msk.bf16.mxu1 %vm204_vm1, %v9165_v4  ;;  %v5162_v4 = vld [vmem:[#allocation3 + $0x198] sm:$0xff] }
 0x57a   : > { %7698 = vmatmul.mubr.msk.bf16.vlgmr.msra.gmra.mrb[32].mxu1 %vm204_vm1, %v9174_v23  ;;  %v5163_v23 = vld [vmem:[#allocation3 + $0x1a0] sm:$0xff] }
 0x57b   : > { %7730 = vmatpush3.bf16.msra.mxu1 %v5527_v53  ;;  %7701 = vmatprep.mubr.msk.bf16.mxu1 %vm204_vm1, %v9176_v41  ;;  %v5179_v41 = vpack.c.bf16 %v5163_v23, %v5162_v4 }
 0x57c   : > { %8361 = vmatprep.subr.msk.bf16.mxu1 %vm529_vm0, %v6773_v1 }
 0x582   : > { %7702 = vmatmul.mubr.msk.bf16.gmra.mrb[36].mxu1 %vm204_vm1, %v9182_v13  ;;  %v5426_v13 = vld [vmem:[#allocation3 + $0x39] sm:$0xff] }
 0x583   : > { %7705 = vmatprep.mubr.msk.bf16.mxu1 %vm204_vm1, %v9184_v30  ;;  %v5425_v30 = vld [vmem:[#allocation3 + $0x31] sm:$0xff] }
 0x58a   : > { %7706 = vmatmul.mubr.msk.bf16.gmra.mrb[40].mxu1 %vm204_vm1, %v9190_v49  ;;  %v5457_v49 = vpack.c.bf16 %v5426_v13, %v5425_v30 }
 0x58b   : > { %7709 = vmatprep.mubr.msk.bf16.mxu1 %vm204_vm1, %v9192_v57  ;;  %v6790_v57 = vld [vmem:[%s9602_s2 + $0x4] sm:$0xf] }
 0x58c   : > { %8362 = vmatprep.subr.msk.bf16.mxu0 %vm3068_vm4, %v6790_v57 }
 0x592   : > { %7710 = vmatmul.mubr.msk.bf16.gmra.mrb[44].mxu1 %vm204_vm1, %v9198_v42  ;;  %v6114_v42 = vsel %vm3068_vm4, %v6790_v57, 0 }
 0x593   : > { %7713 = vmatprep.mubr.msk.bf16.mxu1 %vm204_vm1, %v9200_v60  ;;  %7798 = vmatpush3.bf16.msra.mxu0 %v6114_v42  ;;  %v5428_v60 = vld [vmem:[#allocation3 + $0x51] sm:$0xff] }
 0x59a   : > { %7714 = vmatmul.mubr.msk.bf16.gmra.mrb[48].mxu1 %vm204_vm1, %v9206_v46  ;;  %v5430_v46 = vld [vmem:[#allocation3 + $0x69] sm:$0xff] }
 0x59b   : > { %7717 = vmatprep.mubr.msk.bf16.mxu1 %vm204_vm1, %v9208_v54  ;;  %v5427_v54 = vld [vmem:[#allocation3 + $0x49] sm:$0xff] }
 0x5a2   : > { %7718 = vmatmul.mubr.msk.bf16.gmra.mrb[52].mxu1 %vm204_vm1, %v9214_v11  ;;  %v5458_v11 = vpack.c.bf16 %v5428_v60, %v5427_v54 }
 0x5a3   : > { %7721 = vmatprep.mubr.msk.bf16.mxu1 %vm204_vm1, %v9216_v20  ;;  %v5820_v20 = vsel %vm529_vm0, %v6773_v1, 0 }
 0x5aa   : > { %7722 = vmatmul.mubr.msk.bf16.gmra.mrb[56].mxu1 %vm204_vm1, %v9222_v7  ;;  %v5429_v7 = vld [vmem:[#allocation3 + $0x61] sm:$0xff] }
 0x5ab   : > { %7725 = vmatprep.mubr.msk.bf16.mxu1 %vm204_vm1, %v9329_v39  ;;  %v5459_v8 = vpack.c.bf16 %v5430_v46, %v5429_v7 }
 0x5b2   : > { %7726 = vmatmul.mubr.msk.bf16.gmra.mrb[60].mxu1 %vm204_vm1, %v5179_v41 }
 0x5b3   : > { %7731 = vmatprep.mubr.msk.bf16.mxu1 %vm204_vm1, %v5457_v49 }
 0x5ba   : > { %7732 = vmatmul.mubr.msk.bf16.vlgmr.msra.gmra.mrb[32].mxu1 %vm204_vm1, %v5458_v11 }
 0x5bb   : > { %7764 = vmatpush3.bf16.msra.mxu1 %v5820_v20  ;;  %7735 = vmatprep.mubr.msk.bf16.mxu1 %vm204_vm1, %v5459_v8 }
 0x5c2   : > { %7736 = vmatmul.mubr.msk.bf16.gmra.mrb[36].mxu1 %vm204_vm1, %v5460_v0 }
 0x5c3   : > { %7739 = vmatprep.mubr.msk.bf16.mxu1 %vm204_vm1, %v5461_v43 }
 0x5ca   : > { %7740 = vmatmul.mubr.msk.bf16.gmra.mrb[40].mxu1 %vm204_vm1, %v9098_v51  ;;  %v5455_v51 = vld [vmem:[#allocation3 + $0x199] sm:$0xff] }
 0x5cb   : > { %7743 = vmatprep.mubr.msk.bf16.mxu1 %vm204_vm1, %v9100_v10  ;;  %v5456_v10 = vld [vmem:[#allocation3 + $0x1a1] sm:$0xff] }
 0x5d2   : > { %7744 = vmatmul.mubr.msk.bf16.gmra.mrb[44].mxu1 %vm204_vm1, %v9114_v16  ;;  %v5472_v16 = vpack.c.bf16 %v5456_v10, %v5455_v51 }
 0x5d3   : > { %7747 = vmatprep.mubr.msk.bf16.mxu1 %vm204_vm1, %v9116_v55  ;;  %v5752_v55 = vld [vmem:[#allocation3 + $0x19a] sm:$0xff] }
 0x5da   : > { %7748 = vmatmul.mubr.msk.bf16.gmra.mrb[48].mxu1 %vm204_vm1, %v9130_v21  ;;  %v5753_v21 = vld [vmem:[#allocation3 + $0x1a2] sm:$0xff] }
 0x5db   : > { %7751 = vmatprep.mubr.msk.bf16.mxu1 %vm204_vm1, %v9132_v32  ;;  %v5769_v32 = vpack.c.bf16 %v5753_v21, %v5752_v55 }
 0x5e2   : > { %7752 = vmatmul.mubr.msk.bf16.gmra.mrb[52].mxu1 %vm204_vm1, %v9142_v29 }
 0x5e3   : > { %7755 = vmatprep.mubr.msk.bf16.mxu1 %vm204_vm1, %v9144_v17 }
 0x5ea   : > { %7756 = vmatmul.mubr.msk.bf16.gmra.mrb[56].mxu1 %vm204_vm1, %v9150_v58 }
 0x5eb   : > { %7759 = vmatprep.mubr.msk.bf16.mxu1 %vm204_vm1, %v9368_v12 }
 0x5f2   : > { %7760 = vmatmul.mubr.msk.bf16.gmra.mrb[60].mxu1 %vm204_vm1, %v5472_v16 }
 0x5f3   : > { %7765 = vmatprep.mubr.msk.bf16.mxu1 %vm204_vm1, %v9232_v40 }
 0x5fa   : > { %7766 = vmatmul.mubr.msk.bf16.vlgmr.msra.gmra.mrb[32].mxu1 %vm204_vm1, %v9242_v2 }
 0x5fb   : > { %7769 = vmatprep.mubr.msk.bf16.mxu1 %vm204_vm1, %v9244_v38 }
 0x602   : > { %7770 = vmatmul.mubr.msk.bf16.gmra.mrb[36].mxu1 %vm204_vm1, %v9250_v9 }
 0x603   : > { %7773 = vmatprep.mubr.msk.bf16.mxu1 %vm204_vm1, %v9252_v33 }
 0x60a   : > { %7774 = vmatmul.mubr.msk.bf16.gmra.mrb[40].mxu1 %vm204_vm1, %v9258_v48 }
 0x60b   : > { %7777 = vmatprep.mubr.msk.bf16.mxu1 %vm204_vm1, %v9260_v61 }
 0x612   : > { %7778 = vmatmul.mubr.msk.bf16.gmra.mrb[44].mxu1 %vm204_vm1, %v9266_v25 }
 0x613   : > { %7781 = vmatprep.mubr.msk.bf16.mxu1 %vm204_vm1, %v9268_v52 }
 0x61a   : > { %7782 = vmatmul.mubr.msk.bf16.gmra.mrb[48].mxu1 %vm204_vm1, %v9274_v31 }
 0x61b   : > { %7785 = vmatprep.mubr.msk.bf16.mxu1 %vm204_vm1, %v9276_v15 }
 0x622   : > { %7786 = vmatmul.mubr.msk.bf16.gmra.mrb[52].mxu1 %vm204_vm1, %v9282_v14 }
 0x623   : > { %7789 = vmatprep.mubr.msk.bf16.mxu1 %vm204_vm1, %v9284_v28 }
 0x62a   : > { %7790 = vmatmul.mubr.msk.bf16.gmra.mrb[56].mxu1 %vm204_vm1, %v9290_v6 }
 0x62b   : > { %7793 = vmatprep.mubr.msk.bf16.mxu1 %vm204_vm1, %v9407_v22 }
 0x632   : > { %7794 = vmatmul.mubr.msk.bf16.gmra.mrb[60].mxu1 %vm204_vm1, %v5769_v32 }
 0x6cd   : > { %v7767_v29 = vpop.f32.mrb[32].mxu1 }
 0x6ce   : > { %v5856_v17 = vpop.f32.mrb[33].mxu1  ;;  %v6017_v40 = vmax.f32 %v7767_v29, 0.0 }
 0x6cf   : > { %v7768_v58 = vpop.f32.mrb[34].mxu1  ;;  %v6015_v9 = vmax.f32 %v5856_v17, 0.0 }
 0x6d0   : > { %v6018_v2 = vmax.f32 %v7768_v58, 0.0  ;;  %v5859_v38 = vpop.f32.mrb[35].mxu1 }
 0x6d1   : > { %v6016_v33 = vmax.f32 %v5859_v38, 0.0 }
 0x6d2   : > { %v6048_v48 = vpack.c.bf16 %v6018_v2, %v6017_v40 }
 0x6d3   : > { %v6047_v61 = vpack.c.bf16 %v6016_v33, %v6015_v9 }
 0x6d5   : > { %v7771_v25 = vpop.f32.mrb[36].mxu1  ;;  %7799 = vmatprep.mubr.msk.bf16.mxu0 %vm3019_vm5, %v6047_v61 }
 0x6d6   : > { %v5872_v52 = vpop.f32.mrb[37].mxu1  ;;  %7800 = vmatmul.mubr.msk.bf16.vlgmr.msra.gmra.mrb[32].mxu0 %vm3019_vm5, %v6048_v48  ;;  %v6021_v15 = vmax.f32 %v7771_v25, 0.0 }
 0x6d7   : > { %v7772_v31 = vpop.f32.mrb[38].mxu1  ;;  %v6019_v50 = vmax.f32 %v5872_v52, 0.0 }
 0x6d8   : > { %v6022_v14 = vmax.f32 %v7772_v31, 0.0  ;;  %v5875_v28 = vpop.f32.mrb[39].mxu1 }
 0x6d9   : > { %v6020_v6 = vmax.f32 %v5875_v28, 0.0 }
 0x6da   : > { %v6050_v24 = vpack.c.bf16 %v6022_v14, %v6021_v15 }
 0x6db   : > { %v6049_v36 = vpack.c.bf16 %v6020_v6, %v6019_v50  ;;  %v6279_v6 = vld [vmem:[#allocation2 + $0x10] sm:$0xff] }
 0x6dd   : > { %v7775_v37 = vpop.f32.mrb[40].mxu1  ;;  %7803 = vmatprep.mubr.msk.bf16.mxu0 %vm3019_vm5, %v6049_v36 }
 0x6de   : > { %v5888_v45 = vpop.f32.mrb[41].mxu1  ;;  %7804 = vmatmul.mubr.msk.bf16.gmra.mrb[36].mxu0 %vm3019_vm5, %v6050_v24  ;;  %v6025_v39 = vmax.f32 %v7775_v37, 0.0  ;;  %v6277_v37 = vld [vmem:[#allocation2] sm:$0xff] }
 0x6df   : > { %v7776_v56 = vpop.f32.mrb[42].mxu1  ;;  %v6023_v44 = vmax.f32 %v5888_v45, 0.0 }
 0x6e0   : > { %v6026_v62 = vmax.f32 %v7776_v56, 0.0  ;;  %v5891_v5 = vpop.f32.mrb[43].mxu1 }
 0x6e1   : > { %v6024_v18 = vmax.f32 %v5891_v5, 0.0 }
 0x6e2   : > { %v6052_v12 = vpack.c.bf16 %v6026_v62, %v6025_v39  ;;  %v6280_v39 = vld [vmem:[#allocation2 + $0x18] sm:$0xff] }
 0x6e3   : > { %v6051_v35 = vpack.c.bf16 %v6024_v18, %v6023_v44  ;;  %v6278_v18 = vld [vmem:[#allocation2 + $0x8] sm:$0xff] }
 0x6e5   : > { %v7779_v63 = vpop.f32.mrb[44].mxu1  ;;  %7807 = vmatprep.mubr.msk.bf16.mxu0 %vm3019_vm5, %v6051_v35 }
 0x6e6   : > { %v5904_v19 = vpop.f32.mrb[45].mxu1  ;;  %7808 = vmatmul.mubr.msk.bf16.gmra.mrb[40].mxu0 %vm3019_vm5, %v6052_v12  ;;  %v6029_v47 = vmax.f32 %v7779_v63, 0.0 }
 0x6e7   : > { %v7780_v26 = vpop.f32.mrb[46].mxu1  ;;  %v6027_v1 = vmax.f32 %v5904_v19, 0.0 }
 0x6e8   : > { %v6030_v22 = vmax.f32 %v7780_v26, 0.0  ;;  %v5907_v53 = vpop.f32.mrb[47].mxu1 }
 0x6e9   : > { %v6028_v4 = vmax.f32 %v5907_v53, 0.0 }
 0x6ea   : > { %v6054_v23 = vpack.c.bf16 %v6030_v22, %v6029_v47  ;;  %v6283_v47 = vld [vmem:[#allocation2 + $0x30] sm:$0xff] }
 0x6eb   : > { %v6053_v41 = vpack.c.bf16 %v6028_v4, %v6027_v1  ;;  %v6281_v1 = vld [vmem:[#allocation2 + $0x20] sm:$0xff] }
 0x6ed   : > { %v7783_v13 = vpop.f32.mrb[48].mxu1  ;;  %7811 = vmatprep.mubr.msk.bf16.mxu0 %vm3019_vm5, %v6053_v41  ;;  %v6284_v41 = vld [vmem:[#allocation2 + $0x38] sm:$0xff] }
 0x6ee   : > { %v5920_v30 = vpop.f32.mrb[49].mxu1  ;;  %7812 = vmatmul.mubr.msk.bf16.gmra.mrb[44].mxu0 %vm3019_vm5, %v6054_v23  ;;  %v6033_v57 = vmax.f32 %v7783_v13, 0.0 }
 0x6ef   : > { %v7784_v49 = vpop.f32.mrb[50].mxu1  ;;  %v6031_v46 = vmax.f32 %v5920_v30, 0.0 }
 0x6f0   : > { %v6034_v42 = vmax.f32 %v7784_v49, 0.0  ;;  %v5923_v60 = vpop.f32.mrb[51].mxu1 }
 0x6f1   : > { %v6032_v54 = vmax.f32 %v5923_v60, 0.0 }
 0x6f2   : > { %v6056_v11 = vpack.c.bf16 %v6034_v42, %v6033_v57  ;;  %v6282_v57 = vld [vmem:[#allocation2 + $0x28] sm:$0xff] }
 0x6f3   : > { %v6055_v20 = vpack.c.bf16 %v6032_v54, %v6031_v46 }
 0x6f5   : > { %v7787_v7 = vpop.f32.mrb[52].mxu1  ;;  %7815 = vmatprep.mubr.msk.bf16.mxu0 %vm3019_vm5, %v6055_v20  ;;  %v6287_v20 = vld [vmem:[#allocation2 + $0x50] sm:$0xff] }
 0x6f6   : > { %v5936_v8 = vpop.f32.mrb[53].mxu1  ;;  %7816 = vmatmul.mubr.msk.bf16.gmra.mrb[48].mxu0 %vm3019_vm5, %v6056_v11  ;;  %v6037_v3 = vmax.f32 %v7787_v7, 0.0 }
 0x6f7   : > { %v7788_v27 = vpop.f32.mrb[54].mxu1  ;;  %v6035_v59 = vmax.f32 %v5936_v8, 0.0 }
 0x6f8   : > { %v6038_v34 = vmax.f32 %v7788_v27, 0.0  ;;  %v5939_v0 = vpop.f32.mrb[55].mxu1  ;;  %v6285_v27 = vld [vmem:[#allocation2 + $0x40] sm:$0xff] }
 0x6f9   : > { %v6036_v43 = vmax.f32 %v5939_v0, 0.0  ;;  %v6288_v0 = vld [vmem:[#allocation2 + $0x58] sm:$0xff] }
 0x6fa   : > { %v6058_v51 = vpack.c.bf16 %v6038_v34, %v6037_v3 }
 0x6fb   : > { %v6057_v10 = vpack.c.bf16 %v6036_v43, %v6035_v59 }
 0x6fd   : > { %v7791_v16 = vpop.f32.mrb[56].mxu1  ;;  %7819 = vmatprep.mubr.msk.bf16.mxu0 %vm3019_vm5, %v6057_v10  ;;  %v6286_v10 = vld [vmem:[#allocation2 + $0x48] sm:$0xff] }
 0x6fe   : > { %v5952_v55 = vpop.f32.mrb[57].mxu1  ;;  %7820 = vmatmul.mubr.msk.bf16.gmra.mrb[52].mxu0 %vm3019_vm5, %v6058_v51  ;;  %v6041_v32 = vmax.f32 %v7791_v16, 0.0 }
 0x6ff   : > { %v7792_v21 = vpop.f32.mrb[58].mxu1  ;;  %v6039_v58 = vmax.f32 %v5952_v55, 0.0 }
 0x700   : > { %v6042_v29 = vmax.f32 %v7792_v21, 0.0  ;;  %v5955_v17 = vpop.f32.mrb[59].mxu1 }
 0x701   : > { %v6040_v40 = vmax.f32 %v5955_v17, 0.0  ;;  %v6291_v17 = vld [vmem:[#allocation2 + $0x70] sm:$0xff] }
 0x702   : > { %v6060_v2 = vpack.c.bf16 %v6042_v29, %v6041_v32 }
 0x703   : > { %v6059_v38 = vpack.c.bf16 %v6040_v40, %v6039_v58 }
 0x705   : > { %v7795_v9 = vpop.f32.mrb[60].mxu1  ;;  %7823 = vmatprep.mubr.msk.bf16.mxu0 %vm3019_vm5, %v6059_v38 }
 0x706   : > { %v5968_v33 = vpop.f32.mrb[61].mxu1  ;;  %7824 = vmatmul.mubr.msk.bf16.gmra.mrb[56].mxu0 %vm3019_vm5, %v6060_v2  ;;  %v6045_v61 = vmax.f32 %v7795_v9, 0.0  ;;  %v6289_v2 = vld [vmem:[#allocation2 + $0x60] sm:$0xff] }
 0x707   : > { %v7796_v48 = vpop.f32.mrb[62].mxu1  ;;  %v6043_v31 = vmax.f32 %v5968_v33, 0.0  ;;  %v6292_v33 = vld [vmem:[#allocation2 + $0x78] sm:$0xff] }
 0x708   : > { %v6046_v25 = vmax.f32 %v7796_v48, 0.0  ;;  %v5971_v52 = vpop.f32.mrb[63].mxu1 }
 0x709   : > { %v6044_v15 = vmax.f32 %v5971_v52, 0.0  ;;  %v6290_v52 = vld [vmem:[#allocation2 + $0x68] sm:$0xff] }
 0x70a   : > { %v6062_v14 = vpack.c.bf16 %v6046_v25, %v6045_v61 }
 0x70b   : > { %v6061_v28 = vpack.c.bf16 %v6044_v15, %v6043_v31 }
 0x70d   : > { %7827 = vmatprep.mubr.msk.bf16.mxu0 %vm3019_vm5, %v6061_v28 }
 0x70e   : > { %7828 = vmatmul.mubr.msk.bf16.gmra.mrb[60].mxu0 %vm3019_vm5, %v6062_v14 }
 0x7a9   : > { %v7801_v50 = vpop.f32.mrb[32].mxu0 }
 0x7aa   : > { %v6311_v24 = vadd.f32 %v7801_v50, %v6279_v6  ;;  %v6150_v36 = vpop.f32.mrb[33].mxu0  ;;  %v6295_v6 = vld [vmem:[#allocation2 + $0x90] sm:$0xff] }
 0x7ab   : > { %v6309_v45 = vadd.f32 %v6277_v37, %v6150_v36  ;;  %v7802_v56 = vpop.f32.mrb[34].mxu0  ;;  %v6293_v37 = vld [vmem:[#allocation2 + $0x80] sm:$0xff] }
 0x7ac   : > { %v6343_v62 = vmax.f32 %v6311_v24, 0.0  ;;  %v6312_v5 = vadd.f32 %v7802_v56, %v6280_v39  ;;  %v6153_v44 = vpop.f32.mrb[35].mxu0  ;;  %v6296_v39 = vld [vmem:[#allocation2 + $0x98] sm:$0xff] }
 0x7ad   : > { %v6341_v12 = vmax.f32 %v6309_v45, 0.0  ;;  %v6310_v35 = vadd.f32 %v6278_v18, %v6153_v44  ;;  %v6294_v18 = vld [vmem:[#allocation2 + $0x88] sm:$0xff] }
 0x7ae   : > { %6375 = vst.msk [vmem:[%s9531_s9 + $0x10] sm:$0xff] %vm204_vm1, %v6343_v62  ;;  %v6344_v63 = vmax.f32 %v6312_v5, 0.0 }
 0x7af   : > { %6373 = vst.msk [vmem:[%s9531_s9] sm:$0xff] %vm204_vm1, %v6341_v12  ;;  %v6342_v19 = vmax.f32 %v6310_v35, 0.0 }
 0x7b0   : > { %6376 = vst.msk [vmem:[%s9531_s9 + $0x18] sm:$0xff] %vm204_vm1, %v6344_v63 }
 0x7b1   : > { %6374 = vst.msk [vmem:[%s9531_s9 + $0x8] sm:$0xff] %vm204_vm1, %v6342_v19  ;;  %v7805_v26 = vpop.f32.mrb[36].mxu0 }
 0x7b2   : > { %v6315_v22 = vadd.f32 %v7805_v26, %v6283_v47  ;;  %v6166_v53 = vpop.f32.mrb[37].mxu0  ;;  %v6299_v47 = vld [vmem:[#allocation2 + $0xb0] sm:$0xff] }
 0x7b3   : > { %v6313_v4 = vadd.f32 %v6281_v1, %v6166_v53  ;;  %v7806_v23 = vpop.f32.mrb[38].mxu0  ;;  %v6297_v1 = vld [vmem:[#allocation2 + $0xa0] sm:$0xff] }
 0x7b4   : > { %v6347_v13 = vmax.f32 %v6315_v22, 0.0  ;;  %v6316_v30 = vadd.f32 %v7806_v23, %v6284_v41  ;;  %v6169_v49 = vpop.f32.mrb[39].mxu0  ;;  %v6300_v41 = vld [vmem:[#allocation2 + $0xb8] sm:$0xff] }
 0x7b5   : > { %v6345_v42 = vmax.f32 %v6313_v4, 0.0  ;;  %v6314_v60 = vadd.f32 %v6282_v57, %v6169_v49  ;;  %v6298_v57 = vld [vmem:[#allocation2 + $0xa8] sm:$0xff] }
 0x7b6   : > { %6379 = vst.msk [vmem:[%s9531_s9 + $0x30] sm:$0xff] %vm204_vm1, %v6347_v13  ;;  %v6348_v46 = vmax.f32 %v6316_v30, 0.0 }
 0x7b7   : > { %6377 = vst.msk [vmem:[%s9531_s9 + $0x20] sm:$0xff] %vm204_vm1, %v6345_v42  ;;  %v6346_v54 = vmax.f32 %v6314_v60, 0.0 }
 0x7b8   : > { %6380 = vst.msk [vmem:[%s9531_s9 + $0x38] sm:$0xff] %vm204_vm1, %v6348_v46 }
 0x7b9   : > { %6378 = vst.msk [vmem:[%s9531_s9 + $0x28] sm:$0xff] %vm204_vm1, %v6346_v54  ;;  %v7809_v11 = vpop.f32.mrb[40].mxu0 }
 0x7ba   : > { %v6319_v7 = vadd.f32 %v7809_v11, %v6287_v20  ;;  %v6182_v8 = vpop.f32.mrb[41].mxu0  ;;  %v6303_v20 = vld [vmem:[#allocation2 + $0xd0] sm:$0xff] }
 0x7bb   : > { %v6317_v3 = vadd.f32 %v6285_v27, %v6182_v8  ;;  %v7810_v34 = vpop.f32.mrb[42].mxu0  ;;  %v6301_v27 = vld [vmem:[#allocation2 + $0xc0] sm:$0xff] }
 0x7bc   : > { %v6351_v59 = vmax.f32 %v6319_v7, 0.0  ;;  %v6320_v43 = vadd.f32 %v7810_v34, %v6288_v0  ;;  %v6185_v51 = vpop.f32.mrb[43].mxu0  ;;  %v6304_v0 = vld [vmem:[#allocation2 + $0xd8] sm:$0xff] }
 0x7bd   : > { %v6349_v16 = vmax.f32 %v6317_v3, 0.0  ;;  %v6318_v55 = vadd.f32 %v6286_v10, %v6185_v51  ;;  %v6302_v10 = vld [vmem:[#allocation2 + $0xc8] sm:$0xff] }
 0x7be   : > { %6383 = vst.msk [vmem:[%s9531_s9 + $0x50] sm:$0xff] %vm204_vm1, %v6351_v59  ;;  %v6352_v21 = vmax.f32 %v6320_v43, 0.0 }
 0x7bf   : > { %6381 = vst.msk [vmem:[%s9531_s9 + $0x40] sm:$0xff] %vm204_vm1, %v6349_v16  ;;  %v6350_v32 = vmax.f32 %v6318_v55, 0.0 }
 0x7c0   : > { %6384 = vst.msk [vmem:[%s9531_s9 + $0x58] sm:$0xff] %vm204_vm1, %v6352_v21 }
 0x7c1   : > { %6382 = vst.msk [vmem:[%s9531_s9 + $0x48] sm:$0xff] %vm204_vm1, %v6350_v32  ;;  %v7813_v29 = vpop.f32.mrb[44].mxu0 }
 0x7c2   : > { %v6323_v58 = vadd.f32 %v7813_v29, %v6291_v17  ;;  %v6198_v40 = vpop.f32.mrb[45].mxu0  ;;  %v6307_v17 = vld [vmem:[#allocation2 + $0xf0] sm:$0xff] }
 0x7c3   : > { %v6321_v38 = vadd.f32 %v6289_v2, %v6198_v40  ;;  %v7814_v9 = vpop.f32.mrb[46].mxu0  ;;  %v6305_v2 = vld [vmem:[#allocation2 + $0xe0] sm:$0xff] }
 0x7c4   : > { %v6355_v48 = vmax.f32 %v6323_v58, 0.0  ;;  %v6324_v61 = vadd.f32 %v7814_v9, %v6292_v33  ;;  %v6201_v25 = vpop.f32.mrb[47].mxu0  ;;  %v6308_v33 = vld [vmem:[#allocation2 + $0xf8] sm:$0xff] }
 0x7c5   : > { %v6353_v31 = vmax.f32 %v6321_v38, 0.0  ;;  %v6322_v15 = vadd.f32 %v6290_v52, %v6201_v25  ;;  %v6306_v52 = vld [vmem:[#allocation2 + $0xe8] sm:$0xff] }
 0x7c6   : > { %6387 = vst.msk [vmem:[%s9531_s9 + $0x70] sm:$0xff] %vm204_vm1, %v6355_v48  ;;  %v6356_v14 = vmax.f32 %v6324_v61, 0.0 }
 0x7c7   : > { %6385 = vst.msk [vmem:[%s9531_s9 + $0x60] sm:$0xff] %vm204_vm1, %v6353_v31  ;;  %v6354_v28 = vmax.f32 %v6322_v15, 0.0 }
 0x7c8   : > { %6388 = vst.msk [vmem:[%s9531_s9 + $0x78] sm:$0xff] %vm204_vm1, %v6356_v14 }
 0x7c9   : > { %6386 = vst.msk [vmem:[%s9531_s9 + $0x68] sm:$0xff] %vm204_vm1, %v6354_v28  ;;  %v7817_v50 = vpop.f32.mrb[48].mxu0 }
 0x7ca   : > { %v6327_v24 = vadd.f32 %v7817_v50, %v6295_v6  ;;  %v6214_v36 = vpop.f32.mrb[49].mxu0 }
 0x7cb   : > { %v6325_v45 = vadd.f32 %v6293_v37, %v6214_v36  ;;  %v7818_v56 = vpop.f32.mrb[50].mxu0 }
 0x7cc   : > { %v6359_v62 = vmax.f32 %v6327_v24, 0.0  ;;  %v6328_v5 = vadd.f32 %v7818_v56, %v6296_v39  ;;  %v6217_v44 = vpop.f32.mrb[51].mxu0 }
 0x7cd   : > { %v6357_v12 = vmax.f32 %v6325_v45, 0.0  ;;  %v6326_v35 = vadd.f32 %v6294_v18, %v6217_v44 }
 0x7ce   : > { %6391 = vst.msk [vmem:[%s9531_s9 + $0x90] sm:$0xff] %vm204_vm1, %v6359_v62  ;;  %v6360_v63 = vmax.f32 %v6328_v5, 0.0 }
 0x7cf   : > { %6389 = vst.msk [vmem:[%s9531_s9 + $0x80] sm:$0xff] %vm204_vm1, %v6357_v12  ;;  %v6358_v19 = vmax.f32 %v6326_v35, 0.0 }
 0x7d0   : > { %6392 = vst.msk [vmem:[%s9531_s9 + $0x98] sm:$0xff] %vm204_vm1, %v6360_v63 }
 0x7d1   : > { %6390 = vst.msk [vmem:[%s9531_s9 + $0x88] sm:$0xff] %vm204_vm1, %v6358_v19  ;;  %v7821_v26 = vpop.f32.mrb[52].mxu0 }
 0x7d2   : > { %v6331_v22 = vadd.f32 %v7821_v26, %v6299_v47  ;;  %v6230_v53 = vpop.f32.mrb[53].mxu0 }
 0x7d3   : > { %v6329_v4 = vadd.f32 %v6297_v1, %v6230_v53  ;;  %v7822_v23 = vpop.f32.mrb[54].mxu0 }
 0x7d4   : > { %v6363_v13 = vmax.f32 %v6331_v22, 0.0  ;;  %v6332_v30 = vadd.f32 %v7822_v23, %v6300_v41  ;;  %v6233_v49 = vpop.f32.mrb[55].mxu0 }
 0x7d5   : > { %v6361_v42 = vmax.f32 %v6329_v4, 0.0  ;;  %v6330_v60 = vadd.f32 %v6298_v57, %v6233_v49 }
 0x7d6   : > { %6395 = vst.msk [vmem:[%s9531_s9 + $0xb0] sm:$0xff] %vm204_vm1, %v6363_v13  ;;  %v6364_v46 = vmax.f32 %v6332_v30, 0.0 }
 0x7d7   : > { %6393 = vst.msk [vmem:[%s9531_s9 + $0xa0] sm:$0xff] %vm204_vm1, %v6361_v42  ;;  %v6362_v54 = vmax.f32 %v6330_v60, 0.0 }
 0x7d8   : > { %6396 = vst.msk [vmem:[%s9531_s9 + $0xb8] sm:$0xff] %vm204_vm1, %v6364_v46 }
 0x7d9   : > { %6394 = vst.msk [vmem:[%s9531_s9 + $0xa8] sm:$0xff] %vm204_vm1, %v6362_v54  ;;  %v7825_v11 = vpop.f32.mrb[56].mxu0 }
 0x7da   : > { %v6335_v7 = vadd.f32 %v7825_v11, %v6303_v20  ;;  %v6246_v8 = vpop.f32.mrb[57].mxu0 }
 0x7db   : > { %v6333_v3 = vadd.f32 %v6301_v27, %v6246_v8  ;;  %v7826_v34 = vpop.f32.mrb[58].mxu0 }
 0x7dc   : > { %v6367_v59 = vmax.f32 %v6335_v7, 0.0  ;;  %v6336_v43 = vadd.f32 %v7826_v34, %v6304_v0  ;;  %v6249_v51 = vpop.f32.mrb[59].mxu0 }
 0x7dd   : > { %v6365_v16 = vmax.f32 %v6333_v3, 0.0  ;;  %v6334_v55 = vadd.f32 %v6302_v10, %v6249_v51 }
 0x7de   : > { %6399 = vst.msk [vmem:[%s9531_s9 + $0xd0] sm:$0xff] %vm204_vm1, %v6367_v59  ;;  %v6368_v21 = vmax.f32 %v6336_v43, 0.0 }
 0x7df   : > { %6397 = vst.msk [vmem:[%s9531_s9 + $0xc0] sm:$0xff] %vm204_vm1, %v6365_v16  ;;  %v6366_v32 = vmax.f32 %v6334_v55, 0.0 }
 0x7e0   : > { %6400 = vst.msk [vmem:[%s9531_s9 + $0xd8] sm:$0xff] %vm204_vm1, %v6368_v21 }
 0x7e1   : > { %6398 = vst.msk [vmem:[%s9531_s9 + $0xc8] sm:$0xff] %vm204_vm1, %v6366_v32  ;;  %v7829_v29 = vpop.f32.mrb[60].mxu0 }
 0x7e2   : > { %v6339_v58 = vadd.f32 %v7829_v29, %v6307_v17  ;;  %v6262_v40 = vpop.f32.mrb[61].mxu0 }
 0x7e3   : > { %v6337_v38 = vadd.f32 %v6305_v2, %v6262_v40  ;;  %v7830_v9 = vpop.f32.mrb[62].mxu0 }
 0x7e4   : > { %v6371_v48 = vmax.f32 %v6339_v58, 0.0  ;;  %v6340_v61 = vadd.f32 %v7830_v9, %v6308_v33  ;;  %v6265_v25 = vpop.f32.mrb[63].mxu0 }
 0x7e5   : > { %v6369_v31 = vmax.f32 %v6337_v38, 0.0  ;;  %v6338_v15 = vadd.f32 %v6306_v52, %v6265_v25 }
 0x7e6   : > { %6403 = vst.msk [vmem:[%s9531_s9 + $0xf0] sm:$0xff] %vm204_vm1, %v6371_v48  ;;  %v6372_v14 = vmax.f32 %v6340_v61, 0.0 }
 0x7e7   : > { %6401 = vst.msk [vmem:[%s9531_s9 + $0xe0] sm:$0xff] %vm204_vm1, %v6369_v31  ;;  %v6370_v28 = vmax.f32 %v6338_v15, 0.0 }
 0x7e8   : > { %6404 = vst.msk [vmem:[%s9531_s9 + $0xf8] sm:$0xff] %vm204_vm1, %v6372_v14 }
 0x7e9   : > { %6402 = vst.msk [vmem:[%s9531_s9 + $0xe8] sm:$0xff] %vm204_vm1, %v6370_v28 }
 0x7ea PF: > { %s13_s12 = sadd.s32 1, %s8386_s12  }
 0x7eb   : > { %p10_p4 = scmp.ge.s32.totalorder %s13_s12, 4  }
 0x7ed   :  { %12 = sbr.rel (!%p10_p4) target bundleno = 1 (0x1), region = 67 }

</bundles_post_ra>
